<compile_context>
chip_gen: v7x
topology: tpu7x:2x2x1
jax: 0.10.0
libtpu: 0.0.40
codegen_flags: <defaults>
</compile_context>

<pallas_src>
import math

import jax
import jax.numpy as jnp
from jax import lax
from jax.experimental import pallas as pl
from jax.experimental.pallas import tpu as pltpu

_SUB = 8       # sublane granularity
_LANE = 128    # lane granularity


# ----------------------------- math helpers (used in kernels AND reference) --
def _sigmoid(x):
    return 1.0 / (1.0 + jnp.exp(-x))


def _silu(x):
    return x * _sigmoid(x)


def _softplus(x):
    return jnp.maximum(x, 0.0) + jnp.log(1.0 + jnp.exp(-jnp.abs(x)))


# ------------------------------------------- generation-aware VMEM budgets ---
_VMEM_LIMIT_CACHE = None


def _vmem_limit():
    """~3/4 of physical VMEM (96 MiB on 128 MiB v5e/v6e, 48 MiB on 64 MiB v7x),
    capped at 100 MiB; conservative fallback if the query is unavailable."""
    global _VMEM_LIMIT_CACHE
    if _VMEM_LIMIT_CACHE is None:
        cap = 64 * 1024 * 1024
        try:
            cap = int(pltpu.get_tpu_info().vmem_capacity_bytes)
        except Exception:
            pass
        _VMEM_LIMIT_CACHE = min(cap * 3 // 4, 100 * 1024 * 1024)
    return _VMEM_LIMIT_CACHE


def _cparams(dims):
    return pltpu.CompilerParams(dimension_semantics=dims,
                                vmem_limit_bytes=_vmem_limit())


def _pick(dim, target, align):
    """Largest legal tile <= target for a dimension of size `dim`."""
    if dim <= target:
        return dim                      # full extent is always legal
    return max(align, (target // align) * align)


def _matmul_tiles(rows, k, n_out, itemsize):
    """Row/N tiles for the mem-bound projections; shrink (N first) while the
    double-buffered x/w/out tiles exceed half the per-generation VMEM budget."""
    budget = _vmem_limit() // 2
    tm = _pick(rows, 512, _SUB)
    tn = _pick(n_out, 512, _LANE)

    def footprint(tm_, tn_):
        return 2 * itemsize * (tm_ * k + k * tn_ + tm_ * tn_)

    while footprint(tm, tn) > budget:
        if tn > _LANE:
            tn = max(_LANE, (tn // 2 // _LANE) * _LANE)
        elif tm > _SUB:
            tm = max(_SUB, (tm // 2 // _SUB) * _SUB)
        else:
            break
    return tm, tn


def _channel_tile(d_inner, target=512):
    """Channel tile for the depthwise conv: must divide d_inner and be either
    lane-aligned or the full extent."""
    if d_inner <= target:
        return d_inner
    td = (target // _LANE) * _LANE
    while td > _LANE and d_inner % td != 0:
        td -= _LANE
    return td if d_inner % td == 0 else d_inner


def _time_tile(l, target):
    if l <= target:
        return l
    return (target // _SUB) * _SUB


def _scan_time_tile(l, d_inner, itemsize):
    budget = _vmem_limit() // 2
    tt = _time_tile(l, 256)
    per_row = (3 * 2 * itemsize + 4) * d_inner  # u/res/y double-buffered + delta scratch
    while tt > _SUB and tt < l and tt * per_row > budget:
        tt = max(_SUB, (tt // 2 // _SUB) * _SUB)
    return tt


# ----------------------------------------------------------------- kernels ---
def _in_proj_kernel(x_ref, wxT_ref, wrT_ref, xo_ref, ro_ref):
    # One read of the x row-tile, two projected output tiles (x / res branch).
    x = x_ref[...]
    xo_ref[...] = jnp.dot(x, wxT_ref[...],
                          preferred_element_type=jnp.float32).astype(xo_ref.dtype)
    ro_ref[...] = jnp.dot(x, wrT_ref[...],
                          preferred_element_type=jnp.float32).astype(ro_ref.dtype)


def _linear_kernel(x_ref, wT_ref, o_ref):
    o_ref[...] = jnp.dot(x_ref[...], wT_ref[...],
                         preferred_element_type=jnp.float32).astype(o_ref.dtype)


def _conv_silu_kernel(x_ref, w_ref, b_ref, o_ref, hist_ref):
    """Causal depthwise conv1d + bias + SiLU for one (batch, channel-tile,
    time-chunk) block.  The last d_conv-1 input rows are carried across time
    chunks in VMEM scratch (zeros at time-chunk 0 == the causal left pad)."""
    f32 = jnp.float32
    tt, td = o_ref.shape
    k_taps = w_ref.shape[0]

    @pl.when(pl.program_id(2) == 0)
    def _():
        hist_ref[...] = jnp.zeros_like(hist_ref)

    x = x_ref[...].astype(f32)
    if k_taps > 1:
        xpad = jnp.concatenate([hist_ref[...], x], axis=0)   # (tt + k - 1, td)
        hist_ref[...] = xpad[tt:tt + k_taps - 1, :]           # carry last k-1 rows
    else:
        xpad = x
    acc = jnp.zeros((tt, td), f32)
    for k in range(k_taps):                                   # static tiny loop
        acc = acc + w_ref[k:k + 1, :].astype(f32) * xpad[k:k + tt, :]
    o_ref[...] = _silu(acc + b_ref[...].astype(f32)).astype(o_ref.dtype)


def _scan_kernel(xc_ref, res_ref, wdT_ref, wdtT_ref, bdt_ref, wbT_ref, wcT_ref,
                 aT_ref, d_ref, y_ref, h_ref, delta_ref, bmat_ref, cmat_ref):
    """Fused x_proj + dt_proj + softplus + selective scan + D*u skip +
    SiLU(res) gate for one (batch, time-chunk) block.  SSM state h (n, d_in)
    is carried across time chunks in VMEM scratch."""
    f32 = jnp.float32
    tt, d_in = y_ref.shape
    n = aT_ref.shape[0]

    @pl.when(pl.program_id(1) == 0)
    def _():
        h_ref[...] = jnp.zeros_like(h_ref)

    # Chunk-level projections (MXU, off the serial h-dependency chain).
    # delta / B / C are staged in VMEM scratch and never round-trip HBM.
    xc = xc_ref[...]
    dlow = jnp.dot(xc, wdT_ref[...], preferred_element_type=f32)
    delta_ref[...] = _softplus(
        jnp.dot(dlow, wdtT_ref[...], preferred_element_type=f32)
        + bdt_ref[...].astype(f32))
    bmat_ref[...] = jnp.dot(xc, wbT_ref[...], preferred_element_type=f32)
    cmat_ref[...] = jnp.dot(xc, wcT_ref[...], preferred_element_type=f32)

    a_t = aT_ref[...].astype(f32)                 # (n, d_in) == (-exp(A_log)).T
    d_row = d_ref[...].astype(f32)                # (1, d_in)
    # Hoisted constants (never rebuilt inside the loop).
    eye = (lax.broadcasted_iota(jnp.int32, (n, n), 0)
           == lax.broadcasted_iota(jnp.int32, (n, n), 1)).astype(f32)
    ones_nd = jnp.ones((n, d_in), f32)

    def one_step(t, h):
        delta_t = delta_ref[pl.ds(t, 1), :]               # (1, d_in) f32
        u_t = xc_ref[pl.ds(t, 1), :].astype(f32)          # (1, d_in)
        b_t = bmat_ref[pl.ds(t, 1), :]                    # (1, n)
        c_t = cmat_ref[pl.ds(t, 1), :]                    # (1, n)
        res_t = res_ref[pl.ds(t, 1), :].astype(f32)       # (1, d_in)

        dA = jnp.exp(delta_t * a_t)                       # (n, d_in)   EUP
        # b_bcast[i, :] == B_t[i]; tiny diag matmul, no per-step (n,d_in) copy.
        b_bcast = jnp.dot(eye * b_t, ones_nd, preferred_element_type=f32)
        h = dA * h + b_bcast * (delta_t * u_t)            # (n, d_in)   VPU FMAs
        y_t = jnp.dot(c_t, h, preferred_element_type=f32)  # (1, d_in)  C-contraction
        y_row = (y_t + u_t * d_row) * _silu(res_t)        # D-skip + SiLU(res) gate
        return h, y_row

    n_slab = tt // _SUB
    rem = tt - n_slab * _SUB

    def slab(s, h):
        # 8 unrolled steps; y written back as one full-sublane (8, d_in) slab.
        base = pl.multiple_of(s * _SUB, _SUB)
        rows = []
        for j in range(_SUB):
            h, y_row = one_step(base + j, h)
            rows.append(y_row)
        y_ref[pl.ds(base, _SUB), :] = jnp.concatenate(rows, axis=0).astype(y_ref.dtype)
        return h

    h = h_ref[...]
    if n_slab > 0:
        h = lax.fori_loop(0, n_slab, slab, h)
    for j in range(rem):                                  # static ragged tail
        t = n_slab * _SUB + j
        h, y_row = one_step(t, h)
        y_ref[pl.ds(t, 1), :] = y_row.astype(y_ref.dtype)
    h_ref[...] = h


# ---------------------------------------------------------------- wrappers ---
def _in_proj(x2, wxT, wrT):
    rows, d_model = x2.shape
    d_inner = wxT.shape[1]
    tm, tn = _matmul_tiles(rows, d_model, d_inner, x2.dtype.itemsize)
    grid = (pl.cdiv(rows, tm), pl.cdiv(d_inner, tn))
    return pl.pallas_call(
        _in_proj_kernel,
        out_shape=(jax.ShapeDtypeStruct((rows, d_inner), x2.dtype),
                   jax.ShapeDtypeStruct((rows, d_inner), x2.dtype)),
        grid_spec=pltpu.PrefetchScalarGridSpec(
            num_scalar_prefetch=0, grid=grid,
            in_specs=[pl.BlockSpec((tm, d_model), lambda i, j: (i, 0)),
                      pl.BlockSpec((d_model, tn), lambda i, j: (0, j)),
                      pl.BlockSpec((d_model, tn), lambda i, j: (0, j))],
            out_specs=(pl.BlockSpec((tm, tn), lambda i, j: (i, j)),
                       pl.BlockSpec((tm, tn), lambda i, j: (i, j)))),
        compiler_params=_cparams(("parallel", "parallel")),
    )(x2, wxT, wrT)


def _linear(x2, wT):
    rows, k = x2.shape
    n_out = wT.shape[1]
    tm, tn = _matmul_tiles(rows, k, n_out, x2.dtype.itemsize)
    grid = (pl.cdiv(rows, tm), pl.cdiv(n_out, tn))
    return pl.pallas_call(
        _linear_kernel,
        out_shape=jax.ShapeDtypeStruct((rows, n_out), x2.dtype),
        grid_spec=pltpu.PrefetchScalarGridSpec(
            num_scalar_prefetch=0, grid=grid,
            in_specs=[pl.BlockSpec((tm, k), lambda i, j: (i, 0)),
                      pl.BlockSpec((k, tn), lambda i, j: (0, j))],
            out_specs=pl.BlockSpec((tm, tn), lambda i, j: (i, j))),
        compiler_params=_cparams(("parallel", "parallel")),
    )(x2, wT)


def _conv_silu(x_in, conv_wT, conv_b):
    b, l, d_in = x_in.shape
    k_taps = conv_wT.shape[0]
    td = _channel_tile(d_in)
    tt = _time_tile(l, 512)
    grid = (b, d_in // td, pl.cdiv(l, tt))
    return pl.pallas_call(
        _conv_silu_kernel,
        out_shape=jax.ShapeDtypeStruct((b, l, d_in), x_in.dtype),
        grid_spec=pltpu.PrefetchScalarGridSpec(
            num_scalar_prefetch=0, grid=grid,
            in_specs=[pl.BlockSpec((None, tt, td), lambda bi, di, ti: (bi, ti, di)),
                      pl.BlockSpec((k_taps, td), lambda bi, di, ti: (0, di)),
                      pl.BlockSpec((1, td), lambda bi, di, ti: (0, di))],
            out_specs=pl.BlockSpec((None, tt, td), lambda bi, di, ti: (bi, ti, di)),
            scratch_shapes=[pltpu.VMEM((max(k_taps - 1, 1), td), jnp.float32)]),
        compiler_params=_cparams(("parallel", "parallel", "arbitrary")),
    )(x_in, conv_wT, conv_b)


def _selective_scan(xc, res, wp):
    b, l, d_in = xc.shape
    n = wp["aT"].shape[0]
    tt = _scan_time_tile(l, d_in, xc.dtype.itemsize)
    grid = (b, pl.cdiv(l, tt))

    def full(a):
        return pl.BlockSpec(a.shape, lambda bi, ti: (0,) * a.ndim)

    def blk():
        return pl.BlockSpec((None, tt, d_in), lambda bi, ti: (bi, ti, 0))

    return pl.pallas_call(
        _scan_kernel,
        out_shape=jax.ShapeDtypeStruct((b, l, d_in), xc.dtype),
        grid_spec=pltpu.PrefetchScalarGridSpec(
            num_scalar_prefetch=0, grid=grid,
            in_specs=[blk(), blk(),
                      full(wp["w_dT"]), full(wp["w_dtT"]), full(wp["b_dt"]),
                      full(wp["w_bT"]), full(wp["w_cT"]),
                      full(wp["aT"]), full(wp["d_row"])],
            out_specs=blk(),
            scratch_shapes=[pltpu.VMEM((n, d_in), jnp.float32),   # SSM state h
                            pltpu.VMEM((tt, d_in), jnp.float32),  # delta chunk
                            pltpu.VMEM((tt, n), jnp.float32),     # B chunk
                            pltpu.VMEM((tt, n), jnp.float32)]),   # C chunk
        compiler_params=_cparams(("parallel", "arbitrary")),
    )(xc, res, wp["w_dT"], wp["w_dtT"], wp["b_dt"], wp["w_bT"], wp["w_cT"],
      wp["aT"], wp["d_row"])


# -------------------------------------------------------- parameter prep -----
def prepare_params(p, *, d_state, dt_rank):
    """One-time (outside jit) transpose / slice of the PyTorch-layout params
    into kernel-ready layouts, so no per-forward weight copies are made."""
    d_inner = p["d"].shape[0]
    f32 = jnp.float32
    return {
        "w_in_xT": jnp.transpose(p["w_in"][:d_inner, :]),        # (d_model, d_inner)
        "w_in_rT": jnp.transpose(p["w_in"][d_inner:, :]),        # (d_model, d_inner)
        "conv_wT": jnp.transpose(p["conv_w"][:, 0, :]),          # (d_conv, d_inner)
        "conv_b": p["conv_b"].reshape(1, d_inner),
        "w_dT": jnp.transpose(p["w_x"][:dt_rank, :]),            # (d_inner, dt_rank)
        "w_bT": jnp.transpose(p["w_x"][dt_rank:dt_rank + d_state, :]),   # (d_inner, n)
        "w_cT": jnp.transpose(p["w_x"][dt_rank + d_state:, :]),          # (d_inner, n)
        "w_dtT": jnp.transpose(p["w_dt"]),                       # (dt_rank, d_inner)
        "b_dt": p["b_dt"].reshape(1, d_inner),
        "aT": jnp.transpose(-jnp.exp(p["a_log"].astype(f32))),   # (n, d_inner)
        "d_row": p["d"].reshape(1, d_inner).astype(f32),
        "w_outT": jnp.transpose(p["w_out"]),                     # (d_inner, d_model)
    }


# -------------------------------------------------------- MambaBlock.forward -
def mamba_block_forward(x, wp):
    """x: (b, l, d_model) -> (b, l, d_model).  Matches MambaBlock.forward.
    `wp` is the pre-transposed parameter dict from prepare_params()."""
    b, l, d_model = x.shape
    d_inner = wp["d_row"].shape[1]

    # in_proj (bias=False, Mamba default) -> x-branch / res-branch.
    x2 = x.reshape(b * l, d_model)
    x_in2, res2 = _in_proj(x2, wp["w_in_xT"], wp["w_in_rT"])
    # NOTE: `gate = x * (1 - sigmoid(res))` in the reference forward is dead code.

    # causal depthwise conv1d + bias + SiLU.
    xc = _conv_silu(x_in2.reshape(b, l, d_inner), wp["conv_wT"], wp["conv_b"])

    # fused x_proj + dt_proj + softplus + selective scan + D*u skip + SiLU gate.
    y = _selective_scan(xc, res2.reshape(b, l, d_inner), wp)

    # out_proj (bias=False).
    out2 = _linear(y.reshape(b * l, d_inner), wp["w_outT"])
    return out2.reshape(b, l, d_model)


# -------------------------------------------------------------- pure-JAX ref -
def ref_forward(x, p, *, d_state, dt_rank):
    b, l, d_model = x.shape
    d_inner = p["d"].shape[0]
    d_conv = p["conv_w"].shape[-1]

    xz = jnp.einsum("bld,ed->ble", x, p["w_in"])
    x_in, res = xz[..., :d_inner], xz[..., d_inner:]

    xpad = jnp.pad(x_in, ((0, 0), (d_conv - 1, 0), (0, 0)))
    xc = sum(p["conv_w"][:, 0, k][None, None, :] * xpad[:, k:k + l, :]
             for k in range(d_conv))
    xc = _silu(xc + p["conv_b"][None, None, :])

    x_dbl = jnp.einsum("bld,ed->ble", xc, p["w_x"])
    delta_low = x_dbl[..., :dt_rank]
    B = x_dbl[..., dt_rank:dt_rank + d_state]
    C = x_dbl[..., dt_rank + d_state:]
    delta = _softplus(jnp.einsum("blr,dr->bld", delta_low, p["w_dt"])
                      + p["b_dt"][None, None, :])

    A = -jnp.exp(p["a_log"].astype(jnp.float32))
    dA = jnp.exp(jnp.einsum("bld,dn->bldn", delta, A))
    dBu = jnp.einsum("bld,bln,bld->bldn", delta, B, xc)
    h = jnp.zeros((b, d_inner, d_state), jnp.float32)
    ys = []
    for t in range(l):
        h = dA[:, t] * h + dBu[:, t]
        ys.append(jnp.einsum("bdn,bn->bd", h, C[:, t]))
    y = jnp.stack(ys, axis=1) + xc * p["d"][None, None, :]
    y = y * _silu(res)
    return jnp.einsum("bld,ed->ble", y, p["w_out"])


# --------------------------------------------------------------------- main --
if __name__ == "__main__":
    jax.config.update("jax_default_matmul_precision", "highest")

    batch, seqlen = 2, 8
    d_model, d_state, d_conv = 32, 16, 4
    d_inner = 2 * d_model                       # expand = 2
    dt_rank = max(1, math.ceil(d_model / 16))   # = 2

    key = jax.random.PRNGKey(0)
    ks = jax.random.split(key, 8)
    x = jax.random.normal(ks[0], (batch, seqlen, d_model), jnp.float32)

    params = {
        "w_in": jax.random.normal(ks[1], (2 * d_inner, d_model), jnp.float32)
                / math.sqrt(d_model),
        "conv_w": jax.random.normal(ks[2], (d_inner, 1, d_conv), jnp.float32)
                  / math.sqrt(d_conv),
        "conv_b": 0.1 * jax.random.normal(ks[3], (d_inner,), jnp.float32),
        "w_x": jax.random.normal(ks[4], (dt_rank + 2 * d_state, d_inner),
                                 jnp.float32) / math.sqrt(d_inner),
        "w_dt": jax.random.normal(ks[5], (d_inner, dt_rank), jnp.float32)
                / math.sqrt(dt_rank),
        "b_dt": 0.1 * jax.random.normal(ks[6], (d_inner,), jnp.float32),
        "a_log": jnp.log(jnp.broadcast_to(
            jnp.arange(1, d_state + 1, dtype=jnp.float32),
            (d_inner, d_state))),
        "d": jnp.ones((d_inner,), jnp.float32),
        "w_out": jax.random.normal(ks[7], (d_model, d_inner), jnp.float32)
                 / math.sqrt(d_inner),
    }

    wp = prepare_params(params, d_state=d_state, dt_rank=dt_rank)

    fwd = jax.jit(mamba_block_forward)
    out = fwd(x, wp)
    jax.block_until_ready(out)

    ref = ref_forward(x, params, d_state=d_state, dt_rank=dt_rank)
    max_err = float(jnp.max(jnp.abs(out - ref)))
    assert out.shape == (batch, seqlen, d_model)
    assert jnp.allclose(out, ref, atol=2e-3, rtol=2e-3), (
        f"mismatch vs reference (max abs err {max_err})")

    print("KERNEL_OK")
</pallas_src>

<mosaic_0001>
module attributes {stable_mosaic.version = 11 : i64} {
  func.func @_conv_silu_kernel(%arg0: i32, %arg1: i32, %arg2: i32, %arg3: memref<1x8x64xf32, #tpu.memory_space<vmem>>, %arg4: memref<4x64xf32, #tpu.memory_space<vmem>>, %arg5: memref<1x64xf32, #tpu.memory_space<vmem>>, %arg6: memref<1x8x64xf32, #tpu.memory_space<vmem>>, %arg7: memref<3x64xf32, #tpu.memory_space<vmem>>) attributes {dimension_semantics = [#tpu.dimension_semantics<parallel>, #tpu.dimension_semantics<parallel>, #tpu.dimension_semantics<arbitrary>], iteration_bounds = array<i64: 2, 1, 1>, scalar_prefetch = 0 : i64, scratch_operands = 1 : i64, tpu.core_type = #tpu.core_type<tc>, window_params = [{transform_indices = @transform_0, window_bounds = array<i64: 1, 8, 64>}, {transform_indices = @transform_1, window_bounds = array<i64: 4, 64>}, {transform_indices = @transform_2, window_bounds = array<i64: 1, 64>}, {transform_indices = @transform_3, window_bounds = array<i64: 1, 8, 64>}]} {
    %c0_i32 = arith.constant 0 : i32
    %0 = arith.cmpi eq, %arg2, %c0_i32 : i32
    %1 = arith.extui %0 : i1 to i32
    %c0_i32_0 = arith.constant 0 : i32
    %2 = arith.cmpi ne, %1, %c0_i32_0 : i32
    scf.if %2 {
      %cst_20 = arith.constant 0.000000e+00 : f32
      %44 = vector.broadcast %cst_20 : f32 to vector<3x64xf32>
      %c0_21 = arith.constant 0 : index
      %c0_22 = arith.constant 0 : index
      %45 = vector.load %arg7[%c0_21, %c0_22] : memref<3x64xf32, #tpu.memory_space<vmem>>, vector<3x64xf32>
      tpu.vector_store %arg7[%c0_21, %c0_22], %44 {strides = array<i32>} : memref<3x64xf32, #tpu.memory_space<vmem>>, vector<3x64xf32>,
    } else {
    }
    %c0 = arith.constant 0 : index
    %c0_1 = arith.constant 0 : index
    %c0_2 = arith.constant 0 : index
    %3 = vector.load %arg3[%c0, %c0_1, %c0_2] : memref<1x8x64xf32, #tpu.memory_space<vmem>>, vector<1x8x64xf32>
    %4 = vector.shape_cast %3 : vector<1x8x64xf32> to vector<8x64xf32>
    %c0_3 = arith.constant 0 : index
    %c0_4 = arith.constant 0 : index
    %5 = vector.load %arg7[%c0_3, %c0_4] : memref<3x64xf32, #tpu.memory_space<vmem>>, vector<3x64xf32>
    %6 = tpu.concatenate %5, %4 in 0 : vector<3x64xf32>, vector<8x64xf32> -> vector<11x64xf32>
    %7 = vector.extract_strided_slice %6 {offsets = [8, 0], sizes = [3, 64], strides = [1, 1]} : vector<11x64xf32> to vector<3x64xf32>
    %c0_5 = arith.constant 0 : index
    %c0_6 = arith.constant 0 : index
    %8 = vector.load %arg7[%c0_5, %c0_6] : memref<3x64xf32, #tpu.memory_space<vmem>>, vector<3x64xf32>
    tpu.vector_store %arg7[%c0_5, %c0_6], %7 {strides = array<i32>} : memref<3x64xf32, #tpu.memory_space<vmem>>, vector<3x64xf32>,
    %cst = arith.constant 0.000000e+00 : f32
    %9 = vector.broadcast %cst : f32 to vector<8x64xf32>
    %c0_7 = arith.constant 0 : index
    %c0_8 = arith.constant 0 : index
    %10 = vector.load %arg4[%c0_7, %c0_8] : memref<4x64xf32, #tpu.memory_space<vmem>>, vector<1x64xf32>
    %11 = vector.extract_strided_slice %6 {offsets = [0, 0], sizes = [8, 64], strides = [1, 1]} : vector<11x64xf32> to vector<8x64xf32>
    %12 = vector.broadcast %10 : vector<1x64xf32> to vector<8x64xf32>
    %13 = arith.mulf %12, %11 : vector<8x64xf32>
    %14 = arith.addf %9, %13 : vector<8x64xf32>
    %c1 = arith.constant 1 : index
    %c0_9 = arith.constant 0 : index
    %15 = vector.load %arg4[%c1, %c0_9] : memref<4x64xf32, #tpu.memory_space<vmem>>, vector<1x64xf32>
    %16 = vector.extract_strided_slice %6 {offsets = [1, 0], sizes = [8, 64], strides = [1, 1]} : vector<11x64xf32> to vector<8x64xf32>
    %17 = vector.broadcast %15 : vector<1x64xf32> to vector<8x64xf32>
    %18 = arith.mulf %17, %16 : vector<8x64xf32>
    %19 = arith.addf %14, %18 : vector<8x64xf32>
    %c2 = arith.constant 2 : index
    %c0_10 = arith.constant 0 : index
    %20 = vector.load %arg4[%c2, %c0_10] : memref<4x64xf32, #tpu.memory_space<vmem>>, vector<1x64xf32>
    %21 = vector.extract_strided_slice %6 {offsets = [2, 0], sizes = [8, 64], strides = [1, 1]} : vector<11x64xf32> to vector<8x64xf32>
    %22 = vector.broadcast %20 : vector<1x64xf32> to vector<8x64xf32>
    %23 = arith.mulf %22, %21 : vector<8x64xf32>
    %24 = arith.addf %19, %23 : vector<8x64xf32>
    %c3 = arith.constant 3 : index
    %c0_11 = arith.constant 0 : index
    %25 = vector.load %arg4[%c3, %c0_11] : memref<4x64xf32, #tpu.memory_space<vmem>>, vector<1x64xf32>
    %26 = vector.extract_strided_slice %6 {offsets = [3, 0], sizes = [8, 64], strides = [1, 1]} : vector<11x64xf32> to vector<8x64xf32>
    %27 = vector.broadcast %25 : vector<1x64xf32> to vector<8x64xf32>
    %28 = arith.mulf %27, %26 : vector<8x64xf32>
    %29 = arith.addf %24, %28 : vector<8x64xf32>
    %c0_12 = arith.constant 0 : index
    %c0_13 = arith.constant 0 : index
    %30 = vector.load %arg5[%c0_12, %c0_13] : memref<1x64xf32, #tpu.memory_space<vmem>>, vector<1x64xf32>
    %31 = vector.broadcast %30 : vector<1x64xf32> to vector<8x64xf32>
    %32 = arith.addf %29, %31 : vector<8x64xf32>
    %cst_14 = arith.constant 0.000000e+00 : f32
    %33 = vector.broadcast %cst_14 : f32 to vector<8x64xf32>
    %34 = arith.subf %33, %32 : vector<8x64xf32>
    %35 = math.exp %34 : vector<8x64xf32>
    %cst_15 = arith.constant 1.000000e+00 : f32
    %36 = vector.broadcast %cst_15 : f32 to vector<8x64xf32>
    %37 = arith.addf %36, %35 : vector<8x64xf32>
    %cst_16 = arith.constant 1.000000e+00 : f32
    %38 = vector.broadcast %cst_16 : f32 to vector<8x64xf32>
    %39 = arith.divf %38, %37 : vector<8x64xf32>
    %40 = arith.mulf %32, %39 : vector<8x64xf32>
    %c0_17 = arith.constant 0 : index
    %c0_18 = arith.constant 0 : index
    %c0_19 = arith.constant 0 : index
    %41 = vector.load %arg6[%c0_17, %c0_18, %c0_19] : memref<1x8x64xf32, #tpu.memory_space<vmem>>, vector<1x8x64xf32>
    %42 = vector.shape_cast %41 : vector<1x8x64xf32> to vector<8x64xf32>
    %43 = vector.shape_cast %40 : vector<8x64xf32> to vector<1x8x64xf32>
    tpu.vector_store %arg6[%c0_17, %c0_18, %c0_19], %43 {strides = array<i32>} : memref<1x8x64xf32, #tpu.memory_space<vmem>>, vector<1x8x64xf32>,
    return
  }
  func.func @transform_0(%arg0: i32, %arg1: i32, %arg2: i32) -> (i32, i32, i32) {
    %c0_i32 = arith.constant 0 : i32
    return %arg0, %arg2, %arg1 : i32, i32, i32
  }
  func.func @transform_1(%arg0: i32, %arg1: i32, %arg2: i32) -> (i32, i32) {
    %c0_i32 = arith.constant 0 : i32
    %c0_i32_0 = arith.constant 0 : i32
    return %c0_i32, %arg1 : i32, i32
  }
  func.func @transform_2(%arg0: i32, %arg1: i32, %arg2: i32) -> (i32, i32) {
    %c0_i32 = arith.constant 0 : i32
    %c0_i32_0 = arith.constant 0 : i32
    return %c0_i32, %arg1 : i32, i32
  }
  func.func @transform_3(%arg0: i32, %arg1: i32, %arg2: i32) -> (i32, i32, i32) {
    %c0_i32 = arith.constant 0 : i32
    return %arg0, %arg2, %arg1 : i32, i32, i32
  }
}

module attributes {stable_mosaic.version = 11 : i64} {
  func.func @_in_proj_kernel(%arg0: i32, %arg1: i32, %arg2: memref<16x32xf32, #tpu.memory_space<vmem>>, %arg3: memref<32x64xf32, #tpu.memory_space<vmem>>, %arg4: memref<32x64xf32, #tpu.memory_space<vmem>>, %arg5: memref<16x64xf32, #tpu.memory_space<vmem>>, %arg6: memref<16x64xf32, #tpu.memory_space<vmem>>) attributes {dimension_semantics = [#tpu.dimension_semantics<parallel>, #tpu.dimension_semantics<parallel>], iteration_bounds = array<i64: 1, 1>, scalar_prefetch = 0 : i64, scratch_operands = 0 : i64, tpu.core_type = #tpu.core_type<tc>, window_params = [{transform_indices = @transform_0, window_bounds = array<i64: 16, 32>}, {transform_indices = @transform_1, window_bounds = array<i64: 32, 64>}, {transform_indices = @transform_2, window_bounds = array<i64: 32, 64>}, {transform_indices = @transform_3, window_bounds = array<i64: 16, 64>}, {transform_indices = @transform_4, window_bounds = array<i64: 16, 64>}]} {
    %c0 = arith.constant 0 : index
    %c0_0 = arith.constant 0 : index
    %0 = vector.load %arg2[%c0, %c0_0] : memref<16x32xf32, #tpu.memory_space<vmem>>, vector<16x32xf32>
    %c0_1 = arith.constant 0 : index
    %c0_2 = arith.constant 0 : index
    %1 = vector.load %arg3[%c0_1, %c0_2] : memref<32x64xf32, #tpu.memory_space<vmem>>, vector<32x64xf32>
    %cst = arith.constant dense<0.000000e+00> : vector<16x64xf32>
    %2 = tpu.matmul %0, %1, %cst {dimension_numbers = #tpu.dot_dimension_numbers<[1], [0], [0], [1], [0, 0, 1, 1], [], []>, precision = #tpu.contract_precision<fp32>} : vector<16x32xf32>, vector<32x64xf32>, vector<16x64xf32> -> vector<16x64xf32>
    %c0_3 = arith.constant 0 : index
    %c0_4 = arith.constant 0 : index
    %3 = vector.load %arg5[%c0_3, %c0_4] : memref<16x64xf32, #tpu.memory_space<vmem>>, vector<16x64xf32>
    tpu.vector_store %arg5[%c0_3, %c0_4], %2 {strides = array<i32>} : memref<16x64xf32, #tpu.memory_space<vmem>>, vector<16x64xf32>,
    %c0_5 = arith.constant 0 : index
    %c0_6 = arith.constant 0 : index
    %4 = vector.load %arg4[%c0_5, %c0_6] : memref<32x64xf32, #tpu.memory_space<vmem>>, vector<32x64xf32>
    %cst_7 = arith.constant dense<0.000000e+00> : vector<16x64xf32>
    %5 = tpu.matmul %0, %4, %cst_7 {dimension_numbers = #tpu.dot_dimension_numbers<[1], [0], [0], [1], [0, 0, 1, 1], [], []>, precision = #tpu.contract_precision<fp32>} : vector<16x32xf32>, vector<32x64xf32>, vector<16x64xf32> -> vector<16x64xf32>
    %c0_8 = arith.constant 0 : index
    %c0_9 = arith.constant 0 : index
    %6 = vector.load %arg6[%c0_8, %c0_9] : memref<16x64xf32, #tpu.memory_space<vmem>>, vector<16x64xf32>
    tpu.vector_store %arg6[%c0_8, %c0_9], %5 {strides = array<i32>} : memref<16x64xf32, #tpu.memory_space<vmem>>, vector<16x64xf32>,
    return
  }
  func.func @transform_0(%arg0: i32, %arg1: i32) -> (i32, i32) {
    %c0_i32 = arith.constant 0 : i32
    %c0_i32_0 = arith.constant 0 : i32
    return %arg0, %c0_i32 : i32, i32
  }
  func.func @transform_1(%arg0: i32, %arg1: i32) -> (i32, i32) {
    %c0_i32 = arith.constant 0 : i32
    %c0_i32_0 = arith.constant 0 : i32
    return %c0_i32, %arg1 : i32, i32
  }
  func.func @transform_2(%arg0: i32, %arg1: i32) -> (i32, i32) {
    %c0_i32 = arith.constant 0 : i32
    %c0_i32_0 = arith.constant 0 : i32
    return %c0_i32, %arg1 : i32, i32
  }
  func.func @transform_3(%arg0: i32, %arg1: i32) -> (i32, i32) {
    %c0_i32 = arith.constant 0 : i32
    return %arg0, %arg1 : i32, i32
  }
  func.func @transform_4(%arg0: i32, %arg1: i32) -> (i32, i32) {
    %c0_i32 = arith.constant 0 : i32
    return %arg0, %arg1 : i32, i32
  }
}

module attributes {stable_mosaic.version = 11 : i64} {
  func.func @_scan_kernel(%arg0: i32, %arg1: i32, %arg2: memref<1x8x64xf32, #tpu.memory_space<vmem>>, %arg3: memref<1x8x64xf32, #tpu.memory_space<vmem>>, %arg4: memref<64x2xf32, #tpu.memory_space<vmem>>, %arg5: memref<2x64xf32, #tpu.memory_space<vmem>>, %arg6: memref<1x64xf32, #tpu.memory_space<vmem>>, %arg7: memref<64x16xf32, #tpu.memory_space<vmem>>, %arg8: memref<64x16xf32, #tpu.memory_space<vmem>>, %arg9: memref<16x64xf32, #tpu.memory_space<vmem>>, %arg10: memref<1x64xf32, #tpu.memory_space<vmem>>, %arg11: memref<1x8x64xf32, #tpu.memory_space<vmem>>, %arg12: memref<16x64xf32, #tpu.memory_space<vmem>>, %arg13: memref<8x64xf32, #tpu.memory_space<vmem>>, %arg14: memref<8x16xf32, #tpu.memory_space<vmem>>, %arg15: memref<8x16xf32, #tpu.memory_space<vmem>>) attributes {dimension_semantics = [#tpu.dimension_semantics<parallel>, #tpu.dimension_semantics<arbitrary>], iteration_bounds = array<i64: 2, 1>, scalar_prefetch = 0 : i64, scratch_operands = 4 : i64, tpu.core_type = #tpu.core_type<tc>, window_params = [{transform_indices = @transform_0, window_bounds = array<i64: 1, 8, 64>}, {transform_indices = @transform_1, window_bounds = array<i64: 1, 8, 64>}, {pipeline_mode = #tpu.pipeline_mode<synchronous>, transform_indices = @transform_2, window_bounds = array<i64: 64, 2>}, {pipeline_mode = #tpu.pipeline_mode<synchronous>, transform_indices = @transform_3, window_bounds = array<i64: 2, 64>}, {pipeline_mode = #tpu.pipeline_mode<synchronous>, transform_indices = @transform_4, window_bounds = array<i64: 1, 64>}, {pipeline_mode = #tpu.pipeline_mode<synchronous>, transform_indices = @transform_5, window_bounds = array<i64: 64, 16>}, {pipeline_mode = #tpu.pipeline_mode<synchronous>, transform_indices = @transform_6, window_bounds = array<i64: 64, 16>}, {pipeline_mode = #tpu.pipeline_mode<synchronous>, transform_indices = @transform_7, window_bounds = array<i64: 16, 64>}, {pipeline_mode = #tpu.pipeline_mode<synchronous>, transform_indices = @transform_8, window_bounds = array<i64: 1, 64>}, {transform_indices = @transform_9, window_bounds = array<i64: 1, 8, 64>}]} {
    %c0_i32 = arith.constant 0 : i32
    %0 = arith.cmpi eq, %arg1, %c0_i32 : i32
    %1 = arith.extui %0 : i1 to i32
    %c0_i32_0 = arith.constant 0 : i32
    %2 = arith.cmpi ne, %1, %c0_i32_0 : i32
    scf.if %2 {
      %cst_135 = arith.constant 0.000000e+00 : f32
      %334 = vector.broadcast %cst_135 : f32 to vector<16x64xf32>
      %c0_136 = arith.constant 0 : index
      %c0_137 = arith.constant 0 : index
      %335 = vector.load %arg12[%c0_136, %c0_137] : memref<16x64xf32, #tpu.memory_space<vmem>>, vector<16x64xf32>
      tpu.vector_store %arg12[%c0_136, %c0_137], %334 {strides = array<i32>} : memref<16x64xf32, #tpu.memory_space<vmem>>, vector<16x64xf32>,
    } else {
    }
    %c0 = arith.constant 0 : index
    %c0_1 = arith.constant 0 : index
    %c0_2 = arith.constant 0 : index
    %3 = vector.load %arg2[%c0, %c0_1, %c0_2] : memref<1x8x64xf32, #tpu.memory_space<vmem>>, vector<1x8x64xf32>
    %4 = vector.shape_cast %3 : vector<1x8x64xf32> to vector<8x64xf32>
    %c0_3 = arith.constant 0 : index
    %c0_4 = arith.constant 0 : index
    %5 = vector.load %arg4[%c0_3, %c0_4] : memref<64x2xf32, #tpu.memory_space<vmem>>, vector<64x2xf32>
    %cst = arith.constant dense<0.000000e+00> : vector<8x2xf32>
    %6 = tpu.matmul %4, %5, %cst {dimension_numbers = #tpu.dot_dimension_numbers<[1], [0], [0], [1], [0, 0, 1, 1], [], []>, precision = #tpu.contract_precision<fp32>} : vector<8x64xf32>, vector<64x2xf32>, vector<8x2xf32> -> vector<8x2xf32>
    %c0_5 = arith.constant 0 : index
    %c0_6 = arith.constant 0 : index
    %7 = vector.load %arg5[%c0_5, %c0_6] : memref<2x64xf32, #tpu.memory_space<vmem>>, vector<2x64xf32>
    %cst_7 = arith.constant dense<0.000000e+00> : vector<8x64xf32>
    %8 = tpu.matmul %6, %7, %cst_7 {dimension_numbers = #tpu.dot_dimension_numbers<[1], [0], [0], [1], [0, 0, 1, 1], [], []>, precision = #tpu.contract_precision<fp32>} : vector<8x2xf32>, vector<2x64xf32>, vector<8x64xf32> -> vector<8x64xf32>
    %c0_8 = arith.constant 0 : index
    %c0_9 = arith.constant 0 : index
    %9 = vector.load %arg6[%c0_8, %c0_9] : memref<1x64xf32, #tpu.memory_space<vmem>>, vector<1x64xf32>
    %10 = vector.broadcast %9 : vector<1x64xf32> to vector<8x64xf32>
    %11 = arith.addf %8, %10 : vector<8x64xf32>
    %cst_10 = arith.constant 0.000000e+00 : f32
    %12 = vector.broadcast %cst_10 : f32 to vector<8x64xf32>
    %13 = arith.maximumf %11, %12 : vector<8x64xf32>
    %14 = math.absf %11 : vector<8x64xf32>
    %cst_11 = arith.constant 0.000000e+00 : f32
    %15 = vector.broadcast %cst_11 : f32 to vector<8x64xf32>
    %16 = arith.subf %15, %14 : vector<8x64xf32>
    %17 = math.exp %16 : vector<8x64xf32>
    %cst_12 = arith.constant 1.000000e+00 : f32
    %18 = vector.broadcast %cst_12 : f32 to vector<8x64xf32>
    %19 = arith.addf %18, %17 : vector<8x64xf32>
    %20 = math.log %19 : vector<8x64xf32>
    %21 = arith.addf %13, %20 : vector<8x64xf32>
    %c0_13 = arith.constant 0 : index
    %c0_14 = arith.constant 0 : index
    %22 = vector.load %arg13[%c0_13, %c0_14] : memref<8x64xf32, #tpu.memory_space<vmem>>, vector<8x64xf32>
    tpu.vector_store %arg13[%c0_13, %c0_14], %21 {strides = array<i32>} : memref<8x64xf32, #tpu.memory_space<vmem>>, vector<8x64xf32>,
    %c0_15 = arith.constant 0 : index
    %c0_16 = arith.constant 0 : index
    %23 = vector.load %arg7[%c0_15, %c0_16] : memref<64x16xf32, #tpu.memory_space<vmem>>, vector<64x16xf32>
    %cst_17 = arith.constant dense<0.000000e+00> : vector<8x16xf32>
    %24 = tpu.matmul %4, %23, %cst_17 {dimension_numbers = #tpu.dot_dimension_numbers<[1], [0], [0], [1], [0, 0, 1, 1], [], []>, precision = #tpu.contract_precision<fp32>} : vector<8x64xf32>, vector<64x16xf32>, vector<8x16xf32> -> vector<8x16xf32>
    %c0_18 = arith.constant 0 : index
    %c0_19 = arith.constant 0 : index
    %25 = vector.load %arg14[%c0_18, %c0_19] : memref<8x16xf32, #tpu.memory_space<vmem>>, vector<8x16xf32>
    tpu.vector_store %arg14[%c0_18, %c0_19], %24 {strides = array<i32>} : memref<8x16xf32, #tpu.memory_space<vmem>>, vector<8x16xf32>,
    %c0_20 = arith.constant 0 : index
    %c0_21 = arith.constant 0 : index
    %26 = vector.load %arg8[%c0_20, %c0_21] : memref<64x16xf32, #tpu.memory_space<vmem>>, vector<64x16xf32>
    %cst_22 = arith.constant dense<0.000000e+00> : vector<8x16xf32>
    %27 = tpu.matmul %4, %26, %cst_22 {dimension_numbers = #tpu.dot_dimension_numbers<[1], [0], [0], [1], [0, 0, 1, 1], [], []>, precision = #tpu.contract_precision<fp32>} : vector<8x64xf32>, vector<64x16xf32>, vector<8x16xf32> -> vector<8x16xf32>
    %c0_23 = arith.constant 0 : index
    %c0_24 = arith.constant 0 : index
    %28 = vector.load %arg15[%c0_23, %c0_24] : memref<8x16xf32, #tpu.memory_space<vmem>>, vector<8x16xf32>
    tpu.vector_store %arg15[%c0_23, %c0_24], %27 {strides = array<i32>} : memref<8x16xf32, #tpu.memory_space<vmem>>, vector<8x16xf32>,
    %c0_25 = arith.constant 0 : index
    %c0_26 = arith.constant 0 : index
    %29 = vector.load %arg9[%c0_25, %c0_26] : memref<16x64xf32, #tpu.memory_space<vmem>>, vector<16x64xf32>
    %c0_27 = arith.constant 0 : index
    %c0_28 = arith.constant 0 : index
    %30 = vector.load %arg10[%c0_27, %c0_28] : memref<1x64xf32, #tpu.memory_space<vmem>>, vector<1x64xf32>
    %31 = tpu.iota {dimensions = array<i32: 0>} : vector<16x16xi32>
    %32 = tpu.iota {dimensions = array<i32: 1>} : vector<16x16xi32>
    %33 = arith.cmpi eq, %31, %32 : vector<16x16xi32>
    %34 = arith.extui %33 : vector<16x16xi1> to vector<16x16xi32>
    %35 = arith.sitofp %34 : vector<16x16xi32> to vector<16x16xf32>
    %cst_29 = arith.constant 1.000000e+00 : f32
    %36 = vector.broadcast %cst_29 : f32 to vector<16x64xf32>
    %c0_30 = arith.constant 0 : index
    %c0_31 = arith.constant 0 : index
    %37 = vector.load %arg12[%c0_30, %c0_31] : memref<16x64xf32, #tpu.memory_space<vmem>>, vector<16x64xf32>
    %c0_i32_32 = arith.constant 0 : i32
    %c8_i32 = arith.constant 8 : i32
    %38 = arith.muli %c0_i32_32, %c8_i32 : i32
    %39 = tpu.assume_multiple %38, 8 : i32
    %c0_i32_33 = arith.constant 0 : i32
    %40 = arith.addi %39, %c0_i32_33 : i32
    %41 = arith.index_cast %40 : i32 to index
    %c0_34 = arith.constant 0 : index
    %42 = vector.load %arg13[%41, %c0_34] : memref<8x64xf32, #tpu.memory_space<vmem>>, vector<1x64xf32>
    %c0_35 = arith.constant 0 : index
    %43 = arith.index_cast %40 : i32 to index
    %c0_36 = arith.constant 0 : index
    %44 = vector.load %arg2[%c0_35, %43, %c0_36] : memref<1x8x64xf32, #tpu.memory_space<vmem>>, vector<1x1x64xf32>
    %45 = vector.shape_cast %44 : vector<1x1x64xf32> to vector<1x64xf32>
    %46 = arith.index_cast %40 : i32 to index
    %c0_37 = arith.constant 0 : index
    %47 = vector.load %arg14[%46, %c0_37] : memref<8x16xf32, #tpu.memory_space<vmem>>, vector<1x16xf32>
    %48 = arith.index_cast %40 : i32 to index
    %c0_38 = arith.constant 0 : index
    %49 = vector.load %arg15[%48, %c0_38] : memref<8x16xf32, #tpu.memory_space<vmem>>, vector<1x16xf32>
    %c0_39 = arith.constant 0 : index
    %50 = arith.index_cast %40 : i32 to index
    %c0_40 = arith.constant 0 : index
    %51 = vector.load %arg3[%c0_39, %50, %c0_40] : memref<1x8x64xf32, #tpu.memory_space<vmem>>, vector<1x1x64xf32>
    %52 = vector.shape_cast %51 : vector<1x1x64xf32> to vector<1x64xf32>
    %53 = vector.broadcast %42 : vector<1x64xf32> to vector<16x64xf32>
    %54 = arith.mulf %53, %29 : vector<16x64xf32>
    %55 = math.exp %54 : vector<16x64xf32>
    %56 = vector.broadcast %47 : vector<1x16xf32> to vector<16x16xf32>
    %57 = arith.mulf %35, %56 : vector<16x16xf32>
    %cst_41 = arith.constant dense<0.000000e+00> : vector<16x64xf32>
    %58 = tpu.matmul %57, %36, %cst_41 {dimension_numbers = #tpu.dot_dimension_numbers<[1], [0], [0], [1], [0, 0, 1, 1], [], []>, precision = #tpu.contract_precision<fp32>} : vector<16x16xf32>, vector<16x64xf32>, vector<16x64xf32> -> vector<16x64xf32>
    %59 = arith.mulf %55, %37 : vector<16x64xf32>
    %60 = arith.mulf %42, %45 : vector<1x64xf32>
    %61 = vector.broadcast %60 : vector<1x64xf32> to vector<16x64xf32>
    %62 = arith.mulf %58, %61 : vector<16x64xf32>
    %63 = arith.addf %59, %62 : vector<16x64xf32>
    %cst_42 = arith.constant dense<0.000000e+00> : vector<1x64xf32>
    %64 = tpu.matmul %49, %63, %cst_42 {dimension_numbers = #tpu.dot_dimension_numbers<[1], [0], [0], [1], [0, 0, 1, 1], [], []>, precision = #tpu.contract_precision<fp32>} : vector<1x16xf32>, vector<16x64xf32>, vector<1x64xf32> -> vector<1x64xf32>
    %65 = arith.mulf %45, %30 : vector<1x64xf32>
    %66 = arith.addf %64, %65 : vector<1x64xf32>
    %cst_43 = arith.constant 0.000000e+00 : f32
    %67 = vector.broadcast %cst_43 : f32 to vector<1x64xf32>
    %68 = arith.subf %67, %52 : vector<1x64xf32>
    %69 = math.exp %68 : vector<1x64xf32>
    %cst_44 = arith.constant 1.000000e+00 : f32
    %70 = vector.broadcast %cst_44 : f32 to vector<1x64xf32>
    %71 = arith.addf %70, %69 : vector<1x64xf32>
    %cst_45 = arith.constant 1.000000e+00 : f32
    %72 = vector.broadcast %cst_45 : f32 to vector<1x64xf32>
    %73 = arith.divf %72, %71 : vector<1x64xf32>
    %74 = arith.mulf %52, %73 : vector<1x64xf32>
    %75 = arith.mulf %66, %74 : vector<1x64xf32>
    %c1_i32 = arith.constant 1 : i32
    %76 = arith.addi %39, %c1_i32 : i32
    %77 = arith.index_cast %76 : i32 to index
    %c0_46 = arith.constant 0 : index
    %78 = vector.load %arg13[%77, %c0_46] : memref<8x64xf32, #tpu.memory_space<vmem>>, vector<1x64xf32>
    %c0_47 = arith.constant 0 : index
    %79 = arith.index_cast %76 : i32 to index
    %c0_48 = arith.constant 0 : index
    %80 = vector.load %arg2[%c0_47, %79, %c0_48] : memref<1x8x64xf32, #tpu.memory_space<vmem>>, vector<1x1x64xf32>
    %81 = vector.shape_cast %80 : vector<1x1x64xf32> to vector<1x64xf32>
    %82 = arith.index_cast %76 : i32 to index
    %c0_49 = arith.constant 0 : index
    %83 = vector.load %arg14[%82, %c0_49] : memref<8x16xf32, #tpu.memory_space<vmem>>, vector<1x16xf32>
    %84 = arith.index_cast %76 : i32 to index
    %c0_50 = arith.constant 0 : index
    %85 = vector.load %arg15[%84, %c0_50] : memref<8x16xf32, #tpu.memory_space<vmem>>, vector<1x16xf32>
    %c0_51 = arith.constant 0 : index
    %86 = arith.index_cast %76 : i32 to index
    %c0_52 = arith.constant 0 : index
    %87 = vector.load %arg3[%c0_51, %86, %c0_52] : memref<1x8x64xf32, #tpu.memory_space<vmem>>, vector<1x1x64xf32>
    %88 = vector.shape_cast %87 : vector<1x1x64xf32> to vector<1x64xf32>
    %89 = vector.broadcast %78 : vector<1x64xf32> to vector<16x64xf32>
    %90 = arith.mulf %89, %29 : vector<16x64xf32>
    %91 = math.exp %90 : vector<16x64xf32>
    %92 = vector.broadcast %83 : vector<1x16xf32> to vector<16x16xf32>
    %93 = arith.mulf %35, %92 : vector<16x16xf32>
    %cst_53 = arith.constant dense<0.000000e+00> : vector<16x64xf32>
    %94 = tpu.matmul %93, %36, %cst_53 {dimension_numbers = #tpu.dot_dimension_numbers<[1], [0], [0], [1], [0, 0, 1, 1], [], []>, precision = #tpu.contract_precision<fp32>} : vector<16x16xf32>, vector<16x64xf32>, vector<16x64xf32> -> vector<16x64xf32>
    %95 = arith.mulf %91, %63 : vector<16x64xf32>
    %96 = arith.mulf %78, %81 : vector<1x64xf32>
    %97 = vector.broadcast %96 : vector<1x64xf32> to vector<16x64xf32>
    %98 = arith.mulf %94, %97 : vector<16x64xf32>
    %99 = arith.addf %95, %98 : vector<16x64xf32>
    %cst_54 = arith.constant dense<0.000000e+00> : vector<1x64xf32>
    %100 = tpu.matmul %85, %99, %cst_54 {dimension_numbers = #tpu.dot_dimension_numbers<[1], [0], [0], [1], [0, 0, 1, 1], [], []>, precision = #tpu.contract_precision<fp32>} : vector<1x16xf32>, vector<16x64xf32>, vector<1x64xf32> -> vector<1x64xf32>
    %101 = arith.mulf %81, %30 : vector<1x64xf32>
    %102 = arith.addf %100, %101 : vector<1x64xf32>
    %cst_55 = arith.constant 0.000000e+00 : f32
    %103 = vector.broadcast %cst_55 : f32 to vector<1x64xf32>
    %104 = arith.subf %103, %88 : vector<1x64xf32>
    %105 = math.exp %104 : vector<1x64xf32>
    %cst_56 = arith.constant 1.000000e+00 : f32
    %106 = vector.broadcast %cst_56 : f32 to vector<1x64xf32>
    %107 = arith.addf %106, %105 : vector<1x64xf32>
    %cst_57 = arith.constant 1.000000e+00 : f32
    %108 = vector.broadcast %cst_57 : f32 to vector<1x64xf32>
    %109 = arith.divf %108, %107 : vector<1x64xf32>
    %110 = arith.mulf %88, %109 : vector<1x64xf32>
    %111 = arith.mulf %102, %110 : vector<1x64xf32>
    %c2_i32 = arith.constant 2 : i32
    %112 = arith.addi %39, %c2_i32 : i32
    %113 = arith.index_cast %112 : i32 to index
    %c0_58 = arith.constant 0 : index
    %114 = vector.load %arg13[%113, %c0_58] : memref<8x64xf32, #tpu.memory_space<vmem>>, vector<1x64xf32>
    %c0_59 = arith.constant 0 : index
    %115 = arith.index_cast %112 : i32 to index
    %c0_60 = arith.constant 0 : index
    %116 = vector.load %arg2[%c0_59, %115, %c0_60] : memref<1x8x64xf32, #tpu.memory_space<vmem>>, vector<1x1x64xf32>
    %117 = vector.shape_cast %116 : vector<1x1x64xf32> to vector<1x64xf32>
    %118 = arith.index_cast %112 : i32 to index
    %c0_61 = arith.constant 0 : index
    %119 = vector.load %arg14[%118, %c0_61] : memref<8x16xf32, #tpu.memory_space<vmem>>, vector<1x16xf32>
    %120 = arith.index_cast %112 : i32 to index
    %c0_62 = arith.constant 0 : index
    %121 = vector.load %arg15[%120, %c0_62] : memref<8x16xf32, #tpu.memory_space<vmem>>, vector<1x16xf32>
    %c0_63 = arith.constant 0 : index
    %122 = arith.index_cast %112 : i32 to index
    %c0_64 = arith.constant 0 : index
    %123 = vector.load %arg3[%c0_63, %122, %c0_64] : memref<1x8x64xf32, #tpu.memory_space<vmem>>, vector<1x1x64xf32>
    %124 = vector.shape_cast %123 : vector<1x1x64xf32> to vector<1x64xf32>
    %125 = vector.broadcast %114 : vector<1x64xf32> to vector<16x64xf32>
    %126 = arith.mulf %125, %29 : vector<16x64xf32>
    %127 = math.exp %126 : vector<16x64xf32>
    %128 = vector.broadcast %119 : vector<1x16xf32> to vector<16x16xf32>
    %129 = arith.mulf %35, %128 : vector<16x16xf32>
    %cst_65 = arith.constant dense<0.000000e+00> : vector<16x64xf32>
    %130 = tpu.matmul %129, %36, %cst_65 {dimension_numbers = #tpu.dot_dimension_numbers<[1], [0], [0], [1], [0, 0, 1, 1], [], []>, precision = #tpu.contract_precision<fp32>} : vector<16x16xf32>, vector<16x64xf32>, vector<16x64xf32> -> vector<16x64xf32>
    %131 = arith.mulf %127, %99 : vector<16x64xf32>
    %132 = arith.mulf %114, %117 : vector<1x64xf32>
    %133 = vector.broadcast %132 : vector<1x64xf32> to vector<16x64xf32>
    %134 = arith.mulf %130, %133 : vector<16x64xf32>
    %135 = arith.addf %131, %134 : vector<16x64xf32>
    %cst_66 = arith.constant dense<0.000000e+00> : vector<1x64xf32>
    %136 = tpu.matmul %121, %135, %cst_66 {dimension_numbers = #tpu.dot_dimension_numbers<[1], [0], [0], [1], [0, 0, 1, 1], [], []>, precision = #tpu.contract_precision<fp32>} : vector<1x16xf32>, vector<16x64xf32>, vector<1x64xf32> -> vector<1x64xf32>
    %137 = arith.mulf %117, %30 : vector<1x64xf32>
    %138 = arith.addf %136, %137 : vector<1x64xf32>
    %cst_67 = arith.constant 0.000000e+00 : f32
    %139 = vector.broadcast %cst_67 : f32 to vector<1x64xf32>
    %140 = arith.subf %139, %124 : vector<1x64xf32>
    %141 = math.exp %140 : vector<1x64xf32>
    %cst_68 = arith.constant 1.000000e+00 : f32
    %142 = vector.broadcast %cst_68 : f32 to vector<1x64xf32>
    %143 = arith.addf %142, %141 : vector<1x64xf32>
    %cst_69 = arith.constant 1.000000e+00 : f32
    %144 = vector.broadcast %cst_69 : f32 to vector<1x64xf32>
    %145 = arith.divf %144, %143 : vector<1x64xf32>
    %146 = arith.mulf %124, %145 : vector<1x64xf32>
    %147 = arith.mulf %138, %146 : vector<1x64xf32>
    %c3_i32 = arith.constant 3 : i32
    %148 = arith.addi %39, %c3_i32 : i32
    %149 = arith.index_cast %148 : i32 to index
    %c0_70 = arith.constant 0 : index
    %150 = vector.load %arg13[%149, %c0_70] : memref<8x64xf32, #tpu.memory_space<vmem>>, vector<1x64xf32>
    %c0_71 = arith.constant 0 : index
    %151 = arith.index_cast %148 : i32 to index
    %c0_72 = arith.constant 0 : index
    %152 = vector.load %arg2[%c0_71, %151, %c0_72] : memref<1x8x64xf32, #tpu.memory_space<vmem>>, vector<1x1x64xf32>
    %153 = vector.shape_cast %152 : vector<1x1x64xf32> to vector<1x64xf32>
    %154 = arith.index_cast %148 : i32 to index
    %c0_73 = arith.constant 0 : index
    %155 = vector.load %arg14[%154, %c0_73] : memref<8x16xf32, #tpu.memory_space<vmem>>, vector<1x16xf32>
    %156 = arith.index_cast %148 : i32 to index
    %c0_74 = arith.constant 0 : index
    %157 = vector.load %arg15[%156, %c0_74] : memref<8x16xf32, #tpu.memory_space<vmem>>, vector<1x16xf32>
    %c0_75 = arith.constant 0 : index
    %158 = arith.index_cast %148 : i32 to index
    %c0_76 = arith.constant 0 : index
    %159 = vector.load %arg3[%c0_75, %158, %c0_76] : memref<1x8x64xf32, #tpu.memory_space<vmem>>, vector<1x1x64xf32>
    %160 = vector.shape_cast %159 : vector<1x1x64xf32> to vector<1x64xf32>
    %161 = vector.broadcast %150 : vector<1x64xf32> to vector<16x64xf32>
    %162 = arith.mulf %161, %29 : vector<16x64xf32>
    %163 = math.exp %162 : vector<16x64xf32>
    %164 = vector.broadcast %155 : vector<1x16xf32> to vector<16x16xf32>
    %165 = arith.mulf %35, %164 : vector<16x16xf32>
    %cst_77 = arith.constant dense<0.000000e+00> : vector<16x64xf32>
    %166 = tpu.matmul %165, %36, %cst_77 {dimension_numbers = #tpu.dot_dimension_numbers<[1], [0], [0], [1], [0, 0, 1, 1], [], []>, precision = #tpu.contract_precision<fp32>} : vector<16x16xf32>, vector<16x64xf32>, vector<16x64xf32> -> vector<16x64xf32>
    %167 = arith.mulf %163, %135 : vector<16x64xf32>
    %168 = arith.mulf %150, %153 : vector<1x64xf32>
    %169 = vector.broadcast %168 : vector<1x64xf32> to vector<16x64xf32>
    %170 = arith.mulf %166, %169 : vector<16x64xf32>
    %171 = arith.addf %167, %170 : vector<16x64xf32>
    %cst_78 = arith.constant dense<0.000000e+00> : vector<1x64xf32>
    %172 = tpu.matmul %157, %171, %cst_78 {dimension_numbers = #tpu.dot_dimension_numbers<[1], [0], [0], [1], [0, 0, 1, 1], [], []>, precision = #tpu.contract_precision<fp32>} : vector<1x16xf32>, vector<16x64xf32>, vector<1x64xf32> -> vector<1x64xf32>
    %173 = arith.mulf %153, %30 : vector<1x64xf32>
    %174 = arith.addf %172, %173 : vector<1x64xf32>
    %cst_79 = arith.constant 0.000000e+00 : f32
    %175 = vector.broadcast %cst_79 : f32 to vector<1x64xf32>
    %176 = arith.subf %175, %160 : vector<1x64xf32>
    %177 = math.exp %176 : vector<1x64xf32>
    %cst_80 = arith.constant 1.000000e+00 : f32
    %178 = vector.broadcast %cst_80 : f32 to vector<1x64xf32>
    %179 = arith.addf %178, %177 : vector<1x64xf32>
    %cst_81 = arith.constant 1.000000e+00 : f32
    %180 = vector.broadcast %cst_81 : f32 to vector<1x64xf32>
    %181 = arith.divf %180, %179 : vector<1x64xf32>
    %182 = arith.mulf %160, %181 : vector<1x64xf32>
    %183 = arith.mulf %174, %182 : vector<1x64xf32>
    %c4_i32 = arith.constant 4 : i32
    %184 = arith.addi %39, %c4_i32 : i32
    %185 = arith.index_cast %184 : i32 to index
    %c0_82 = arith.constant 0 : index
    %186 = vector.load %arg13[%185, %c0_82] : memref<8x64xf32, #tpu.memory_space<vmem>>, vector<1x64xf32>
    %c0_83 = arith.constant 0 : index
    %187 = arith.index_cast %184 : i32 to index
    %c0_84 = arith.constant 0 : index
    %188 = vector.load %arg2[%c0_83, %187, %c0_84] : memref<1x8x64xf32, #tpu.memory_space<vmem>>, vector<1x1x64xf32>
    %189 = vector.shape_cast %188 : vector<1x1x64xf32> to vector<1x64xf32>
    %190 = arith.index_cast %184 : i32 to index
    %c0_85 = arith.constant 0 : index
    %191 = vector.load %arg14[%190, %c0_85] : memref<8x16xf32, #tpu.memory_space<vmem>>, vector<1x16xf32>
    %192 = arith.index_cast %184 : i32 to index
    %c0_86 = arith.constant 0 : index
    %193 = vector.load %arg15[%192, %c0_86] : memref<8x16xf32, #tpu.memory_space<vmem>>, vector<1x16xf32>
    %c0_87 = arith.constant 0 : index
    %194 = arith.index_cast %184 : i32 to index
    %c0_88 = arith.constant 0 : index
    %195 = vector.load %arg3[%c0_87, %194, %c0_88] : memref<1x8x64xf32, #tpu.memory_space<vmem>>, vector<1x1x64xf32>
    %196 = vector.shape_cast %195 : vector<1x1x64xf32> to vector<1x64xf32>
    %197 = vector.broadcast %186 : vector<1x64xf32> to vector<16x64xf32>
    %198 = arith.mulf %197, %29 : vector<16x64xf32>
    %199 = math.exp %198 : vector<16x64xf32>
    %200 = vector.broadcast %191 : vector<1x16xf32> to vector<16x16xf32>
    %201 = arith.mulf %35, %200 : vector<16x16xf32>
    %cst_89 = arith.constant dense<0.000000e+00> : vector<16x64xf32>
    %202 = tpu.matmul %201, %36, %cst_89 {dimension_numbers = #tpu.dot_dimension_numbers<[1], [0], [0], [1], [0, 0, 1, 1], [], []>, precision = #tpu.contract_precision<fp32>} : vector<16x16xf32>, vector<16x64xf32>, vector<16x64xf32> -> vector<16x64xf32>
    %203 = arith.mulf %199, %171 : vector<16x64xf32>
    %204 = arith.mulf %186, %189 : vector<1x64xf32>
    %205 = vector.broadcast %204 : vector<1x64xf32> to vector<16x64xf32>
    %206 = arith.mulf %202, %205 : vector<16x64xf32>
    %207 = arith.addf %203, %206 : vector<16x64xf32>
    %cst_90 = arith.constant dense<0.000000e+00> : vector<1x64xf32>
    %208 = tpu.matmul %193, %207, %cst_90 {dimension_numbers = #tpu.dot_dimension_numbers<[1], [0], [0], [1], [0, 0, 1, 1], [], []>, precision = #tpu.contract_precision<fp32>} : vector<1x16xf32>, vector<16x64xf32>, vector<1x64xf32> -> vector<1x64xf32>
    %209 = arith.mulf %189, %30 : vector<1x64xf32>
    %210 = arith.addf %208, %209 : vector<1x64xf32>
    %cst_91 = arith.constant 0.000000e+00 : f32
    %211 = vector.broadcast %cst_91 : f32 to vector<1x64xf32>
    %212 = arith.subf %211, %196 : vector<1x64xf32>
    %213 = math.exp %212 : vector<1x64xf32>
    %cst_92 = arith.constant 1.000000e+00 : f32
    %214 = vector.broadcast %cst_92 : f32 to vector<1x64xf32>
    %215 = arith.addf %214, %213 : vector<1x64xf32>
    %cst_93 = arith.constant 1.000000e+00 : f32
    %216 = vector.broadcast %cst_93 : f32 to vector<1x64xf32>
    %217 = arith.divf %216, %215 : vector<1x64xf32>
    %218 = arith.mulf %196, %217 : vector<1x64xf32>
    %219 = arith.mulf %210, %218 : vector<1x64xf32>
    %c5_i32 = arith.constant 5 : i32
    %220 = arith.addi %39, %c5_i32 : i32
    %221 = arith.index_cast %220 : i32 to index
    %c0_94 = arith.constant 0 : index
    %222 = vector.load %arg13[%221, %c0_94] : memref<8x64xf32, #tpu.memory_space<vmem>>, vector<1x64xf32>
    %c0_95 = arith.constant 0 : index
    %223 = arith.index_cast %220 : i32 to index
    %c0_96 = arith.constant 0 : index
    %224 = vector.load %arg2[%c0_95, %223, %c0_96] : memref<1x8x64xf32, #tpu.memory_space<vmem>>, vector<1x1x64xf32>
    %225 = vector.shape_cast %224 : vector<1x1x64xf32> to vector<1x64xf32>
    %226 = arith.index_cast %220 : i32 to index
    %c0_97 = arith.constant 0 : index
    %227 = vector.load %arg14[%226, %c0_97] : memref<8x16xf32, #tpu.memory_space<vmem>>, vector<1x16xf32>
    %228 = arith.index_cast %220 : i32 to index
    %c0_98 = arith.constant 0 : index
    %229 = vector.load %arg15[%228, %c0_98] : memref<8x16xf32, #tpu.memory_space<vmem>>, vector<1x16xf32>
    %c0_99 = arith.constant 0 : index
    %230 = arith.index_cast %220 : i32 to index
    %c0_100 = arith.constant 0 : index
    %231 = vector.load %arg3[%c0_99, %230, %c0_100] : memref<1x8x64xf32, #tpu.memory_space<vmem>>, vector<1x1x64xf32>
    %232 = vector.shape_cast %231 : vector<1x1x64xf32> to vector<1x64xf32>
    %233 = vector.broadcast %222 : vector<1x64xf32> to vector<16x64xf32>
    %234 = arith.mulf %233, %29 : vector<16x64xf32>
    %235 = math.exp %234 : vector<16x64xf32>
    %236 = vector.broadcast %227 : vector<1x16xf32> to vector<16x16xf32>
    %237 = arith.mulf %35, %236 : vector<16x16xf32>
    %cst_101 = arith.constant dense<0.000000e+00> : vector<16x64xf32>
    %238 = tpu.matmul %237, %36, %cst_101 {dimension_numbers = #tpu.dot_dimension_numbers<[1], [0], [0], [1], [0, 0, 1, 1], [], []>, precision = #tpu.contract_precision<fp32>} : vector<16x16xf32>, vector<16x64xf32>, vector<16x64xf32> -> vector<16x64xf32>
    %239 = arith.mulf %235, %207 : vector<16x64xf32>
    %240 = arith.mulf %222, %225 : vector<1x64xf32>
    %241 = vector.broadcast %240 : vector<1x64xf32> to vector<16x64xf32>
    %242 = arith.mulf %238, %241 : vector<16x64xf32>
    %243 = arith.addf %239, %242 : vector<16x64xf32>
    %cst_102 = arith.constant dense<0.000000e+00> : vector<1x64xf32>
    %244 = tpu.matmul %229, %243, %cst_102 {dimension_numbers = #tpu.dot_dimension_numbers<[1], [0], [0], [1], [0, 0, 1, 1], [], []>, precision = #tpu.contract_precision<fp32>} : vector<1x16xf32>, vector<16x64xf32>, vector<1x64xf32> -> vector<1x64xf32>
    %245 = arith.mulf %225, %30 : vector<1x64xf32>
    %246 = arith.addf %244, %245 : vector<1x64xf32>
    %cst_103 = arith.constant 0.000000e+00 : f32
    %247 = vector.broadcast %cst_103 : f32 to vector<1x64xf32>
    %248 = arith.subf %247, %232 : vector<1x64xf32>
    %249 = math.exp %248 : vector<1x64xf32>
    %cst_104 = arith.constant 1.000000e+00 : f32
    %250 = vector.broadcast %cst_104 : f32 to vector<1x64xf32>
    %251 = arith.addf %250, %249 : vector<1x64xf32>
    %cst_105 = arith.constant 1.000000e+00 : f32
    %252 = vector.broadcast %cst_105 : f32 to vector<1x64xf32>
    %253 = arith.divf %252, %251 : vector<1x64xf32>
    %254 = arith.mulf %232, %253 : vector<1x64xf32>
    %255 = arith.mulf %246, %254 : vector<1x64xf32>
    %c6_i32 = arith.constant 6 : i32
    %256 = arith.addi %39, %c6_i32 : i32
    %257 = arith.index_cast %256 : i32 to index
    %c0_106 = arith.constant 0 : index
    %258 = vector.load %arg13[%257, %c0_106] : memref<8x64xf32, #tpu.memory_space<vmem>>, vector<1x64xf32>
    %c0_107 = arith.constant 0 : index
    %259 = arith.index_cast %256 : i32 to index
    %c0_108 = arith.constant 0 : index
    %260 = vector.load %arg2[%c0_107, %259, %c0_108] : memref<1x8x64xf32, #tpu.memory_space<vmem>>, vector<1x1x64xf32>
    %261 = vector.shape_cast %260 : vector<1x1x64xf32> to vector<1x64xf32>
    %262 = arith.index_cast %256 : i32 to index
    %c0_109 = arith.constant 0 : index
    %263 = vector.load %arg14[%262, %c0_109] : memref<8x16xf32, #tpu.memory_space<vmem>>, vector<1x16xf32>
    %264 = arith.index_cast %256 : i32 to index
    %c0_110 = arith.constant 0 : index
    %265 = vector.load %arg15[%264, %c0_110] : memref<8x16xf32, #tpu.memory_space<vmem>>, vector<1x16xf32>
    %c0_111 = arith.constant 0 : index
    %266 = arith.index_cast %256 : i32 to index
    %c0_112 = arith.constant 0 : index
    %267 = vector.load %arg3[%c0_111, %266, %c0_112] : memref<1x8x64xf32, #tpu.memory_space<vmem>>, vector<1x1x64xf32>
    %268 = vector.shape_cast %267 : vector<1x1x64xf32> to vector<1x64xf32>
    %269 = vector.broadcast %258 : vector<1x64xf32> to vector<16x64xf32>
    %270 = arith.mulf %269, %29 : vector<16x64xf32>
    %271 = math.exp %270 : vector<16x64xf32>
    %272 = vector.broadcast %263 : vector<1x16xf32> to vector<16x16xf32>
    %273 = arith.mulf %35, %272 : vector<16x16xf32>
    %cst_113 = arith.constant dense<0.000000e+00> : vector<16x64xf32>
    %274 = tpu.matmul %273, %36, %cst_113 {dimension_numbers = #tpu.dot_dimension_numbers<[1], [0], [0], [1], [0, 0, 1, 1], [], []>, precision = #tpu.contract_precision<fp32>} : vector<16x16xf32>, vector<16x64xf32>, vector<16x64xf32> -> vector<16x64xf32>
    %275 = arith.mulf %271, %243 : vector<16x64xf32>
    %276 = arith.mulf %258, %261 : vector<1x64xf32>
    %277 = vector.broadcast %276 : vector<1x64xf32> to vector<16x64xf32>
    %278 = arith.mulf %274, %277 : vector<16x64xf32>
    %279 = arith.addf %275, %278 : vector<16x64xf32>
    %cst_114 = arith.constant dense<0.000000e+00> : vector<1x64xf32>
    %280 = tpu.matmul %265, %279, %cst_114 {dimension_numbers = #tpu.dot_dimension_numbers<[1], [0], [0], [1], [0, 0, 1, 1], [], []>, precision = #tpu.contract_precision<fp32>} : vector<1x16xf32>, vector<16x64xf32>, vector<1x64xf32> -> vector<1x64xf32>
    %281 = arith.mulf %261, %30 : vector<1x64xf32>
    %282 = arith.addf %280, %281 : vector<1x64xf32>
    %cst_115 = arith.constant 0.000000e+00 : f32
    %283 = vector.broadcast %cst_115 : f32 to vector<1x64xf32>
    %284 = arith.subf %283, %268 : vector<1x64xf32>
    %285 = math.exp %284 : vector<1x64xf32>
    %cst_116 = arith.constant 1.000000e+00 : f32
    %286 = vector.broadcast %cst_116 : f32 to vector<1x64xf32>
    %287 = arith.addf %286, %285 : vector<1x64xf32>
    %cst_117 = arith.constant 1.000000e+00 : f32
    %288 = vector.broadcast %cst_117 : f32 to vector<1x64xf32>
    %289 = arith.divf %288, %287 : vector<1x64xf32>
    %290 = arith.mulf %268, %289 : vector<1x64xf32>
    %291 = arith.mulf %282, %290 : vector<1x64xf32>
    %c7_i32 = arith.constant 7 : i32
    %292 = arith.addi %39, %c7_i32 : i32
    %293 = arith.index_cast %292 : i32 to index
    %c0_118 = arith.constant 0 : index
    %294 = vector.load %arg13[%293, %c0_118] : memref<8x64xf32, #tpu.memory_space<vmem>>, vector<1x64xf32>
    %c0_119 = arith.constant 0 : index
    %295 = arith.index_cast %292 : i32 to index
    %c0_120 = arith.constant 0 : index
    %296 = vector.load %arg2[%c0_119, %295, %c0_120] : memref<1x8x64xf32, #tpu.memory_space<vmem>>, vector<1x1x64xf32>
    %297 = vector.shape_cast %296 : vector<1x1x64xf32> to vector<1x64xf32>
    %298 = arith.index_cast %292 : i32 to index
    %c0_121 = arith.constant 0 : index
    %299 = vector.load %arg14[%298, %c0_121] : memref<8x16xf32, #tpu.memory_space<vmem>>, vector<1x16xf32>
    %300 = arith.index_cast %292 : i32 to index
    %c0_122 = arith.constant 0 : index
    %301 = vector.load %arg15[%300, %c0_122] : memref<8x16xf32, #tpu.memory_space<vmem>>, vector<1x16xf32>
    %c0_123 = arith.constant 0 : index
    %302 = arith.index_cast %292 : i32 to index
    %c0_124 = arith.constant 0 : index
    %303 = vector.load %arg3[%c0_123, %302, %c0_124] : memref<1x8x64xf32, #tpu.memory_space<vmem>>, vector<1x1x64xf32>
    %304 = vector.shape_cast %303 : vector<1x1x64xf32> to vector<1x64xf32>
    %305 = vector.broadcast %294 : vector<1x64xf32> to vector<16x64xf32>
    %306 = arith.mulf %305, %29 : vector<16x64xf32>
    %307 = math.exp %306 : vector<16x64xf32>
    %308 = vector.broadcast %299 : vector<1x16xf32> to vector<16x16xf32>
    %309 = arith.mulf %35, %308 : vector<16x16xf32>
    %cst_125 = arith.constant dense<0.000000e+00> : vector<16x64xf32>
    %310 = tpu.matmul %309, %36, %cst_125 {dimension_numbers = #tpu.dot_dimension_numbers<[1], [0], [0], [1], [0, 0, 1, 1], [], []>, precision = #tpu.contract_precision<fp32>} : vector<16x16xf32>, vector<16x64xf32>, vector<16x64xf32> -> vector<16x64xf32>
    %311 = arith.mulf %307, %279 : vector<16x64xf32>
    %312 = arith.mulf %294, %297 : vector<1x64xf32>
    %313 = vector.broadcast %312 : vector<1x64xf32> to vector<16x64xf32>
    %314 = arith.mulf %310, %313 : vector<16x64xf32>
    %315 = arith.addf %311, %314 : vector<16x64xf32>
    %cst_126 = arith.constant dense<0.000000e+00> : vector<1x64xf32>
    %316 = tpu.matmul %301, %315, %cst_126 {dimension_numbers = #tpu.dot_dimension_numbers<[1], [0], [0], [1], [0, 0, 1, 1], [], []>, precision = #tpu.contract_precision<fp32>} : vector<1x16xf32>, vector<16x64xf32>, vector<1x64xf32> -> vector<1x64xf32>
    %317 = arith.mulf %297, %30 : vector<1x64xf32>
    %318 = arith.addf %316, %317 : vector<1x64xf32>
    %cst_127 = arith.constant 0.000000e+00 : f32
    %319 = vector.broadcast %cst_127 : f32 to vector<1x64xf32>
    %320 = arith.subf %319, %304 : vector<1x64xf32>
    %321 = math.exp %320 : vector<1x64xf32>
    %cst_128 = arith.constant 1.000000e+00 : f32
    %322 = vector.broadcast %cst_128 : f32 to vector<1x64xf32>
    %323 = arith.addf %322, %321 : vector<1x64xf32>
    %cst_129 = arith.constant 1.000000e+00 : f32
    %324 = vector.broadcast %cst_129 : f32 to vector<1x64xf32>
    %325 = arith.divf %324, %323 : vector<1x64xf32>
    %326 = arith.mulf %304, %325 : vector<1x64xf32>
    %327 = arith.mulf %318, %326 : vector<1x64xf32>
    %328 = tpu.concatenate %75, %111, %147, %183, %219, %255, %291, %327 in 0 : vector<1x64xf32>, vector<1x64xf32>, vector<1x64xf32>, vector<1x64xf32>, vector<1x64xf32>, vector<1x64xf32>, vector<1x64xf32>, vector<1x64xf32> -> vector<8x64xf32>
    %c0_130 = arith.constant 0 : index
    %329 = arith.index_cast %39 : i32 to index
    %c0_131 = arith.constant 0 : index
    %330 = vector.load %arg11[%c0_130, %329, %c0_131] : memref<1x8x64xf32, #tpu.memory_space<vmem>>, vector<1x8x64xf32>
    %331 = vector.shape_cast %330 : vector<1x8x64xf32> to vector<8x64xf32>
    %332 = vector.shape_cast %328 : vector<8x64xf32> to vector<1x8x64xf32>
    tpu.vector_store %arg11[%c0_130, %329, %c0_131], %332 {strides = array<i32>} : memref<1x8x64xf32, #tpu.memory_space<vmem>>, vector<1x8x64xf32>,
    %c1_i32_132 = arith.constant 1 : i32
    %c0_133 = arith.constant 0 : index
    %c0_134 = arith.constant 0 : index
    %333 = vector.load %arg12[%c0_133, %c0_134] : memref<16x64xf32, #tpu.memory_space<vmem>>, vector<16x64xf32>
    tpu.vector_store %arg12[%c0_133, %c0_134], %315 {strides = array<i32>} : memref<16x64xf32, #tpu.memory_space<vmem>>, vector<16x64xf32>,
    return
  }
  func.func @transform_0(%arg0: i32, %arg1: i32) -> (i32, i32, i32) {
    %c0_i32 = arith.constant 0 : i32
    %c0_i32_0 = arith.constant 0 : i32
    return %arg0, %arg1, %c0_i32 : i32, i32, i32
  }
  func.func @transform_1(%arg0: i32, %arg1: i32) -> (i32, i32, i32) {
    %c0_i32 = arith.constant 0 : i32
    %c0_i32_0 = arith.constant 0 : i32
    return %arg0, %arg1, %c0_i32 : i32, i32, i32
  }
  func.func @transform_2(%arg0: i32, %arg1: i32) -> (i32, i32) {
    %c0_i32 = arith.constant 0 : i32
    %c0_i32_0 = arith.constant 0 : i32
    %c0_i32_1 = arith.constant 0 : i32
    return %c0_i32, %c0_i32_0 : i32, i32
  }
  func.func @transform_3(%arg0: i32, %arg1: i32) -> (i32, i32) {
    %c0_i32 = arith.constant 0 : i32
    %c0_i32_0 = arith.constant 0 : i32
    %c0_i32_1 = arith.constant 0 : i32
    return %c0_i32, %c0_i32_0 : i32, i32
  }
  func.func @transform_4(%arg0: i32, %arg1: i32) -> (i32, i32) {
    %c0_i32 = arith.constant 0 : i32
    %c0_i32_0 = arith.constant 0 : i32
    %c0_i32_1 = arith.constant 0 : i32
    return %c0_i32, %c0_i32_0 : i32, i32
  }
  func.func @transform_5(%arg0: i32, %arg1: i32) -> (i32, i32) {
    %c0_i32 = arith.constant 0 : i32
    %c0_i32_0 = arith.constant 0 : i32
    %c0_i32_1 = arith.constant 0 : i32
    return %c0_i32, %c0_i32_0 : i32, i32
  }
  func.func @transform_6(%arg0: i32, %arg1: i32) -> (i32, i32) {
    %c0_i32 = arith.constant 0 : i32
    %c0_i32_0 = arith.constant 0 : i32
    %c0_i32_1 = arith.constant 0 : i32
    return %c0_i32, %c0_i32_0 : i32, i32
  }
  func.func @transform_7(%arg0: i32, %arg1: i32) -> (i32, i32) {
    %c0_i32 = arith.constant 0 : i32
    %c0_i32_0 = arith.constant 0 : i32
    %c0_i32_1 = arith.constant 0 : i32
    return %c0_i32, %c0_i32_0 : i32, i32
  }
  func.func @transform_8(%arg0: i32, %arg1: i32) -> (i32, i32) {
    %c0_i32 = arith.constant 0 : i32
    %c0_i32_0 = arith.constant 0 : i32
    %c0_i32_1 = arith.constant 0 : i32
    return %c0_i32, %c0_i32_0 : i32, i32
  }
  func.func @transform_9(%arg0: i32, %arg1: i32) -> (i32, i32, i32) {
    %c0_i32 = arith.constant 0 : i32
    %c0_i32_0 = arith.constant 0 : i32
    return %arg0, %arg1, %c0_i32 : i32, i32, i32
  }
}

module attributes {stable_mosaic.version = 11 : i64} {
  func.func @_linear_kernel(%arg0: i32, %arg1: i32, %arg2: memref<16x64xf32, #tpu.memory_space<vmem>>, %arg3: memref<64x32xf32, #tpu.memory_space<vmem>>, %arg4: memref<16x32xf32, #tpu.memory_space<vmem>>) attributes {dimension_semantics = [#tpu.dimension_semantics<parallel>, #tpu.dimension_semantics<parallel>], iteration_bounds = array<i64: 1, 1>, scalar_prefetch = 0 : i64, scratch_operands = 0 : i64, tpu.core_type = #tpu.core_type<tc>, window_params = [{transform_indices = @transform_0, window_bounds = array<i64: 16, 64>}, {transform_indices = @transform_1, window_bounds = array<i64: 64, 32>}, {transform_indices = @transform_2, window_bounds = array<i64: 16, 32>}]} {
    %c0 = arith.constant 0 : index
    %c0_0 = arith.constant 0 : index
    %0 = vector.load %arg2[%c0, %c0_0] : memref<16x64xf32, #tpu.memory_space<vmem>>, vector<16x64xf32>
    %c0_1 = arith.constant 0 : index
    %c0_2 = arith.constant 0 : index
    %1 = vector.load %arg3[%c0_1, %c0_2] : memref<64x32xf32, #tpu.memory_space<vmem>>, vector<64x32xf32>
    %cst = arith.constant dense<0.000000e+00> : vector<16x32xf32>
    %2 = tpu.matmul %0, %1, %cst {dimension_numbers = #tpu.dot_dimension_numbers<[1], [0], [0], [1], [0, 0, 1, 1], [], []>, precision = #tpu.contract_precision<fp32>} : vector<16x64xf32>, vector<64x32xf32>, vector<16x32xf32> -> vector<16x32xf32>
    %c0_3 = arith.constant 0 : index
    %c0_4 = arith.constant 0 : index
    %3 = vector.load %arg4[%c0_3, %c0_4] : memref<16x32xf32, #tpu.memory_space<vmem>>, vector<16x32xf32>
    tpu.vector_store %arg4[%c0_3, %c0_4], %2 {strides = array<i32>} : memref<16x32xf32, #tpu.memory_space<vmem>>, vector<16x32xf32>,
    return
  }
  func.func @transform_0(%arg0: i32, %arg1: i32) -> (i32, i32) {
    %c0_i32 = arith.constant 0 : i32
    %c0_i32_0 = arith.constant 0 : i32
    return %arg0, %c0_i32 : i32, i32
  }
  func.func @transform_1(%arg0: i32, %arg1: i32) -> (i32, i32) {
    %c0_i32 = arith.constant 0 : i32
    %c0_i32_0 = arith.constant 0 : i32
    return %c0_i32, %arg1 : i32, i32
  }
  func.func @transform_2(%arg0: i32, %arg1: i32) -> (i32, i32) {
    %c0_i32 = arith.constant 0 : i32
    return %arg0, %arg1 : i32, i32
  }
}

</mosaic_0001>

<bundles_post_ra>
// kernel: mamba_block_forward.5
= control target key start
LH: loop header
LB: loop body
LE: loop exit
PB: predicated region body
PF: predicated region fallthrough
CT: control target
= control target key end

     0   :  { %s546_s12 = smov 0   ;;  %s548_s13 = smov 0   ;;  %s601_s0 = inlined_call_operand.vmem [shape: f32[2,8,64], index: 0, kind: input, shape index: {}]   ;;  %s602_s1 = inlined_call_operand.vmem [shape: f32[4,64], index: 1, kind: input, shape index: {}]   ;;  %s603_s2 = inlined_call_operand.vmem [shape: f32[1,64], index: 2, kind: input, shape index: {}]   ;;  %s604_s3 = inlined_call_operand.vmem [shape: f32[2,8,64], index: 3, kind: output, shape index: {}]  }
   0x1   :  { %s550_s14 = smov 0  }
   0x2 LB: > { %s32_s15 = sadd.s32 1, %s519_s13  ;;  %p462_p0 = scmp.ge.s32.totalorder %s523_s14, 1  ;;  %s523_s14 = sphi %s550_s14, %s13_s14   ;;  %s519_s13 = sphi %s548_s13, %s606_s13   ;;  %s515_s12 = sphi %s546_s12, %s605_s12  }
   0x3   : > { %p34_p1 = scmp.ge.s32.totalorder %s32_s15, 2  ;;  %p186_p2 = scmp.lt.s32.totalorder %s523_s14, 3 }
   0x5   : > { %s608_s15 = smov (%p34_p1, %s32_s15), 0  ;;  %p187_p3 = pnand %p462_p0, %p186_p2 }
   0x6   : > { %vm258_vm0 = vcmask (!%p187_p3), 518144   ;;  %p227_p4 = scmp.lt.s32.totalorder (!%p187_p3), %s515_s12, 1  ;;  %v525_v0 = vmov (!%p187_p3), 0.0   ;;  %vm265_vm1 = vcmask (!%p187_p3), 1042432   ;;  %v466_v2 = vld [vmem:[%s602_s1 + $0x1] ss:$0 sm:$0xff] (!%p187_p3) }
   0x7   : > { %190 = sbr.rel (%p187_p3) target bundleno = 65 (0x41), region = 32  ;;  %259 = vst.msk [vmem:[#allocation2] sm:$0x7] (!%p187_p3), %vm258_vm0, %v525_v0  ;;  %v467_v3 = vld [vmem:[%s602_s1 + $0x2] ss:$0 sm:$0xff] (!%p187_p3)  ;;  %vm285_vm2 = vcmask (!%p187_p3), 1046528  }
   0x8   : > { %v468_v5 = vld [vmem:[%s602_s1 + $0x3] ss:$0 sm:$0xff] (!%p187_p3)  ;;  %v465_v10 = vld [vmem:[%s602_s1] ss:$0 sm:$0xff] (!%p187_p3)  ;;  %vm300_vm3 = vcmask (!%p187_p3), 1045504   ;;  %vm315_vm4 = vcmask (!%p187_p3), 1044480  }
   0x9   : > { %v469_v27 = vld [vmem:[%s603_s2] ss:$0 sm:$0xff] (!%p187_p3)  ;;  %vm336_vm5 = vcmask (!%p187_p3), 523264  }
   0xe   : > { %s610_s12 = smov (!%p227_p4, %s515_s12), 1  ;;  %v261_v6 = vld [vmem:[#allocation2] sm:$0x7] }
   0xf   : > { %s463_s16 = sshll.u32 %s610_s12, 3 }
  0x10   : > { %s236_s19 = scalar_lea.vmem %s601_s0, %s463_s16  ;;  %s253_s5 = scalar_lea.vmem %s604_s3, %s463_s16 }
  0x11   : > { %v260_v1 = vld [vmem:[%s236_s19] sm:$0xff] }
  0x12   : > { %v263_v4 = vrot.slane %v260_v1, 5 }
  0x14   : > { %v266_v7 = vsel %vm265_vm1, %v261_v6, %v263_v4  ;;  %268 = vst.msk [vmem:[#allocation2] sm:$0x7] %vm258_vm0, %v263_v4  ;;  %v282_v8 = vmul.f32 %v466_v2, %v263_v4  ;;  %v297_v9 = vmul.f32 %v467_v3, %v263_v4  ;;  %v312_v14 = vmul.f32 %v468_v5, %v263_v4 }
  0x15   : > { %v281_v11 = vmul.f32 %v466_v2, %v266_v7  ;;  %v296_v12 = vmul.f32 %v467_v3, %v266_v7  ;;  %v311_v13 = vmul.f32 %v468_v5, %v266_v7  ;;  %v274_v19 = vmul.f32 %v465_v10, %v266_v7 }
  0x16   : > { %v287_v15 = vrot.slane %v282_v8, 1  ;;  %v302_v18 = vrot.slane %v297_v9, 2  ;;  %v317_v22 = vrot.slane %v312_v14, 3 }
  0x17   : > { %v286_v16 = vrot.slane %v281_v11, 1  ;;  %v301_v17 = vrot.slane %v296_v12, 2  ;;  %v316_v21 = vrot.slane %v311_v13, 3 }
  0x19   : > { %v288_v20 = vsel %vm285_vm2, %v286_v16, %v287_v15  ;;  %v303_v24 = vsel %vm300_vm3, %v301_v17, %v302_v18  ;;  %v318_v26 = vsel %vm315_vm4, %v316_v21, %v317_v22 }
  0x1a   : > { %v290_v23 = vadd.f32 %v288_v20, %v274_v19 }
  0x1c   : > { %v305_v25 = vadd.f32 %v303_v24, %v290_v23 }
  0x1e   : > { %v320_v28 = vadd.f32 %v318_v26, %v305_v25 }
  0x20   : > { %v328_v29 = vadd.f32 %v469_v27, %v320_v28 }
  0x22   : > { %v329_v30 = vsub.f32 0.0, %v328_v29 }
  0x24   : > { %v330_v31 = vmul.f32 1.442695, %v329_v30 }
  0x26   : > { %497 = vpow2.f32 %v330_v31 }
  0x30   : > { %v498_v32 = vpop.eup %497 }
  0x31   : > { %v332_v33 = vadd.f32 1.0, %v498_v32 }
  0x33   : > { %499 = vrcp.f32 %v332_v33 }
  0x3d   : > { %v500_v34 = vpop.eup %499 }
  0x3e   : > { %v335_v35 = vmul.f32 %v500_v34, %v328_v29 }
  0x40   : > { %337 = vst.msk [vmem:[%s253_s5] sm:$0xff] %vm336_vm5, %v335_v35 }
  0x41 PF: > { %s13_s14 = sadd.s32 1, %s523_s14   ;;  %s605_s12 = smov %s519_s13 }
  0x42   : > { %p10_p5 = scmp.ge.s32.totalorder %s13_s14, 4   ;;  %s606_s13 = smov %s608_s15 }
  0x44   :  { %12 = sbr.rel (!%p10_p5) target bundleno = 2 (0x2), region = 72 }

// kernel: mamba_block_forward.4
= control target key start
LH: loop header
LB: loop body
LE: loop exit
PB: predicated region body
PF: predicated region fallthrough
CT: control target
= control target key end

     0   :  { %10 = vsyncpa [#allocation3], 0  ;;  %s1714_s0 = inlined_call_operand.hbm [shape: f32[16,32], index: 0, kind: input, shape index: {}]   ;;  %s1715_s1 = inlined_call_operand.vmem [shape: f32[32,64], index: 1, kind: input, shape index: {}]   ;;  %s1716_s2 = inlined_call_operand.hbm [shape: f32[32,64], index: 2, kind: input, shape index: {}]   ;;  %s1717_s3 = inlined_call_operand.vmem [shape: f32[16,64], index: 3, kind: output, shape index: {0}]   ;;  %s1718_s4 = inlined_call_operand.vmem [shape: f32[16,64], index: 4, kind: output, shape index: {1}]  }
   0x1   :  { %11 = vsyncpa [#allocation5], 0  ;;  %s1504_s15 = smov [#allocation2]   ;;  %s1456_s19 = scalar_lea.hbm %s1714_s0, 256 }
   0x2   :  { %s17_s16 = sshll.u32 %s1504_s15, 4  ;;  %p1457_p0 = scmp.ne.s32.totalorder %s1714_s0, %s1456_s19  ;;  %s18_s16 = int_to_ptr.vmem [resolvable:$true] %s17_s16 }
   0x3   :  { %p1460_p1 = scmp.lt.u32.totalorder %s1456_s19, %s1714_s0 }
   0x5   :  { %p1462_p2 = pnand %p1460_p1, %p1457_p0 }
   0x7   :  { %1465 = shalt.err (!%p1462_p2)
}
   0x8   :  { %s1466_s24 = scalar_lea.vmem %s18_s16, 256  ;;  %p1471_p4 = scmp.lt.s32.totalorder %s18_s16, %s18_s16 }
   0x9   :  { %p1467_p3 = scmp.ne.s32.totalorder %s18_s16, %s1466_s24  ;;  %p1472_p5 = scmp.lt.s32.totalorder %s1466_s24, %s1466_s24 }
   0xb   :  { %p1473_p6 = por %p1472_p5, %p1471_p4 }
   0xd   :  { %p1474_p7 = pnand %p1473_p6, %p1467_p3 }
   0xf   :  { %1477 = shalt.err (!%p1474_p7)
}
  0x10   :  { %s1505_s25 = smov 128   ;;  %s1506_s26 = smov 8  }
  0x11   :  { %23 = dma.hbm_to_vmem [thread:$0]  %s1714_s0, 256, %s18_s16, [#allocation3], %s1505_s25, %s1505_s25, %s1506_s26  }
  0x12   :  { %s1507_s29 = smov [#allocation4]   ;;  %s1478_s7 = scalar_lea.hbm %s1716_s2, 512 }
  0x13   :  { %s31_s30 = sshll.u32 %s1507_s29, 4  ;;  %p1479_p8 = scmp.ne.s32.totalorder %s1716_s2, %s1478_s7  ;;  %s32_s30 = int_to_ptr.vmem [resolvable:$true] %s31_s30 }
  0x14   :  { %p1482_p9 = scmp.lt.u32.totalorder %s1478_s7, %s1716_s2 }
  0x16   :  { %p1484_p10 = pnand %p1482_p9, %p1479_p8 }
  0x18   :  { %1487 = shalt.err (!%p1484_p10)
}
  0x19   :  { %s1488_s12 = scalar_lea.vmem %s32_s30, 512  ;;  %p1493_p12 = scmp.lt.s32.totalorder %s32_s30, %s32_s30 }
  0x1a   :  { %p1489_p11 = scmp.ne.s32.totalorder %s32_s30, %s1488_s12  ;;  %p1494_p13 = scmp.lt.s32.totalorder %s1488_s12, %s1488_s12 }
  0x1c   :  { %p1495_p0 = por %p1494_p13, %p1493_p12 }
  0x1e   :  { %p1496_p1 = pnand %p1495_p0, %p1489_p11 }
  0x20   :  { %1499 = shalt.err (!%p1496_p1)
}
  0x21   :  { %37 = dma.hbm_to_vmem [thread:$0]  %s1716_s2, 512, %s32_s30, [#allocation5], %s1505_s25, %s1505_s25, %s1506_s26  }
  0x22   :  { %1500 = dma.done.wait [#allocation3], 256  }
  0x23   :  { %1501 = vsyncadd [#allocation3], 4294967040 }
  0x24   :  { %1502 = dma.done.wait [#allocation5], 512  }
  0x25   :  { %1503 = vsyncadd [#allocation5], 4294966784  ;;  %v46_v0 = vld [vmem:[%s1715_s1] sm:$0xff]  ;;  %v47_v1 = vld [vmem:[%s1715_s1 + $0x8] sm:$0xff]  ;;  %vm50_vm0 = vcmask 261120   ;;  %vm585_vm1 = vcmask 523264  }
  0x26   :  { %v588_v2 = vld [vmem:[#allocation4] sm:$0xff]  ;;  %v58_v3 = vand.u32 4294901760, %v46_v0  ;;  %v61_v4 = vand.u32 4294901760, %v47_v1  ;;  %v589_v5 = vld [vmem:[#allocation4 + $0x8] sm:$0xff]  ;;  %v590_v12 = vld [vmem:[#allocation4 + $0x10] sm:$0xff] }
  0x27   :  { %v593_v6 = vand.u32 4294901760, %v588_v2  ;;  %v48_v7 = vld [vmem:[%s1715_s1 + $0x10] sm:$0xff]  ;;  %v49_v8 = vld [vmem:[%s1715_s1 + $0x18] sm:$0xff]  ;;  %v596_v9 = vand.u32 4294901760, %v589_v5  ;;  %v591_v13 = vld [vmem:[#allocation4 + $0x18] sm:$0xff]  ;;  %v599_v16 = vand.u32 4294901760, %v590_v12 }
  0x28   :  { %v64_v10 = vand.u32 4294901760, %v48_v7  ;;  %v67_v11 = vand.u32 4294901760, %v49_v8  ;;  %v44_v14 = vld [vmem:[#allocation2] sm:$0xff]  ;;  %v1569_v15 = vpack.c.bf16 %v61_v4, %v58_v3  ;;  %v602_v17 = vand.u32 4294901760, %v591_v13  ;;  %v45_v18 = vld [vmem:[#allocation2 + $0x8] sm:$0xff] }
  0x29   :  { %v52_v19 = vsel %vm50_vm0, %v44_v14, 0  ;;  %v1572_v20 = vpack.c.bf16 %v596_v9, %v593_v6  ;;  %v55_v22 = vsel %vm50_vm0, %v45_v18, 0  ;;  %v1584_v26 = vsub.f32 %v46_v0, %v58_v3 }
  0x2a   :  { %v1574_v21 = vpack.c.bf16 %v67_v11, %v64_v10  ;;  %v1577_v23 = vand.u32 4294901760, %v52_v19  ;;  %1337 = vmatprep.subr.bf16.mxu0 %v1569_v15  ;;  %v1580_v24 = vpack.c.bf16 %v602_v17, %v599_v16  ;;  %v1582_v25 = vand.u32 4294901760, %v55_v22 }
  0x2b   :  { %v1586_v27 = vsub.f32 %v47_v1, %v61_v4  ;;  %1385 = vmatprep.subr.bf16.mxu1 %v1572_v20  ;;  %1339 = vmatpush3.bf16.msra.mxu0 %v1569_v15  ;;  %v1593_v29 = vsub.f32 %v588_v2, %v593_v6  ;;  %v1595_v30 = vsub.f32 %v589_v5, %v596_v9  ;;  %v149_v32 = vand.u32 4294901760, %v1584_v26 }
  0x2c   :  { %v1591_v28 = vsub.f32 %v52_v19, %v1577_v23  ;;  %1387 = vmatpush3.bf16.msra.mxu1 %v1572_v20  ;;  %1341 = vmatprep.subr.bf16.mxu0 %v1574_v21  ;;  %v1600_v31 = vsub.f32 %v55_v22, %v1582_v25  ;;  %v1604_v34 = vsub.f32 %v48_v7, %v64_v10 }
  0x2d   :  { %v156_v33 = vand.u32 4294901760, %v1586_v27  ;;  %1389 = vmatprep.subr.bf16.mxu1 %v1580_v24  ;;  %v684_v36 = vand.u32 4294901760, %v1593_v29  ;;  %v691_v37 = vand.u32 4294901760, %v1595_v30  ;;  %v1612_v38 = vsub.f32 %v49_v8, %v67_v11 }
  0x2e   :  { %v1608_v35 = vand.u32 4294901760, %v1591_v28  ;;  %v1615_v39 = vand.u32 4294901760, %v1600_v31  ;;  %v150_v40 = vsub.f32 %v1584_v26, %v149_v32  ;;  %v163_v42 = vand.u32 4294901760, %v1604_v34 }
  0x2f   :  { %v157_v41 = vsub.f32 %v1586_v27, %v156_v33  ;;  %1343 = vmatpush3.bf16.msra.mxu0 %v1574_v21  ;;  %v685_v44 = vsub.f32 %v1593_v29, %v684_v36  ;;  %v692_v45 = vsub.f32 %v1595_v30, %v691_v37  ;;  %v170_v46 = vand.u32 4294901760, %v1612_v38 }
  0x30   :  { %v129_v43 = vsub.f32 %v1591_v28, %v1608_v35  ;;  %1391 = vmatpush3.bf16.msra.mxu1 %v1580_v24  ;;  %v139_v47 = vsub.f32 %v1600_v31, %v1615_v39  ;;  %v151_v48 = vand.u32 4294901760, %v150_v40  ;;  %v164_v50 = vsub.f32 %v1604_v34, %v163_v42 }
  0x31   :  { %v158_v49 = vand.u32 4294901760, %v157_v41  ;;  %v686_v52 = vand.u32 4294901760, %v685_v44  ;;  %v693_v53 = vand.u32 4294901760, %v692_v45  ;;  %v171_v54 = vsub.f32 %v1612_v38, %v170_v46 }
  0x32   :  { %v130_v51 = vand.u32 4294901760, %v129_v43  ;;  %v140_v55 = vand.u32 4294901760, %v139_v47  ;;  %v165_v57 = vand.u32 4294901760, %v164_v50  ;;  %v1643_v58 = vsub.f32 %v590_v12, %v599_v16 }
  0x33   :  { %v1344_v56 = vpack.c.bf16 %v158_v49, %v151_v48  ;;  %v1392_v59 = vpack.c.bf16 %v693_v53, %v686_v52  ;;  %v172_v60 = vand.u32 4294901760, %v171_v54  ;;  %v704_v61 = vsub.f32 %v591_v13, %v602_v17 }
  0x34   :  { %1212 = vmatprep.mubr.f32.mxu0 %v130_v51  ;;  %1278 = vmatprep.mubr.f32.mxu1 %v130_v51  ;;  %v698_v62 = vand.u32 4294901760, %v1643_v58  ;;  %v1352_v3 = vpack.c.bf16 %v1586_v27, %v1584_v26  ;;  %v1400_v7 = vpack.c.bf16 %v1595_v30, %v1593_v29  ;;  %v1356_v8 = vpack.c.bf16 %v1612_v38, %v1604_v34 }
  0x35   :  { %1213 = vmatmul.mubr.f32.vlgmr.msra.gmra.mrb[0].mxu0 %v140_v55  ;;  %1345 = vmatprep.subr.bf16.mxu0 %v1344_v56  ;;  %v1348_v63 = vpack.c.bf16 %v172_v60, %v165_v57  ;;  %v705_v0 = vand.u32 4294901760, %v704_v61  ;;  %v1404_v9 = vpack.c.bf16 %v704_v61, %v1643_v58  ;;  %v1368_v10 = vpack.c.bf16 %v156_v33, %v149_v32 }
  0x36   :  { %1279 = vmatmul.mubr.f32.vlgmr.msra.gmra.mrb[0].mxu1 %v140_v55  ;;  %1393 = vmatprep.subr.bf16.mxu1 %v1392_v59  ;;  %v699_v1 = vsub.f32 %v1643_v58, %v698_v62  ;;  %v1416_v11 = vpack.c.bf16 %v691_v37, %v684_v36  ;;  %v1372_v12 = vpack.c.bf16 %v170_v46, %v163_v42 }
  0x37   :  { %1347 = vmatpush3.bf16.msra.mxu0 %v1344_v56  ;;  %1395 = vmatpush3.bf16.msra.mxu1 %v1392_v59  ;;  %v706_v2 = vsub.f32 %v704_v61, %v705_v0  ;;  %v1420_v13 = vpack.c.bf16 %v705_v0, %v698_v62 }
  0x38   :  { %1349 = vmatprep.subr.bf16.mxu0 %v1348_v63  ;;  %1223 = vmatprep.mubr.f32.mxu0 %v1577_v23  ;;  %v700_v4 = vand.u32 4294901760, %v699_v1 }
  0x39   :  { %1289 = vmatprep.mubr.f32.mxu1 %v1577_v23  ;;  %v707_v5 = vand.u32 4294901760, %v706_v2 }
  0x3b   :  { %1351 = vmatpush3.bf16.msra.mxu0 %v1348_v63  ;;  %v1396_v6 = vpack.c.bf16 %v707_v5, %v700_v4 }
  0x3c   :  { %1353 = vmatprep.subr.bf16.mxu0 %v1352_v3 }
  0x3d   :  { %1397 = vmatprep.subr.bf16.mxu1 %v1396_v6 }
  0x3e   :  { %1224 = vmatmul.mubr.f32.vlgmr.msra.gmra.mrb[0].mxu0 %v1582_v25  ;;  %1399 = vmatpush3.bf16.msra.mxu1 %v1396_v6 }
  0x3f   :  { %1355 = vmatpush3.bf16.msra.mxu0 %v1352_v3  ;;  %1401 = vmatprep.subr.bf16.mxu1 %v1400_v7 }
  0x40   :  { %1357 = vmatprep.subr.bf16.mxu0 %v1356_v8  ;;  %1234 = vmatprep.mubr.f32.mxu0 %v1591_v28 }
  0x41   :  { %1290 = vmatmul.mubr.f32.vlgmr.msra.gmra.mrb[0].mxu1 %v1582_v25 }
  0x42   :  { %1403 = vmatpush3.bf16.msra.mxu1 %v1400_v7  ;;  %1300 = vmatprep.mubr.f32.mxu1 %v1591_v28 }
  0x43   :  { %1359 = vmatpush3.bf16.msra.mxu0 %v1356_v8  ;;  %1405 = vmatprep.subr.bf16.mxu1 %v1404_v9 }
  0x44   :  { %1361 = vmatprep.subr.bf16.mxu0 %v1569_v15 }
  0x46   :  { %1235 = vmatmul.mubr.f32.vlgmr.msra.gmra.mrb[0].mxu0 %v1600_v31  ;;  %1407 = vmatpush3.bf16.msra.mxu1 %v1404_v9 }
  0x47   :  { %1363 = vmatpush3.bf16.msra.mxu0 %v1569_v15  ;;  %1409 = vmatprep.subr.bf16.mxu1 %v1572_v20 }
  0x48   :  { %1365 = vmatprep.subr.bf16.mxu0 %v1574_v21  ;;  %1245 = vmatprep.mubr.f32.mxu0 %v1608_v35 }
  0x49   :  { %1301 = vmatmul.mubr.f32.vlgmr.msra.gmra.mrb[0].mxu1 %v1600_v31 }
  0x4a   :  { %1411 = vmatpush3.bf16.msra.mxu1 %v1572_v20  ;;  %1311 = vmatprep.mubr.f32.mxu1 %v1608_v35 }
  0x4b   :  { %1367 = vmatpush3.bf16.msra.mxu0 %v1574_v21  ;;  %1413 = vmatprep.subr.bf16.mxu1 %v1580_v24 }
  0x4c   :  { %1369 = vmatprep.subr.bf16.mxu0 %v1368_v10 }
  0x4e   :  { %1246 = vmatmul.mubr.f32.vlgmr.msra.gmra.mrb[0].mxu0 %v1615_v39  ;;  %1415 = vmatpush3.bf16.msra.mxu1 %v1580_v24 }
  0x4f   :  { %1371 = vmatpush3.bf16.msra.mxu0 %v1368_v10  ;;  %1417 = vmatprep.subr.bf16.mxu1 %v1416_v11 }
  0x50   :  { %1373 = vmatprep.subr.bf16.mxu0 %v1372_v12  ;;  %1256 = vmatprep.mubr.f32.mxu0 %v1577_v23 }
  0x51   :  { %1312 = vmatmul.mubr.f32.vlgmr.msra.gmra.mrb[0].mxu1 %v1615_v39 }
  0x52   :  { %1419 = vmatpush3.bf16.msra.mxu1 %v1416_v11  ;;  %1322 = vmatprep.mubr.f32.mxu1 %v1577_v23 }
  0x53   :  { %1375 = vmatpush3.bf16.msra.mxu0 %v1372_v12  ;;  %1421 = vmatprep.subr.bf16.mxu1 %v1420_v13 }
  0x54   :  { %1377 = vmatprep.subr.bf16.mxu0 %v1569_v15 }
  0x56   :  { %1257 = vmatmul.mubr.f32.vlgmr.msra.gmra.mrb[0].mxu0 %v1582_v25  ;;  %1423 = vmatpush3.bf16.msra.mxu1 %v1420_v13 }
  0x57   :  { %1379 = vmatpush3.bf16.msra.mxu0 %v1569_v15  ;;  %1425 = vmatprep.subr.bf16.mxu1 %v1572_v20 }
  0x58   :  { %1381 = vmatprep.subr.bf16.mxu0 %v1574_v21  ;;  %1267 = vmatprep.mubr.f32.mxu0 %v1577_v23 }
  0x59   :  { %1323 = vmatmul.mubr.f32.vlgmr.msra.gmra.mrb[0].mxu1 %v1582_v25 }
  0x5a   :  { %1427 = vmatpush3.bf16.msra.mxu1 %v1572_v20  ;;  %1333 = vmatprep.mubr.f32.mxu1 %v1577_v23 }
  0x5b   :  { %1383 = vmatpush3.bf16.msra.mxu0 %v1574_v21  ;;  %1429 = vmatprep.subr.bf16.mxu1 %v1580_v24 }
  0x5e   :  { %1268 = vmatmul.mubr.f32.vlgmr.msra.gmra.mrb[0].mxu0 %v1582_v25  ;;  %1431 = vmatpush3.bf16.msra.mxu1 %v1580_v24 }
  0x61   :  { %1334 = vmatmul.mubr.f32.vlgmr.msra.gmra.mrb[0].mxu1 %v1582_v25 }
 0x131   :  { %v1269_v14 = vpop.f32.mrb[0].mxu0 }
 0x132   :  { %587 = vst.msk [vmem:[%s1717_s3 + $0x8] sm:$0xff] %vm585_vm1, %v1269_v14  ;;  %v575_v15 = vpop.f32.mrb[1].mxu0 }
 0x133   :  { %586 = vst.msk [vmem:[%s1717_s3] sm:$0xff] %vm585_vm1, %v575_v15 }
 0x134   :  { %v1335_v16 = vpop.f32.mrb[0].mxu1 }
 0x135   :  { %1121 = vst.msk [vmem:[%s1718_s4 + $0x8] sm:$0xff] %vm585_vm1, %v1335_v16  ;;  %v1110_v17 = vpop.f32.mrb[1].mxu1 }
 0x136   :  { %1120 = vst.msk [vmem:[%s1718_s4] sm:$0xff] %vm585_vm1, %v1110_v17 }
 0x137   :  { %1130 = vsyncpa [#allocation3], 1 }
 0x138   :  { %1131 = vsyncpa [#allocation5], 1 }

// kernel: mamba_block_forward.7
= control target key start
LH: loop header
LB: loop body
LE: loop exit
PB: predicated region body
PF: predicated region fallthrough
CT: control target
= control target key end

     0   :  { %vm22_vm0 = vcmask 523264   ;;  %s1086_s0 = inlined_call_operand.vmem [shape: f32[16,64], index: 0, kind: input, shape index: {}]   ;;  %s1087_s1 = inlined_call_operand.vmem [shape: f32[64,32], index: 1, kind: input, shape index: {}]   ;;  %s1088_s2 = inlined_call_operand.hbm [shape: f32[16,32], index: 2, kind: output, shape index: {}]  }
   0x1   :  { %v14_v0 = vld [vmem:[%s1087_s1] sm:$0xff]  ;;  %v15_v1 = vld [vmem:[%s1087_s1 + $0x8] sm:$0xff]  ;;  %v16_v2 = vld [vmem:[%s1087_s1 + $0x10] sm:$0xff] }
   0x2   :  { %v30_v3 = vand.u32 4294901760, %v14_v0  ;;  %v33_v4 = vand.u32 4294901760, %v15_v1  ;;  %v17_v5 = vld [vmem:[%s1087_s1 + $0x18] sm:$0xff]  ;;  %v36_v6 = vand.u32 4294901760, %v16_v2  ;;  %v18_v7 = vld [vmem:[%s1087_s1 + $0x20] sm:$0xff]  ;;  %v19_v8 = vld [vmem:[%s1087_s1 + $0x28] sm:$0xff] }
   0x3   :  { %v39_v9 = vand.u32 4294901760, %v17_v5  ;;  %v42_v10 = vand.u32 4294901760, %v18_v7  ;;  %v45_v11 = vand.u32 4294901760, %v19_v8  ;;  %v20_v12 = vld [vmem:[%s1087_s1 + $0x30] sm:$0xff]  ;;  %v12_v13 = vld [vmem:[%s1086_s0] sm:$0xff]  ;;  %v21_v15 = vld [vmem:[%s1087_s1 + $0x38] sm:$0xff] }
   0x4   :  { %v977_v14 = vpack.c.bf16 %v33_v4, %v30_v3  ;;  %v13_v16 = vld [vmem:[%s1086_s0 + $0x8] sm:$0xff]  ;;  %v24_v17 = vsel %vm22_vm0, %v12_v13, 0 }
   0x5   :  { %7 = vsyncpa [#allocation3], 0  ;;  %v986_v18 = vpack.c.bf16 %v39_v9, %v36_v6  ;;  %v48_v19 = vand.u32 4294901760, %v20_v12  ;;  %v27_v20 = vsel %vm22_vm0, %v13_v16, 0  ;;  %v989_v21 = vand.u32 4294901760, %v24_v17  ;;  %s935_s0 = smov [#allocation2]  }
   0x6   :  { %803 = vmatprep.subr.bf16.mxu1 %v977_v14  ;;  %851 = vmatprep.subr.bf16.mxu0 %v977_v14  ;;  %v993_v22 = vpack.c.bf16 %v45_v11, %v42_v10  ;;  %v995_v23 = vand.u32 4294901760, %v27_v20  ;;  %v997_v24 = vsub.f32 %v14_v0, %v30_v3  ;;  %v999_v25 = vsub.f32 %v15_v1, %v33_v4  ;;  %s617_s1 = sshll.u32 %s935_s0, 4  ;;  %s618_s1 = int_to_ptr.vmem [resolvable:$true] %s617_s1 }
   0x7   :  { %805 = vmatpush3.bf16.msra.mxu1 %v977_v14  ;;  %853 = vmatpush3.bf16.msra.mxu0 %v977_v14  ;;  %v51_v26 = vand.u32 4294901760, %v21_v15  ;;  %v1004_v27 = vsub.f32 %v24_v17, %v989_v21  ;;  %v1006_v28 = vsub.f32 %v16_v2, %v36_v6  ;;  %v1008_v29 = vsub.f32 %v17_v5, %v39_v9  ;;  %s911_s29 = scalar_lea.vmem %s618_s1, 256  ;;  %p916_p1 = scmp.lt.s32.totalorder %s618_s1, %s618_s1 }
   0x8   :  { %807 = vmatprep.subr.bf16.mxu1 %v986_v18  ;;  %855 = vmatprep.subr.bf16.mxu0 %v986_v18  ;;  %v125_v30 = vand.u32 4294901760, %v997_v24  ;;  %v132_v31 = vand.u32 4294901760, %v999_v25  ;;  %v1015_v32 = vsub.f32 %v27_v20, %v995_v23  ;;  %v1017_v33 = vsub.f32 %v18_v7, %v42_v10  ;;  %p912_p0 = scmp.ne.s32.totalorder %s618_s1, %s911_s29  ;;  %p917_p2 = scmp.lt.s32.totalorder %s911_s29, %s911_s29 }
   0x9   :  { %v104_v34 = vand.u32 4294901760, %v1004_v27  ;;  %v139_v35 = vand.u32 4294901760, %v1006_v28  ;;  %v146_v36 = vand.u32 4294901760, %v1008_v29  ;;  %v1025_v40 = vsub.f32 %v19_v8, %v45_v11 }
   0xa   :  { %v126_v37 = vsub.f32 %v997_v24, %v125_v30  ;;  %v133_v38 = vsub.f32 %v999_v25, %v132_v31  ;;  %v114_v39 = vand.u32 4294901760, %v1015_v32  ;;  %v1034_v44 = vpack.c.bf16 %v51_v26, %v48_v19  ;;  %p918_p3 = por %p917_p2, %p916_p1 }
   0xb   :  { %809 = vmatpush3.bf16.msra.mxu1 %v986_v18  ;;  %857 = vmatpush3.bf16.msra.mxu0 %v986_v18  ;;  %v105_v41 = vsub.f32 %v1004_v27, %v104_v34  ;;  %v140_v42 = vsub.f32 %v1006_v28, %v139_v35  ;;  %v147_v43 = vsub.f32 %v1008_v29, %v146_v36  ;;  %v153_v47 = vand.u32 4294901760, %v1017_v33 }
   0xc   :  { %811 = vmatprep.subr.bf16.mxu1 %v993_v22  ;;  %859 = vmatprep.subr.bf16.mxu0 %v993_v22  ;;  %v127_v45 = vand.u32 4294901760, %v126_v37  ;;  %v134_v46 = vand.u32 4294901760, %v133_v38  ;;  %v115_v49 = vsub.f32 %v1015_v32, %v114_v39  ;;  %v160_v50 = vand.u32 4294901760, %v1025_v40  ;;  %p919_p4 = pnand %p918_p3, %p912_p0 }
   0xd   :  { %v106_v48 = vand.u32 4294901760, %v105_v41  ;;  %761 = vmatprep.mubr.f32.mxu0 %v104_v34  ;;  %v1039_v51 = vsub.f32 %v20_v12, %v48_v19  ;;  %v866_v52 = vpack.c.bf16 %v132_v31, %v125_v30  ;;  %v141_v53 = vand.u32 4294901760, %v140_v42 }
   0xe   :  { %v148_v54 = vand.u32 4294901760, %v147_v43  ;;  %v173_v55 = vsub.f32 %v21_v15, %v51_v26  ;;  %v818_v56 = vpack.c.bf16 %v134_v46, %v127_v45  ;;  %v154_v57 = vsub.f32 %v1017_v33, %v153_v47 }
   0xf   :  { %813 = vmatpush3.bf16.msra.mxu1 %v993_v22  ;;  %861 = vmatpush3.bf16.msra.mxu0 %v993_v22  ;;  %v161_v58 = vsub.f32 %v1025_v40, %v160_v50  ;;  %v167_v59 = vand.u32 4294901760, %v1039_v51  ;;  %v116_v61 = vand.u32 4294901760, %v115_v49  ;;  %v870_v63 = vpack.c.bf16 %v146_v36, %v139_v35 }
  0x10   :  { %815 = vmatprep.subr.bf16.mxu1 %v1034_v44  ;;  %863 = vmatprep.subr.bf16.mxu0 %v1034_v44  ;;  %v174_v60 = vand.u32 4294901760, %v173_v55  ;;  %v822_v62 = vpack.c.bf16 %v148_v54, %v141_v53  ;;  %v155_v0 = vand.u32 4294901760, %v154_v57  ;;  %v874_v5 = vpack.c.bf16 %v160_v50, %v153_v47 }
  0x11   :  { %704 = vmatprep.mubr.f32.mxu1 %v106_v48  ;;  %v162_v1 = vand.u32 4294901760, %v161_v58  ;;  %v168_v2 = vsub.f32 %v1039_v51, %v167_v59  ;;  %v834_v10 = vpack.c.bf16 %v999_v25, %v997_v24  ;;  %v838_v11 = vpack.c.bf16 %v1008_v29, %v1006_v28 }
  0x12   :  { %v175_v3 = vsub.f32 %v173_v55, %v174_v60  ;;  %v878_v9 = vpack.c.bf16 %v174_v60, %v167_v59  ;;  %v842_v12 = vpack.c.bf16 %v1025_v40, %v1017_v33  ;;  %v846_v13 = vpack.c.bf16 %v173_v55, %v1039_v51 }
  0x13   :  { %817 = vmatpush3.bf16.msra.mxu1 %v1034_v44  ;;  %865 = vmatpush3.bf16.msra.mxu0 %v1034_v44  ;;  %v826_v4 = vpack.c.bf16 %v162_v1, %v155_v0  ;;  %v169_v6 = vand.u32 4294901760, %v168_v2  ;;  %vm609_vm1 = vcmask 261120  }
  0x14   :  { %819 = vmatprep.subr.bf16.mxu1 %v818_v56  ;;  %867 = vmatprep.subr.bf16.mxu0 %v866_v52  ;;  %v176_v7 = vand.u32 4294901760, %v175_v3 }
  0x16   :  { %705 = vmatmul.mubr.f32.vlgmr.msra.gmra.mrb[0].mxu1 %v116_v61  ;;  %762 = vmatmul.mubr.f32.vlgmr.msra.gmra.mrb[0].mxu0 %v114_v39  ;;  %v830_v8 = vpack.c.bf16 %v176_v7, %v169_v6 }
  0x17   :  { %821 = vmatpush3.bf16.msra.mxu1 %v818_v56  ;;  %869 = vmatpush3.bf16.msra.mxu0 %v866_v52 }
  0x18   :  { %823 = vmatprep.subr.bf16.mxu1 %v822_v62  ;;  %871 = vmatprep.subr.bf16.mxu0 %v870_v63 }
  0x19   :  { %723 = vmatprep.mubr.f32.mxu1 %v989_v21  ;;  %780 = vmatprep.mubr.f32.mxu0 %v989_v21 }
  0x1b   :  { %825 = vmatpush3.bf16.msra.mxu1 %v822_v62  ;;  %873 = vmatpush3.bf16.msra.mxu0 %v870_v63 }
  0x1c   :  { %827 = vmatprep.subr.bf16.mxu1 %v826_v4  ;;  %875 = vmatprep.subr.bf16.mxu0 %v874_v5 }
  0x1f   :  { %829 = vmatpush3.bf16.msra.mxu1 %v826_v4  ;;  %877 = vmatpush3.bf16.msra.mxu0 %v874_v5 }
  0x20   :  { %831 = vmatprep.subr.bf16.mxu1 %v830_v8  ;;  %879 = vmatprep.subr.bf16.mxu0 %v878_v9 }
  0x23   :  { %833 = vmatpush3.bf16.msra.mxu1 %v830_v8  ;;  %881 = vmatpush3.bf16.msra.mxu0 %v878_v9 }
  0x24   :  { %835 = vmatprep.subr.bf16.mxu1 %v834_v10  ;;  %883 = vmatprep.subr.bf16.mxu0 %v977_v14 }
  0x26   :  { %724 = vmatmul.mubr.f32.vlgmr.msra.gmra.mrb[0].mxu1 %v995_v23  ;;  %781 = vmatmul.mubr.f32.vlgmr.msra.gmra.mrb[0].mxu0 %v995_v23 }
  0x27   :  { %837 = vmatpush3.bf16.msra.mxu1 %v834_v10  ;;  %885 = vmatpush3.bf16.msra.mxu0 %v977_v14 }
  0x28   :  { %839 = vmatprep.subr.bf16.mxu1 %v838_v11  ;;  %887 = vmatprep.subr.bf16.mxu0 %v986_v18 }
  0x29   :  { %742 = vmatprep.mubr.f32.mxu1 %v1004_v27  ;;  %799 = vmatprep.mubr.f32.mxu0 %v989_v21 }
  0x2b   :  { %841 = vmatpush3.bf16.msra.mxu1 %v838_v11  ;;  %889 = vmatpush3.bf16.msra.mxu0 %v986_v18 }
  0x2c   :  { %843 = vmatprep.subr.bf16.mxu1 %v842_v12  ;;  %891 = vmatprep.subr.bf16.mxu0 %v993_v22 }
  0x2f   :  { %845 = vmatpush3.bf16.msra.mxu1 %v842_v12  ;;  %893 = vmatpush3.bf16.msra.mxu0 %v993_v22 }
  0x30   :  { %847 = vmatprep.subr.bf16.mxu1 %v846_v13  ;;  %895 = vmatprep.subr.bf16.mxu0 %v1034_v44 }
  0x33   :  { %849 = vmatpush3.bf16.msra.mxu1 %v846_v13  ;;  %897 = vmatpush3.bf16.msra.mxu0 %v1034_v44 }
  0x36   :  { %743 = vmatmul.mubr.f32.vlgmr.msra.gmra.mrb[0].mxu1 %v1015_v32  ;;  %800 = vmatmul.mubr.f32.vlgmr.msra.gmra.mrb[0].mxu0 %v995_v23 }
 0x109   :  { %v744_v14 = vpop.f32.mrb[0].mxu1  ;;  %v801_v15 = vpop.f32.mrb[0].mxu0 }
 0x10a   :  { %v898_v16 = vadd.f32 %v801_v15, %v744_v14  ;;  %v323_v17 = vpop.f32.mrb[1].mxu1  ;;  %v599_v18 = vpop.f32.mrb[1].mxu0 }
 0x10b   :  { %v899_v19 = vadd.f32 %v599_v18, %v323_v17 }
 0x10c   :  { %611 = vst.msk [vmem:[#allocation2 + $0x8] sm:$0xff] %vm609_vm1, %v898_v16 }
 0x10d   :  { %610 = vst.msk [vmem:[#allocation2] sm:$0xff] %vm609_vm1, %v899_v19 }
 0x10e   :  { %922 = shalt.err (!%p919_p4)
}
 0x10f   :  { %s923_s4 = scalar_lea.hbm %s1088_s2, 256 }
 0x110   :  { %p924_p5 = scmp.ne.s32.totalorder %s1088_s2, %s923_s4  ;;  %p927_p6 = scmp.lt.u32.totalorder %s923_s4, %s1088_s2 }
 0x112   :  { %p929_p7 = pnand %p927_p6, %p924_p5 }
 0x114   :  { %932 = shalt.err (!%p929_p7)
}
 0x115   :  { %s936_s9 = smov 128   ;;  %s937_s10 = smov 8  }
 0x116   :  { %623 = dma.vmem_to_hbm [thread:$0]  %s618_s1, 256, %s1088_s2, [#allocation3], %s936_s9, %s936_s9, %s937_s10  }
 0x117   :  { %933 = dma.done.wait [#allocation3], 256  }
 0x118   :  { %934 = vsyncadd [#allocation3], 4294967040 }
 0x119   :  { %627 = vsyncpa [#allocation3], 1 }

// kernel: mamba_block_forward.6
= control target key start
LH: loop header
LB: loop body
LE: loop exit
PB: predicated region body
PF: predicated region fallthrough
CT: control target
= control target key end

     0   :  { %s12921_s30 = smov 0   ;;  %s12923_s10 = smov 0   ;;  %s14211_s0 = inlined_call_operand.vmem [shape: f32[2,8,64], index: 0, kind: input, shape index: {}]   ;;  %s14212_s1 = inlined_call_operand.vmem [shape: f32[2,8,64], index: 1, kind: input, shape index: {}]   ;;  %s14213_s2 = inlined_call_operand.vmem [shape: f32[64,2], index: 2, kind: input, shape index: {}]   ;;  %s14214_s3 = inlined_call_operand.vmem [shape: f32[2,64], index: 3, kind: input, shape index: {}]   ;;  %s14215_s4 = inlined_call_operand.vmem [shape: f32[1,64], index: 4, kind: input, shape index: {}]   ;;  %s14216_s5 = inlined_call_operand.vmem [shape: f32[64,16], index: 5, kind: input, shape index: {}]   ;;  %s14217_s6 = inlined_call_operand.vmem [shape: f32[64,16], index: 6, kind: input, shape index: {}]   ;;  %s14218_s7 = inlined_call_operand.vmem [shape: f32[16,64], index: 7, kind: input, shape index: {}]   ;;  %s14219_s8 = inlined_call_operand.vmem [shape: f32[1,64], index: 8, kind: input, shape index: {}]   ;;  %s14220_s9 = inlined_call_operand.vmem [shape: f32[2,8,64], index: 9, kind: output, shape index: {}]  }
   0x1   :  { %s12925_s11 = smov 0  }
   0x2 LB: > { %s31_s12 = sadd.s32 1, %s12861_s10  ;;  %p10612_p0 = scmp.ge.s32.totalorder %s12865_s11, 1  ;;  %s12865_s11 = sphi %s12925_s11, %s19_s11   ;;  %s12861_s10 = sphi %s12923_s10, %s14226_s10   ;;  %s12857_s30 = sphi %s12921_s30, %s14225_s30  }
   0x3   : > { %p33_p1 = scmp.ge.s32.totalorder %s31_s12, 2  ;;  %p319_p2 = scmp.lt.s32.totalorder %s12865_s11, 3 }
   0x5   : > { %s14228_s12 = smov (%p33_p1, %s31_s12), 0  ;;  %p320_p3 = pnand %p10612_p0, %p319_p2 }
   0x6   : > { %v395_v0 = vld [vmem:[%s14213_s2] sm:$0xff] (!%p320_p3)  ;;  %v396_v1 = vld [vmem:[%s14213_s2 + $0x8] sm:$0xff] (!%p320_p3)  ;;  %v397_v2 = vld [vmem:[%s14213_s2 + $0x10] sm:$0xff] (!%p320_p3)  ;;  %v12867_v3 = vmov (!%p320_p3), 0.0|0.0   ;;  %vm12868_vm0 = vmmov (!%p320_p3), 0   ;;  %v12869_v10 = vmov (!%p320_p3), 0.0  }
   0x7   : > { %323 = sbr.rel (%p320_p3) target bundleno = 2010 (0x7da), region = 56  ;;  %12125 = vmatprep.subr.bf16.mxu0 (!%p320_p3), %v12867_v3  ;;  %v408_v4 = vand.u32 (!%p320_p3), 4294901760, %v395_v0  ;;  %v411_v5 = vand.u32 (!%p320_p3), 4294901760, %v396_v1  ;;  %v398_v6 = vld [vmem:[%s14213_s2 + $0x18] sm:$0xff] (!%p320_p3)  ;;  %v414_v7 = vand.u32 (!%p320_p3), 4294901760, %v397_v2  ;;  %v399_v8 = vld [vmem:[%s14213_s2 + $0x20] sm:$0xff] (!%p320_p3)  ;;  %11145 = vmatprep.mubr.msk.f32.mxu0 (!%p320_p3), %vm12868_vm0, %v12869_v10 }
   0x8   : > { %v400_v9 = vld [vmem:[%s14213_s2 + $0x28] sm:$0xff] (!%p320_p3)  ;;  %v417_v11 = vand.u32 (!%p320_p3), 4294901760, %v398_v6  ;;  %p366_p4 = scmp.lt.s32.totalorder (!%p320_p3), %s12857_s30, 1  ;;  %11243 = vmatprep.subr.mxu1 (!%p320_p3), %v12869_v10  ;;  %11245 = vmatprep.mubr.msk.f32.mxu1 (!%p320_p3), %vm12868_vm0, %v12869_v10  ;;  %v420_v16 = vand.u32 (!%p320_p3), 4294901760, %v399_v8  ;;  %v401_v18 = vld [vmem:[%s14213_s2 + $0x30] sm:$0xff] (!%p320_p3)  ;;  %v402_v19 = vld [vmem:[%s14213_s2 + $0x38] sm:$0xff] (!%p320_p3) }
   0x9   : > { %v12966_v12 = vpack.c.bf16 (!%p320_p3), %v411_v5, %v408_v4  ;;  %v12968_v13 = vsub.f32 (!%p320_p3), %v395_v0, %v408_v4  ;;  %v12970_v14 = vsub.f32 (!%p320_p3), %v396_v1, %v411_v5  ;;  %v12972_v15 = vsub.f32 (!%p320_p3), %v397_v2, %v414_v7 }
   0xa   : > { %v423_v17 = vand.u32 (!%p320_p3), 4294901760, %v400_v9  ;;  %v12982_v20 = vpack.c.bf16 (!%p320_p3), %v417_v11, %v414_v7  ;;  %v12984_v21 = vsub.f32 (!%p320_p3), %v398_v6, %v417_v11  ;;  %vm391_vm1 = vcmask (!%p320_p3), 523264   ;;  %v944_v11 = vld [vmem:[%s14214_s3] sm:$0x3] (!%p320_p3) }
   0xb   : > { %12127 = vmatpush3.bf16.msra.mxu0 (!%p320_p3), %v12966_v12  ;;  %392 = vst.msk [vmem:[#allocation2] sm:$0xff] (!%p320_p3), %vm391_vm1, %v12869_v10  ;;  %393 = vst.msk [vmem:[#allocation2 + $0x8] sm:$0xff] (!%p320_p3), %vm391_vm1, %v12869_v10  ;;  %v493_v22 = vand.u32 (!%p320_p3), 4294901760, %v12968_v13  ;;  %v500_v23 = vand.u32 (!%p320_p3), 4294901760, %v12970_v14  ;;  %v426_v24 = vand.u32 (!%p320_p3), 4294901760, %v401_v18  ;;  %v429_v25 = vand.u32 (!%p320_p3), 4294901760, %v402_v19 }
   0xc   : > { %12128 = vmatprep.subr.bf16.mxu0 (!%p320_p3), %v12867_v3  ;;  %v13001_v26 = vpack.c.bf16 (!%p320_p3), %v423_v17, %v420_v16  ;;  %v13003_v27 = vsub.f32 (!%p320_p3), %v399_v8, %v420_v16  ;;  %v13005_v28 = vsub.f32 (!%p320_p3), %v400_v9, %v423_v17  ;;  %v507_v30 = vand.u32 (!%p320_p3), 4294901760, %v12972_v15 }
   0xd   : > { %v494_v32 = vsub.f32 (!%p320_p3), %v12968_v13, %v493_v22  ;;  %v501_v33 = vsub.f32 (!%p320_p3), %v12970_v14, %v500_v23  ;;  %v514_v34 = vand.u32 (!%p320_p3), 4294901760, %v12984_v21  ;;  %v13021_v36 = vpack.c.bf16 (!%p320_p3), %v429_v25, %v426_v24 }
   0xe   : > { %s14230_s30 = smov (!%p366_p4, %s12857_s30), 1  ;;  %v13023_v37 = vsub.f32 %v401_v18, %v426_v24  ;;  %v13025_v38 = vsub.f32 %v402_v19, %v429_v25  ;;  %v508_v40 = vsub.f32 %v12972_v15, %v507_v30  ;;  %v521_v41 = vand.u32 4294901760, %v13003_v27 }
   0xf   : > { %s12987_s29 = sshll.u32 %s14230_s30, 3  ;;  %12130 = vmatpush3.bf16.msra.mxu0 %v12982_v20  ;;  %v495_v42 = vand.u32 4294901760, %v494_v32  ;;  %v502_v43 = vand.u32 4294901760, %v501_v33  ;;  %v515_v44 = vsub.f32 %v12984_v21, %v514_v34  ;;  %v528_v45 = vand.u32 4294901760, %v13005_v28  ;;  %v1420_v32 = vld [vmem:[%s14216_s5 + $0x20] sm:$0xff]  ;;  %v1421_v33 = vld [vmem:[%s14216_s5 + $0x28] sm:$0xff] }
  0x10   : > { %s12999_s15 = scalar_lea.vmem %s14211_s0, %s12987_s29  ;;  %12131 = vmatprep.subr.bf16.mxu0 %v12867_v3  ;;  %v509_v48 = vand.u32 4294901760, %v508_v40  ;;  %v522_v49 = vsub.f32 %v13003_v27, %v521_v41  ;;  %v535_v50 = vand.u32 4294901760, %v13023_v37  ;;  %v542_v54 = vand.u32 4294901760, %v13025_v38  ;;  %s13866_s25 = scalar_lea.vmem %s14212_s1, %s12987_s29 }
  0x11   : > { %v394_v29 = vld [vmem:[%s12999_s15] sm:$0xff]  ;;  %v12138_v51 = vpack.c.bf16 %v502_v43, %v495_v42  ;;  %v516_v52 = vand.u32 4294901760, %v515_v44  ;;  %v529_v53 = vsub.f32 %v13005_v28, %v528_v45  ;;  %v12150_v1 = vpack.c.bf16 %v12970_v14, %v12968_v13  ;;  %s386_s14 = scalar_lea.vmem %s14220_s9, %s12987_s29 }
  0x12   : > { %v405_v31 = vsel %vm391_vm1, %v394_v29, 0  ;;  %v523_v56 = vand.u32 4294901760, %v522_v49  ;;  %v536_v59 = vsub.f32 %v13023_v37, %v535_v50  ;;  %v543_v60 = vsub.f32 %v13025_v38, %v542_v54  ;;  %v1416_v14 = vld [vmem:[%s14216_s5] sm:$0xff] }
  0x13   : > { %v13019_v35 = vand.u32 4294901760, %v405_v31  ;;  %12133 = vmatpush3.bf16.msra.mxu0 %v13001_v26  ;;  %v12141_v57 = vpack.c.bf16 %v516_v52, %v509_v48  ;;  %v530_v58 = vand.u32 4294901760, %v529_v53  ;;  %v12153_v2 = vpack.c.bf16 %v12984_v21, %v12972_v15  ;;  %v1417_v15 = vld [vmem:[%s14216_s5 + $0x8] sm:$0xff] }
  0x14   : > { %12134 = vmatprep.subr.bf16.mxu0 %v12867_v3  ;;  %v537_v62 = vand.u32 4294901760, %v536_v59  ;;  %v544_v63 = vand.u32 4294901760, %v543_v60  ;;  %v12156_v4 = vpack.c.bf16 %v13005_v28, %v13003_v27  ;;  %v12159_v5 = vpack.c.bf16 %v13025_v38, %v13023_v37 }
  0x15   : > { %v13028_v39 = vsub.f32 %v405_v31, %v13019_v35  ;;  %v12144_v61 = vpack.c.bf16 %v530_v58, %v523_v56  ;;  %v12174_v6 = vpack.c.bf16 %v500_v23, %v493_v22  ;;  %v12177_v7 = vpack.c.bf16 %v514_v34, %v507_v30  ;;  %v1418_v22 = vld [vmem:[%s14216_s5 + $0x10] sm:$0xff]  ;;  %v1419_v23 = vld [vmem:[%s14216_s5 + $0x18] sm:$0xff] }
  0x16   : > { %v12147_v0 = vpack.c.bf16 %v544_v63, %v537_v62  ;;  %v12180_v8 = vpack.c.bf16 %v528_v45, %v521_v41  ;;  %v12183_v9 = vpack.c.bf16 %v542_v54, %v535_v50  ;;  %vm956_vm2 = vcmask 1041408   ;;  %v1422_v45 = vld [vmem:[%s14216_s5 + $0x30] sm:$0xff] }
  0x17   : > { %v13041_v46 = vand.u32 4294901760, %v13028_v39  ;;  %12136 = vmatpush3.bf16.msra.mxu0 %v13021_v36  ;;  %v1425_v16 = vand.u32 4294901760, %v1416_v14  ;;  %v1428_v17 = vand.u32 4294901760, %v1417_v15  ;;  %v1431_v24 = vand.u32 4294901760, %v1418_v22 }
  0x18   : > { %12137 = vmatprep.subr.bf16.mxu0 %v12867_v3  ;;  %v1434_v25 = vand.u32 4294901760, %v1419_v23  ;;  %v1437_v37 = vand.u32 4294901760, %v1420_v32  ;;  %v1440_v38 = vand.u32 4294901760, %v1421_v33  ;;  %v1443_v52 = vand.u32 4294901760, %v1422_v45 }
  0x19   : > { %v483_v47 = vsub.f32 %v13028_v39, %v13041_v46  ;;  %v13142_v18 = vsub.f32 %v1416_v14, %v1425_v16  ;;  %v13144_v19 = vsub.f32 %v1417_v15, %v1428_v17  ;;  %v13156_v28 = vsub.f32 %v1418_v22, %v1431_v24 }
  0x1a   : > { %v13158_v29 = vsub.f32 %v1419_v23, %v1434_v25  ;;  %v13172_v43 = vsub.f32 %v1420_v32, %v1437_v37  ;;  %v13174_v44 = vsub.f32 %v1421_v33, %v1440_v38  ;;  %v13188_v58 = vsub.f32 %v1422_v45, %v1443_v52 }
  0x1b   : > { %v13055_v55 = vand.u32 4294901760, %v483_v47  ;;  %v1517_v21 = vand.u32 4294901760, %v13144_v19  ;;  %v1524_v34 = vand.u32 4294901760, %v13156_v28  ;;  %v1423_v47 = vld [vmem:[%s14216_s5 + $0x38] sm:$0xff]  ;;  %v13208_v14 = vpack.c.bf16 %v1428_v17, %v1425_v16 }
  0x1c   : > { %v1538_v50 = vand.u32 4294901760, %v13172_v43  ;;  %v1446_v53 = vand.u32 4294901760, %v1423_v47  ;;  %v1552_v62 = vand.u32 4294901760, %v13188_v58  ;;  %v13212_v15 = vpack.c.bf16 %v1434_v25, %v1431_v24 }
  0x1d   : > { %11146 = vmatmul.mubr.f32.vlgmr.msra.gmra.mrb[0].mxu0 %v13055_v55  ;;  %v1518_v27 = vsub.f32 %v13144_v19, %v1517_v21  ;;  %v1525_v41 = vsub.f32 %v13156_v28, %v1524_v34  ;;  %v13216_v22 = vpack.c.bf16 %v1440_v38, %v1437_v37  ;;  %vm952_vm3 = vcmask 15360  }
  0x1e   : > { %12139 = vmatpush3.bf16.msra.mxu0 %v12138_v51  ;;  %11164 = vmatprep.mubr.msk.f32.mxu0 %vm12868_vm0, %v12869_v10  ;;  %v1545_v51 = vand.u32 4294901760, %v13174_v44  ;;  %v1539_v56 = vsub.f32 %v13172_v43, %v1538_v50  ;;  %v13190_v59 = vsub.f32 %v1423_v47, %v1446_v53  ;;  %v13220_v23 = vpack.c.bf16 %v1446_v53, %v1443_v52 }
  0x1f   : > { %12140 = vmatprep.subr.bf16.mxu0 %v12867_v3  ;;  %v1519_v31 = vand.u32 4294901760, %v1518_v27  ;;  %v1526_v48 = vand.u32 4294901760, %v1525_v41  ;;  %v1966_v41 = vld [vmem:[%s14217_s6 + $0x18] sm:$0xff]  ;;  %vm1961_vm4 = vcmask 130048   ;;  %vm10468_vm7 = vcmask 1040384  }
  0x20   : > { %v1540_v60 = vand.u32 4294901760, %v1539_v56  ;;  %v1559_v63 = vand.u32 4294901760, %v13190_v59  ;;  %v13231_v24 = vpack.c.bf16 %v1545_v51, %v1538_v50  ;;  %v1981_v47 = vand.u32 4294901760, %v1966_v41 }
  0x21   : > { %vm10471_vm8 = vcmask 1042432   ;;  %vm10473_vm9 = vcmask 1043456   ;;  %vm10475_vm10 = vcmask 1044480   ;;  %vm10477_vm11 = vcmask 1045504  }
  0x22   : > { %12142 = vmatpush3.bf16.msra.mxu0 %v12141_v57  ;;  %v1546_v57 = vsub.f32 %v13174_v44, %v1545_v51  ;;  %v13233_v25 = vpack.c.bf16 %v1559_v63, %v1552_v62  ;;  %vm10479_vm12 = vcmask 1046528  }
  0x23   : > { %12143 = vmatprep.subr.bf16.mxu0 %v12867_v3 }
  0x26   : > { %12145 = vmatpush3.bf16.msra.mxu0 %v12144_v61  ;;  %v1547_v61 = vand.u32 4294901760, %v1546_v57 }
  0x27   : > { %12146 = vmatprep.subr.bf16.mxu0 %v12867_v3 }
  0x2a   : > { %12148 = vmatpush3.bf16.msra.mxu0 %v12147_v0  ;;  %v13194_v0 = vpack.c.bf16 %v1547_v61, %v1540_v60 }
  0x2b   : > { %12149 = vmatprep.subr.bf16.mxu0 %v12867_v3 }
  0x2d   : > { %11165 = vmatmul.mubr.f32.vlgmr.msra.gmra.mrb[0].mxu0 %v13019_v35 }
  0x2e   : > { %12151 = vmatpush3.bf16.msra.mxu0 %v12150_v1  ;;  %11183 = vmatprep.mubr.msk.f32.mxu0 %vm12868_vm0, %v12869_v10  ;;  %v1553_v1 = vsub.f32 %v13188_v58, %v1552_v62 }
  0x2f   : > { %12152 = vmatprep.subr.bf16.mxu0 %v12867_v3 }
  0x32   : > { %12154 = vmatpush3.bf16.msra.mxu0 %v12153_v2  ;;  %v1560_v2 = vsub.f32 %v13190_v59, %v1559_v63  ;;  %v1969_v63 = vld [vmem:[%s14217_s6 + $0x30] sm:$0xff] }
  0x33   : > { %12155 = vmatprep.subr.bf16.mxu0 %v12867_v3 }
  0x36   : > { %12157 = vmatpush3.bf16.msra.mxu0 %v12156_v4  ;;  %v1554_v4 = vand.u32 4294901760, %v1553_v1  ;;  %v1970_v1 = vld [vmem:[%s14217_s6 + $0x38] sm:$0xff] }
  0x37   : > { %12158 = vmatprep.subr.bf16.mxu0 %v12867_v3 }
  0x3a   : > { %12160 = vmatpush3.bf16.msra.mxu0 %v12159_v5  ;;  %v1561_v5 = vand.u32 4294901760, %v1560_v2 }
  0x3b   : > { %12161 = vmatprep.subr.bf16.mxu0 %v12867_v3 }
  0x3d   : > { %11184 = vmatmul.mubr.f32.vlgmr.msra.gmra.mrb[0].mxu0 %v13028_v39 }
  0x3e   : > { %12163 = vmatpush3.bf16.msra.mxu0 %v12966_v12  ;;  %11202 = vmatprep.mubr.msk.f32.mxu0 %vm12868_vm0, %v12869_v10 }
  0x3f   : > { %12164 = vmatprep.subr.bf16.mxu0 %v12867_v3 }
  0x42   : > { %12166 = vmatpush3.bf16.msra.mxu0 %v12982_v20 }
  0x43   : > { %12167 = vmatprep.subr.bf16.mxu0 %v12867_v3 }
  0x46   : > { %12169 = vmatpush3.bf16.msra.mxu0 %v13001_v26 }
  0x47   : > { %12170 = vmatprep.subr.bf16.mxu0 %v12867_v3 }
  0x4a   : > { %12172 = vmatpush3.bf16.msra.mxu0 %v13021_v36 }
  0x4b   : > { %12173 = vmatprep.subr.bf16.mxu0 %v12867_v3 }
  0x4d   : > { %11203 = vmatmul.mubr.f32.vlgmr.msra.gmra.mrb[0].mxu0 %v13041_v46 }
  0x4e   : > { %12175 = vmatpush3.bf16.msra.mxu0 %v12174_v6  ;;  %11221 = vmatprep.mubr.msk.f32.mxu0 %vm12868_vm0, %v12869_v10  ;;  %v13198_v6 = vpack.c.bf16 %v1561_v5, %v1554_v4  ;;  %v13288_v4 = vsub.f32 %v1966_v41, %v1981_v47 }
  0x4f   : > { %12176 = vmatprep.subr.bf16.mxu0 %v12867_v3 }
  0x50   : > { %v14221_v41 = vand.u32 4294901760, %v13288_v4 }
  0x52   : > { %12178 = vmatpush3.bf16.msra.mxu0 %v12177_v7  ;;  %v12222_v7 = vpack.c.bf16 %v13144_v19, %v13142_v18  ;;  %v14224_v19 = vand.u32 4294901760, %v13288_v4 }
  0x53   : > { %12179 = vmatprep.subr.bf16.mxu0 %v12867_v3 }
  0x56   : > { %12181 = vmatpush3.bf16.msra.mxu0 %v12180_v8  ;;  %v12225_v8 = vpack.c.bf16 %v13158_v29, %v13156_v28 }
  0x57   : > { %12182 = vmatprep.subr.bf16.mxu0 %v12867_v3 }
  0x5a   : > { %12184 = vmatpush3.bf16.msra.mxu0 %v12183_v9  ;;  %v12228_v9 = vpack.c.bf16 %v13174_v44, %v13172_v43  ;;  %v12870_v44 = vmov 1.0|1.0  }
  0x5b   : > { %12185 = vmatprep.subr.bf16.mxu0 %v12867_v3 }
  0x5d   : > { %11222 = vmatmul.mubr.f32.vlgmr.msra.gmra.mrb[0].mxu0 %v13019_v35 }
  0x5e   : > { %12187 = vmatpush3.bf16.msra.mxu0 %v12966_v12  ;;  %11240 = vmatprep.mubr.msk.f32.mxu0 %vm12868_vm0, %v12869_v10  ;;  %v13129_v12 = vsel %vm956_vm2, %v944_v11, 0  ;;  %v12231_v11 = vpack.c.bf16 %v13190_v59, %v13188_v58 }
  0x5f   : > { %12188 = vmatprep.subr.bf16.mxu0 %v12867_v3  ;;  %v13132_v13 = vand.u32 4294901760, %v13129_v12 }
  0x61   : > { %11244 = vmatpush3.msra.mxu1 %v13132_v13 }
  0x62   : > { %12190 = vmatpush3.bf16.msra.mxu0 %v12982_v20  ;;  %11248 = vmatprep.subr.mxu1 %v12869_v10  ;;  %v1510_v20 = vand.u32 4294901760, %v13142_v18 }
  0x63   : > { %12191 = vmatprep.subr.bf16.mxu0 %v12867_v3 }
  0x64   : > { %v13224_v16 = vpack.c.bf16 %v1517_v21, %v1510_v20 }
  0x66   : > { %12193 = vmatpush3.bf16.msra.mxu0 %v13001_v26  ;;  %v1511_v26 = vsub.f32 %v13142_v18, %v1510_v20 }
  0x67   : > { %12194 = vmatprep.subr.bf16.mxu0 %v12867_v3 }
  0x68   : > { %v1512_v30 = vand.u32 4294901760, %v1511_v26  ;;  %v13237_v26 = vsub.f32 %v13129_v12, %v13132_v13  ;;  %v1963_v12 = vld [vmem:[%s14217_s6] sm:$0xff] }
  0x69   : > { %v1972_v37 = vand.u32 4294901760, %v1963_v12 }
  0x6a   : > { %12196 = vmatpush3.bf16.msra.mxu0 %v13021_v36  ;;  %v1531_v36 = vand.u32 4294901760, %v13158_v29  ;;  %v13168_v40 = vpack.c.bf16 %v1519_v31, %v1512_v30  ;;  %v1039_v20 = vand.u32 4294901760, %v13237_v26 }
  0x6b   : > { %12197 = vmatprep.subr.bf16.mxu0 %v12867_v3  ;;  %v13269_v51 = vsub.f32 %v1963_v12, %v1972_v37 }
  0x6c   : > { %v1532_v42 = vsub.f32 %v13158_v29, %v1531_v36  ;;  %v13229_v17 = vpack.c.bf16 %v1531_v36, %v1524_v34  ;;  %v1040_v33 = vsub.f32 %v13237_v26, %v1039_v20  ;;  %v1964_v34 = vld [vmem:[%s14217_s6 + $0x8] sm:$0xff]  ;;  %v1965_v36 = vld [vmem:[%s14217_s6 + $0x10] sm:$0xff] }
  0x6d   : > { %11241 = vmatmul.mubr.f32.vlgmr.msra.gmra.mrb[0].mxu0 %v13019_v35  ;;  %v1975_v38 = vand.u32 4294901760, %v1964_v34  ;;  %v2057_v5 = vand.u32 4294901760, %v13269_v51 }
  0x6e   : > { %11289 = vmatprep.mubr.msk.f32.mxu0 %vm12868_vm0, %v12869_v10  ;;  %v1533_v49 = vand.u32 4294901760, %v1532_v42  ;;  %12199 = vmatpush3.bf16.msra.mxu0 %v13208_v14  ;;  %v1978_v42 = vand.u32 4294901760, %v1965_v36  ;;  %v1041_v56 = vand.u32 4294901760, %v1040_v33 }
  0x6f   : > { %12200 = vmatprep.subr.bf16.mxu0 %v12867_v3  ;;  %v13267_v50 = vpack.c.bf16 %v1975_v38, %v1972_v37  ;;  %v13271_v52 = vsub.f32 %v1964_v34, %v1975_v38  ;;  %v2058_v37 = vsub.f32 %v13269_v51, %v2057_v5 }
  0x70   : > { %v13184_v54 = vpack.c.bf16 %v1533_v49, %v1526_v48  ;;  %v1967_v48 = vld [vmem:[%s14217_s6 + $0x20] sm:$0xff]  ;;  %v1968_v49 = vld [vmem:[%s14217_s6 + $0x28] sm:$0xff]  ;;  %v13277_v57 = vpack.c.bf16 %v1981_v47, %v1978_v42  ;;  %v13279_v60 = vsub.f32 %v1965_v36, %v1978_v42 }
  0x71   : > { %v1984_v61 = vand.u32 4294901760, %v1967_v48  ;;  %v1987_v62 = vand.u32 4294901760, %v1968_v49 }
  0x72   : > { %12202 = vmatpush3.bf16.msra.mxu0 %v13212_v15  ;;  %v14222_v34 = vand.u32 4294901760, %v13279_v60  ;;  %v14223_v18 = vand.u32 4294901760, %v13279_v60 }
  0x73   : > { %12203 = vmatprep.subr.bf16.mxu0 %v12867_v3  ;;  %v13294_v33 = vpack.c.bf16 %v1987_v62, %v1984_v61  ;;  %v13296_v12 = vsub.f32 %v1967_v48, %v1984_v61  ;;  %v13301_v36 = vsub.f32 %v1968_v49, %v1987_v62  ;;  %v2079_v62 = vsub.f32 %v13288_v4, %v14221_v41 }
  0x74   : > { %v2072_v49 = vsub.f32 %v13279_v60, %v14222_v34  ;;  %v12321_v28 = vpack.c.bf16 %v14224_v19, %v14223_v18 }
  0x76   : > { %12205 = vmatpush3.bf16.msra.mxu0 %v13216_v22 }
  0x77   : > { %12206 = vmatprep.subr.bf16.mxu0 %v12867_v3 }
  0x7a   : > { %12208 = vmatpush3.bf16.msra.mxu0 %v13220_v23 }
  0x7b   : > { %12269 = vmatprep.subr.bf16.mxu0 %v12867_v3 }
  0x7d   : > { %11290 = vmatmul.mubr.f32.vlgmr.msra.gmra.mrb[2].mxu0 %v13055_v55 }
  0x7e   : > { %11403 = vmatprep.mubr.msk.f32.mxu0 %vm12868_vm0, %v12869_v10  ;;  %12271 = vmatpush3.bf16.msra.mxu0 %v13267_v50 }
  0x7f   : > { %12272 = vmatprep.subr.bf16.mxu0 %v12867_v3 }
  0x82   : > { %12274 = vmatpush3.bf16.msra.mxu0 %v13277_v57 }
  0x83   : > { %12275 = vmatprep.subr.bf16.mxu0 %v12867_v3 }
  0x86   : > { %12277 = vmatpush3.bf16.msra.mxu0 %v13294_v33 }
  0x87   : > { %12278 = vmatprep.subr.bf16.mxu0 %v12867_v3 }
 0x140   : > { %v940_v27 = vpop.f32.mrb[0].mxu0 }
 0x141   : > { %v954_v21 = vsel %vm952_vm3, %v940_v27, 0  ;;  %v11242_v30 = vpop.f32.mrb[1].mxu0  ;;  %v2064_v27 = vand.u32 4294901760, %v13271_v52 }
 0x142   : > { %v13240_v31 = vand.u32 4294901760, %v954_v21  ;;  %v1993_v30 = vand.u32 4294901760, %v1970_v1 }
 0x143   : > { %v2065_v38 = vsub.f32 %v13271_v52, %v2064_v27 }
 0x144   : > { %v13243_v32 = vsub.f32 %v954_v21, %v13240_v31  ;;  %v1990_v21 = vand.u32 4294901760, %v1969_v63  ;;  %v13315_v48 = vsub.f32 %v1970_v1, %v1993_v30 }
 0x145   : > { %v2066_v61 = vand.u32 4294901760, %v2065_v38 }
 0x146   : > { %v1028_v45 = vand.u32 4294901760, %v13243_v32  ;;  %v13311_v42 = vpack.c.bf16 %v1993_v30, %v1990_v21  ;;  %v13313_v47 = vsub.f32 %v1969_v63, %v1990_v21  ;;  %v2073_v63 = vand.u32 4294901760, %v2072_v49 }
 0x147   : > { %v2106_v21 = vand.u32 4294901760, %v13315_v48 }
 0x148   : > { %v1029_v53 = vsub.f32 %v13243_v32, %v1028_v45  ;;  %v2099_v1 = vand.u32 4294901760, %v13313_v47  ;;  %12280 = vmatpush3.bf16.msra.mxu0 %v13311_v42 }
 0x149   : > { %12281 = vmatprep.subr.bf16.mxu0 %v12867_v3 }
 0x14a   : > { %v1030_v2 = vand.u32 4294901760, %v1029_v53  ;;  %v2085_v53 = vand.u32 4294901760, %v13296_v12  ;;  %v2100_v49 = vsub.f32 %v13313_v47, %v2099_v1 }
 0x14b   : > { %11404 = vmatmul.mubr.f32.vlgmr.msra.gmra.mrb[4].mxu0 %v13055_v55 }
 0x14c   : > { %11246 = vmatmul.mubr.f32.vlgmr.msra.gmra.mrb[0].mxu1 %v1030_v2  ;;  %v2092_v2 = vand.u32 4294901760, %v13301_v36  ;;  %v2086_v38 = vsub.f32 %v13296_v12, %v2085_v53  ;;  %11422 = vmatprep.mubr.msk.f32.mxu0 %vm12868_vm0, %v12869_v10 }
 0x14d   : > { %11249 = vmatpush3.msra.mxu1 %v1041_v56  ;;  %11250 = vmatprep.mubr.msk.f32.mxu1 %vm12868_vm0, %v12869_v10  ;;  %v2059_v56 = vand.u32 4294901760, %v2058_v37  ;;  %v2080_v37 = vand.u32 4294901760, %v2079_v62  ;;  %v2107_v62 = vsub.f32 %v13315_v48, %v2106_v21 }
 0x14e   : > { %11253 = vmatprep.subr.mxu1 %v12869_v10  ;;  %v2093_v41 = vsub.f32 %v13301_v36, %v2092_v2  ;;  %v12324_v29 = vpack.c.bf16 %v2092_v2, %v2085_v53 }
 0x14f   : > { %v12282_v30 = vpack.c.bf16 %v2066_v61, %v2059_v56  ;;  %v12285_v34 = vpack.c.bf16 %v2080_v37, %v2073_v63  ;;  %v2087_v56 = vand.u32 4294901760, %v2086_v38  ;;  %v2108_v63 = vand.u32 4294901760, %v2107_v62 }
 0x150   : > { %v2094_v61 = vand.u32 4294901760, %v2093_v41  ;;  %v2101_v41 = vand.u32 4294901760, %v2100_v49 }
 0x151   : > { %12283 = vmatpush3.bf16.msra.mxu0 %v12282_v30 }
 0x152   : > { %12284 = vmatprep.subr.bf16.mxu0 %v12867_v3  ;;  %v12288_v55 = vpack.c.bf16 %v2094_v61, %v2087_v56  ;;  %v12291_v30 = vpack.c.bf16 %v2108_v63, %v2101_v41 }
 0x154   : > { %11251 = vmatmul.mubr.f32.vlgmr.msra.gmra.mrb[0].mxu1 %v13240_v31 }
 0x155   : > { %11254 = vmatpush3.msra.mxu1 %v13237_v26  ;;  %11255 = vmatprep.mubr.msk.f32.mxu1 %vm12868_vm0, %v12869_v10  ;;  %v12300_v26 = vpack.c.bf16 %v13301_v36, %v13296_v12 }
 0x156   : > { %11258 = vmatprep.subr.mxu1 %v12869_v10  ;;  %12286 = vmatpush3.bf16.msra.mxu0 %v12285_v34  ;;  %v12294_v34 = vpack.c.bf16 %v13271_v52, %v13269_v51 }
 0x157   : > { %12287 = vmatprep.subr.bf16.mxu0 %v12867_v3 }
 0x15a   : > { %12289 = vmatpush3.bf16.msra.mxu0 %v12288_v55 }
 0x15b   : > { %12290 = vmatprep.subr.bf16.mxu0 %v12867_v3 }
 0x15c   : > { %11256 = vmatmul.mubr.f32.vlgmr.msra.gmra.mrb[0].mxu1 %v13243_v32  ;;  %v12297_v32 = vpack.c.bf16 %v13288_v4, %v13279_v60 }
 0x15d   : > { %11259 = vmatpush3.msra.mxu1 %v13132_v13  ;;  %11260 = vmatprep.mubr.msk.f32.mxu1 %vm12868_vm0, %v12869_v10 }
 0x15e   : > { %11263 = vmatprep.subr.mxu1 %v12869_v10  ;;  %12292 = vmatpush3.bf16.msra.mxu0 %v12291_v30 }
 0x15f   : > { %12293 = vmatprep.subr.bf16.mxu0 %v12867_v3 }
 0x161   : > { %11423 = vmatmul.mubr.f32.vlgmr.msra.gmra.mrb[4].mxu0 %v13019_v35 }
 0x162   : > { %12295 = vmatpush3.bf16.msra.mxu0 %v12294_v34  ;;  %11441 = vmatprep.mubr.msk.f32.mxu0 %vm12868_vm0, %v12869_v10 }
 0x163   : > { %12296 = vmatprep.subr.bf16.mxu0 %v12867_v3 }
 0x164   : > { %11261 = vmatmul.mubr.f32.vlgmr.msra.gmra.mrb[0].mxu1 %v1028_v45 }
 0x165   : > { %11264 = vmatpush3.msra.mxu1 %v1039_v20  ;;  %11265 = vmatprep.mubr.msk.f32.mxu1 %vm12868_vm0, %v12869_v10 }
 0x166   : > { %11268 = vmatprep.subr.mxu1 %v12869_v10  ;;  %12298 = vmatpush3.bf16.msra.mxu0 %v12297_v32 }
 0x167   : > { %12299 = vmatprep.subr.bf16.mxu0 %v12867_v3 }
 0x16a   : > { %12301 = vmatpush3.bf16.msra.mxu0 %v12300_v26 }
 0x16b   : > { %12302 = vmatprep.subr.bf16.mxu0 %v12867_v3 }
 0x16c   : > { %11266 = vmatmul.mubr.f32.vlgmr.msra.gmra.mrb[0].mxu1 %v13240_v31 }
 0x16d   : > { %11269 = vmatpush3.msra.mxu1 %v13132_v13  ;;  %11270 = vmatprep.mubr.msk.f32.mxu1 %vm12868_vm0, %v12869_v10  ;;  %v12303_v13 = vpack.c.bf16 %v13315_v48, %v13313_v47 }
 0x16e   : > { %12209 = vmatprep.subr.bf16.mxu1 %v12867_v3 }
 0x16f   : > { %12304 = vmatpush3.bf16.msra.mxu0 %v12303_v13 }
 0x170   : > { %12305 = vmatprep.subr.bf16.mxu0 %v12867_v3 }
 0x172   : > { %11442 = vmatmul.mubr.f32.vlgmr.msra.gmra.mrb[4].mxu0 %v13028_v39 }
 0x173   : > { %12307 = vmatpush3.bf16.msra.mxu0 %v13267_v50  ;;  %11460 = vmatprep.mubr.msk.f32.mxu0 %vm12868_vm0, %v12869_v10 }
 0x174   : > { %11271 = vmatmul.mubr.f32.vlgmr.msra.gmra.mrb[0].mxu1 %v13240_v31  ;;  %12308 = vmatprep.subr.bf16.mxu0 %v12867_v3  ;;  %v13519_v31 = vld [vmem:[%s14218_s7 + $0x8] sm:$0xff] }
 0x175   : > { %12211 = vmatpush3.bf16.msra.mxu1 %v13168_v40  ;;  %11308 = vmatprep.mubr.msk.f32.mxu1 %vm12868_vm0, %v12869_v10  ;;  %v1503_v40 = vpop.f32.mrb[2].mxu0 }
 0x176   : > { %12212 = vmatprep.subr.bf16.mxu1 %v12867_v3  ;;  %v11291_v43 = vpop.f32.mrb[3].mxu0 }
 0x177   : > { %12310 = vmatpush3.bf16.msra.mxu0 %v13277_v57 }
 0x178   : > { %12311 = vmatprep.subr.bf16.mxu0 %v12867_v3 }
 0x179   : > { %12214 = vmatpush3.bf16.msra.mxu1 %v13184_v54  ;;  %v10616_v54 = vld [vmem:[%s14215_s4] ss:$0 sm:$0xff] }
 0x17a   : > { %12215 = vmatprep.subr.bf16.mxu1 %v12867_v3 }
 0x17b   : > { %12313 = vmatpush3.bf16.msra.mxu0 %v13294_v33 }
 0x17c   : > { %12314 = vmatprep.subr.bf16.mxu0 %v12867_v3 }
 0x17d   : > { %12217 = vmatpush3.bf16.msra.mxu1 %v13194_v0 }
 0x17e   : > { %12218 = vmatprep.subr.bf16.mxu1 %v12867_v3 }
 0x17f   : > { %12316 = vmatpush3.bf16.msra.mxu0 %v13311_v42 }
 0x180   : > { %12317 = vmatprep.subr.bf16.mxu0 %v12867_v3 }
 0x181   : > { %12220 = vmatpush3.bf16.msra.mxu1 %v13198_v6 }
 0x182   : > { %12221 = vmatprep.subr.bf16.mxu1 %v12867_v3  ;;  %11461 = vmatmul.mubr.f32.vlgmr.msra.gmra.mrb[4].mxu0 %v13041_v46 }
 0x183   : > { %11479 = vmatprep.mubr.msk.f32.mxu0 %vm12868_vm0, %v12869_v10 }
 0x184   : > { %11309 = vmatmul.mubr.f32.vlgmr.msra.gmra.mrb[2].mxu1 %v13019_v35 }
 0x185   : > { %12223 = vmatpush3.bf16.msra.mxu1 %v12222_v7  ;;  %11327 = vmatprep.mubr.msk.f32.mxu1 %vm12868_vm0, %v12869_v10 }
 0x186   : > { %12224 = vmatprep.subr.bf16.mxu1 %v12867_v3 }
 0x189   : > { %12226 = vmatpush3.bf16.msra.mxu1 %v12225_v8 }
 0x18a   : > { %12227 = vmatprep.subr.bf16.mxu1 %v12867_v3 }
 0x18d   : > { %12229 = vmatpush3.bf16.msra.mxu1 %v12228_v9 }
 0x18e   : > { %12230 = vmatprep.subr.bf16.mxu1 %v12867_v3 }
 0x191   : > { %12232 = vmatpush3.bf16.msra.mxu1 %v12231_v11 }
 0x192   : > { %12233 = vmatprep.subr.bf16.mxu1 %v12867_v3 }
 0x194   : > { %11328 = vmatmul.mubr.f32.vlgmr.msra.gmra.mrb[2].mxu1 %v13028_v39  ;;  %v12318_v39 = vpack.c.bf16 %v2064_v27, %v2057_v5 }
 0x195   : > { %12235 = vmatpush3.bf16.msra.mxu1 %v13208_v14  ;;  %11346 = vmatprep.mubr.msk.f32.mxu1 %vm12868_vm0, %v12869_v10 }
 0x196   : > { %12236 = vmatprep.subr.bf16.mxu1 %v12867_v3  ;;  %12319 = vmatpush3.bf16.msra.mxu0 %v12318_v39 }
 0x197   : > { %12320 = vmatprep.subr.bf16.mxu0 %v12867_v3 }
 0x199   : > { %12238 = vmatpush3.bf16.msra.mxu1 %v13212_v15 }
 0x19a   : > { %12239 = vmatprep.subr.bf16.mxu1 %v12867_v3  ;;  %12322 = vmatpush3.bf16.msra.mxu0 %v12321_v28 }
 0x19b   : > { %12323 = vmatprep.subr.bf16.mxu0 %v12867_v3 }
 0x19d   : > { %12241 = vmatpush3.bf16.msra.mxu1 %v13216_v22 }
 0x19e   : > { %12242 = vmatprep.subr.bf16.mxu1 %v12867_v3  ;;  %12325 = vmatpush3.bf16.msra.mxu0 %v12324_v29 }
 0x19f   : > { %12326 = vmatprep.subr.bf16.mxu0 %v12867_v3 }
 0x1a1   : > { %12244 = vmatpush3.bf16.msra.mxu1 %v13220_v23 }
 0x1a2   : > { %12245 = vmatprep.subr.bf16.mxu1 %v12867_v3 }
 0x1a4   : > { %11347 = vmatmul.mubr.f32.vlgmr.msra.gmra.mrb[2].mxu1 %v13041_v46  ;;  %v12327_v46 = vpack.c.bf16 %v2106_v21, %v2099_v1 }
 0x1a5   : > { %12247 = vmatpush3.bf16.msra.mxu1 %v13224_v16  ;;  %11365 = vmatprep.mubr.msk.f32.mxu1 %vm12868_vm0, %v12869_v10 }
 0x1a6   : > { %12248 = vmatprep.subr.bf16.mxu1 %v12867_v3  ;;  %12328 = vmatpush3.bf16.msra.mxu0 %v12327_v46 }
 0x1a7   : > { %12329 = vmatprep.subr.bf16.mxu0 %v12867_v3 }
 0x1a9   : > { %12250 = vmatpush3.bf16.msra.mxu1 %v13229_v17  ;;  %11480 = vmatmul.mubr.f32.vlgmr.msra.gmra.mrb[4].mxu0 %v13019_v35 }
 0x1aa   : > { %12251 = vmatprep.subr.bf16.mxu1 %v12867_v3  ;;  %12331 = vmatpush3.bf16.msra.mxu0 %v13267_v50 }
 0x1ab   : > { %11498 = vmatprep.mubr.msk.f32.mxu0 %vm12868_vm0, %v12869_v10  ;;  %12332 = vmatprep.subr.bf16.mxu0 %v12867_v3 }
 0x1ad   : > { %12253 = vmatpush3.bf16.msra.mxu1 %v13231_v24  ;;  %v13510_v24 = vld [vmem:[%s14218_s7] sm:$0xff] }
 0x1ae   : > { %12254 = vmatprep.subr.bf16.mxu1 %v12867_v3  ;;  %12334 = vmatpush3.bf16.msra.mxu0 %v13277_v57 }
 0x1af   : > { %12335 = vmatprep.subr.bf16.mxu0 %v12867_v3 }
 0x1b1   : > { %12256 = vmatpush3.bf16.msra.mxu1 %v13233_v25 }
 0x1b2   : > { %12257 = vmatprep.subr.bf16.mxu1 %v12867_v3  ;;  %12337 = vmatpush3.bf16.msra.mxu0 %v13294_v33 }
 0x1b3   : > { %12338 = vmatprep.subr.bf16.mxu0 %v12867_v3 }
 0x1b4   : > { %11366 = vmatmul.mubr.f32.vlgmr.msra.gmra.mrb[2].mxu1 %v13019_v35 }
 0x1b5   : > { %12259 = vmatpush3.bf16.msra.mxu1 %v13208_v14  ;;  %11384 = vmatprep.mubr.msk.f32.mxu1 %vm12868_vm0, %v12869_v10 }
 0x1b6   : > { %12260 = vmatprep.subr.bf16.mxu1 %v12867_v3  ;;  %12340 = vmatpush3.bf16.msra.mxu0 %v13311_v42 }
 0x1b7   : > { %11664 = vmatprep.subr.mxu0 %v12869_v10 }
 0x1b9   : > { %12262 = vmatpush3.bf16.msra.mxu1 %v13212_v15  ;;  %11499 = vmatmul.mubr.f32.vlgmr.msra.gmra.mrb[4].mxu0 %v13019_v35 }
 0x1ba   : > { %12263 = vmatprep.subr.bf16.mxu1 %v12867_v3  ;;  %11665 = vmatpush3.msra.mxu0 %v12869_v10 }
 0x1bb   : > { %11669 = vmatprep.subr.mxu0 %v12869_v10 }
 0x1bd   : > { %12265 = vmatpush3.bf16.msra.mxu1 %v13216_v22  ;;  %v2512_v22 = vlaneseq }
 0x1be   : > { %12266 = vmatprep.subr.bf16.mxu1 %v12867_v3 }
 0x1bf   : > { %v2513_v16 = vshrl.u32 %v2512_v22, 7  ;;  %v2516_v30 = vand.u32 127, %v2512_v22 }
 0x1c1   : > { %12268 = vmatpush3.bf16.msra.mxu1 %v13220_v23  ;;  %v13505_v17 = vsub.s32 0, %v2513_v16  ;;  %v2514_v34 = vadd.s32 8, %v2513_v16  ;;  %vm2517_vm5 = vcmp.eq.s32.totalorder %v2513_v16, %v2516_v30 }
 0x1c2   : > { %12341 = vmatprep.subr.bf16.mxu1 %v12870_v44  ;;  %v13585_v32 = vsel %vm2517_vm5, 1.0, %v12869_v10 }
 0x1c3   : > { %vm2518_vm6 = vcmp.eq.s32.totalorder %v2514_v34, %v2516_v30 }
 0x1c4   : > { %11385 = vmatmul.mubr.f32.vlgmr.msra.gmra.mrb[2].mxu1 %v13019_v35  ;;  %v13588_v26 = vsel %vm2518_vm6, 1.0, %v12869_v10 }
 0x1c5   : > { %12342 = vmatpush3.bf16.msra.mxu1 %v12870_v44 }
 0x1c6   : > { %11508 = vmatprep.subr.mxu1 %v12869_v10 }
 0x247   : > { %v1402_v58 = vpop.f32.mrb[0].mxu1 }
 0x248   : > { %v12533_v59 = vadd.f32 %v10616_v54, %v1402_v58  ;;  %v11272_v0 = vpop.f32.mrb[1].mxu1 }
 0x24a   : > { %v1407_v6 = vand.u32 2147483647, %v12533_v59  ;;  %v1406_v14 = vmax.f32 %v12533_v59, 0.0 }
 0x24c   : > { %v1408_v35 = vsub.f32 0.0, %v1407_v6 }
 0x24e   : > { %v1409_v7 = vmul.f32 1.442695, %v1408_v35 }
 0x250   : > { %12769 = vpow2.f32 %v1409_v7 }
 0x25a   : > { %v12770_v8 = vpop.eup %12769 }
 0x25b   : > { %v1411_v9 = vadd.f32 1.0, %v12770_v8 }
 0x25d   : > { %12771 = vlog2.f32 %v1411_v9 }
 0x267   : > { %v12772_v11 = vpop.eup %12771 }
 0x268   : > { %v1413_v15 = vmul.f32 0.6931472, %v12772_v11 }
 0x26a   : > { %v1414_v23 = vadd.f32 %v1413_v15, %v1406_v14 }
 0x26c   : > { %1415 = vst.msk [vmem:[#allocation3] sm:$0xff] %vm391_vm1, %v1414_v23 }
 0x273   : > { %v13512_v25 = vld [vmem:[#allocation3 + $0x3] sm:$0x1]  ;;  %v13514_v20 = vld [vmem:[#allocation3 + $0x4] sm:$0x1]  ;;  %v13523_v50 = vld [vmem:[#allocation3 + $0x5] sm:$0x1] }
 0x274   : > { %v5506_v45 = vrot.slane %v13512_v25, %v13505_v17  ;;  %v6497_v51 = vrot.slane %v13514_v20, %v13505_v17  ;;  %v7488_v52 = vrot.slane %v13523_v50, %v13505_v17  ;;  %v13541_v27 = vld [vmem:[#allocation3 + $0x6] sm:$0x1]  ;;  %v13543_v33 = vld [vmem:[#allocation3 + $0x7] sm:$0x1]  ;;  %v13561_v2 = vld [vmem:[#allocation3 + $0x1] sm:$0x1] }
 0x275   : > { %v8479_v42 = vrot.slane %v13541_v27, %v13505_v17  ;;  %v9470_v47 = vrot.slane %v13543_v33, %v13505_v17  ;;  %v12842_v37 = vld [vmem:[#allocation3 + $0x2] ss:$0 sm:$0xff]  ;;  %v3524_v38 = vrot.slane %v13561_v2, %v13505_v17 }
 0x276   : > { %v13530_v57 = vmul.f32 %v5506_v45, %v13510_v24  ;;  %v13533_v60 = vmul.f32 %v5506_v45, %v13519_v31  ;;  %v13536_v4 = vmul.f32 %v6497_v51, %v13510_v24  ;;  %v13539_v5 = vmul.f32 %v6497_v51, %v13519_v31 }
 0x277   : > { %v13546_v12 = vmul.f32 %v7488_v52, %v13510_v24  ;;  %v13549_v36 = vmul.f32 %v7488_v52, %v13519_v31  ;;  %v13556_v48 = vmul.f32 %v8479_v42, %v13510_v24  ;;  %v13559_v53 = vmul.f32 %v8479_v42, %v13519_v31 }
 0x278   : > { %v13564_v1 = vmul.f32 %v9470_v47, %v13510_v24  ;;  %v13567_v21 = vmul.f32 %v9470_v47, %v13519_v31  ;;  %v13572_v49 = vmul.f32 %v3524_v38, %v13510_v24  ;;  %v13575_v56 = vmul.f32 %v3524_v38, %v13519_v31 }
 0x279   : > { %v13578_v61 = vmul.f32 %v12842_v37, %v13510_v24  ;;  %v13581_v62 = vmul.f32 %v12842_v37, %v13519_v31 }
 0x297   : > { %v1957_v55 = vpop.f32.mrb[2].mxu1 }
 0x298   : > { %v12534_v41 = vadd.f32 %v1957_v55, %v1503_v40  ;;  %v11386_v63 = vpop.f32.mrb[3].mxu1 }
 0x29a   : > { %1962 = vst.msk [vmem:[#allocation4] sm:$0xff] %vm1961_vm4, %v12534_v41 }
 0x2a1   : > { %v10625_v13 = vld [vmem:[#allocation4 + $0x2] ss:$0 sm:$0xff]  ;;  %v10619_v39 = vld [vmem:[#allocation4] ss:$0 sm:$0xff]  ;;  %v10628_v45 = vld [vmem:[#allocation4 + $0x3] ss:$0 sm:$0xff] }
 0x2a2   : > { %v4526_v18 = vmul.f32 %v10625_v13, %v13585_v32  ;;  %v4527_v19 = vmul.f32 %v10625_v13, %v13588_v26  ;;  %v2544_v28 = vmul.f32 %v10619_v39, %v13585_v32  ;;  %v2545_v29 = vmul.f32 %v10619_v39, %v13588_v26 }
 0x2a3   : > { %v5517_v52 = vmul.f32 %v10628_v45, %v13585_v32  ;;  %v5518_v42 = vmul.f32 %v10628_v45, %v13588_v26  ;;  %v10634_v45 = vld [vmem:[#allocation4 + $0x5] ss:$0 sm:$0xff] }
 0x2a4   : > { %v4529_v46 = vsel %vm1961_vm4, %v4526_v18, 0  ;;  %v4532_v40 = vsel %vm1961_vm4, %v4527_v19, 0  ;;  %v2547_v43 = vsel %vm1961_vm4, %v2544_v28, 0  ;;  %v2550_v54 = vsel %vm1961_vm4, %v2545_v29, 0 }
 0x2a5   : > { %v4599_v58 = vand.u32 4294901760, %v4529_v46  ;;  %v4609_v59 = vand.u32 4294901760, %v4532_v40  ;;  %v13598_v0 = vand.u32 4294901760, %v2547_v43  ;;  %v13600_v6 = vand.u32 4294901760, %v2550_v54 }
 0x2a6   : > { %v5520_v37 = vsel %vm1961_vm4, %v5517_v52, 0  ;;  %v5523_v38 = vsel %vm1961_vm4, %v5518_v42, 0  ;;  %v7500_v52 = vmul.f32 %v10634_v45, %v13588_v26 }
 0x2a7   : > { %11666 = vmatprep.mubr.f32.mxu0 %v4599_v58  ;;  %v4600_v35 = vsub.f32 %v4529_v46, %v4599_v58  ;;  %v2618_v7 = vsub.f32 %v2547_v43, %v13598_v0  ;;  %v2628_v8 = vsub.f32 %v2550_v54, %v13600_v6  ;;  %v4610_v16 = vsub.f32 %v4532_v40, %v4609_v59  ;;  %v2504_v40 = vpop.f32.mrb[4].mxu0  ;;  %v10631_v54 = vld [vmem:[#allocation4 + $0x4] ss:$0 sm:$0xff] }
 0x2a8   : > { %11667 = vmatmul.mubr.f32.vlgmr.msra.gmra.mrb[6].mxu0 %v4609_v59  ;;  %v13616_v55 = vand.u32 4294901760, %v5520_v37  ;;  %v13624_v30 = vand.u32 4294901760, %v5523_v38  ;;  %2508 = vst.msk [vmem:[#allocation5] sm:$0xff] %vm1961_vm4, %v2504_v40  ;;  %v11500_v43 = vpop.f32.mrb[5].mxu0 }
 0x2a9   : > { %11671 = vmatprep.mubr.f32.mxu0 %v4600_v35  ;;  %v2619_v9 = vand.u32 4294901760, %v2618_v7  ;;  %11670 = vmatpush3.msra.mxu0 %v12869_v10  ;;  %v2629_v11 = vand.u32 4294901760, %v2628_v8  ;;  %v4601_v51 = vand.u32 4294901760, %v4600_v35  ;;  %v4611_v47 = vand.u32 4294901760, %v4610_v16 }
 0x2aa   : > { %12391 = vmatprep.subr.bf16.mxu0 %v12870_v44  ;;  %v5591_v34 = vsub.f32 %v5520_v37, %v13616_v55  ;;  %v5601_v13 = vsub.f32 %v5523_v38, %v13624_v30  ;;  %v7505_v37 = vsel %vm1961_vm4, %v7500_v52, 0 }
 0x2ab   : > { %v2620_v14 = vsub.f32 %v2618_v7, %v2619_v9  ;;  %v2630_v15 = vsub.f32 %v2628_v8, %v2629_v11  ;;  %v13618_v41 = vsub.f32 %v4600_v35, %v4601_v51  ;;  %v13620_v63 = vsub.f32 %v4610_v16, %v4611_v47 }
 0x2ac   : > { %v5592_v39 = vand.u32 4294901760, %v5591_v34  ;;  %v5602_v18 = vand.u32 4294901760, %v5601_v13  ;;  %v7582_v38 = vand.u32 4294901760, %v7505_v37 }
 0x2ad   : > { %v2621_v22 = vand.u32 4294901760, %v2620_v14  ;;  %v2631_v23 = vand.u32 4294901760, %v2630_v15 }
 0x2ae   : > { %v5593_v19 = vsub.f32 %v5591_v34, %v5592_v39  ;;  %v5603_v28 = vsub.f32 %v5601_v13, %v5602_v18 }
 0x2af   : > { %11505 = vmatprep.mubr.f32.mxu1 %v2621_v22 }
 0x2b0   : > { %11506 = vmatmul.mubr.f32.vlgmr.msra.gmra.mrb[4].mxu1 %v2631_v23  ;;  %11672 = vmatmul.mubr.f32.vlgmr.msra.gmra.mrb[6].mxu0 %v4610_v16  ;;  %v5594_v29 = vand.u32 4294901760, %v5593_v19  ;;  %v5604_v46 = vand.u32 4294901760, %v5603_v28 }
 0x2b1   : > { %11510 = vmatprep.mubr.f32.mxu1 %v13598_v0  ;;  %11678 = vmatprep.mubr.f32.mxu0 %v4601_v51  ;;  %v7499_v51 = vmul.f32 %v10634_v45, %v13585_v32 }
 0x2b2   : > { %11509 = vmatpush3.msra.mxu1 %v12869_v10  ;;  %12392 = vmatpush3.bf16.msra.mxu0 %v12870_v44 }
 0x2b3   : > { %11513 = vmatprep.subr.mxu1 %v12869_v10  ;;  %11681 = vmatprep.subr.mxu0 %v12869_v10  ;;  %v7502_v42 = vsel %vm1961_vm4, %v7499_v51, 0 }
 0x2b8   : > { %11511 = vmatmul.mubr.f32.vlgmr.msra.gmra.mrb[4].mxu1 %v13600_v6  ;;  %11679 = vmatmul.mubr.f32.vlgmr.msra.gmra.mrb[6].mxu0 %v4611_v47  ;;  %v7572_v47 = vand.u32 4294901760, %v7502_v42 }
 0x2b9   : > { %11515 = vmatprep.mubr.f32.mxu1 %v2618_v7  ;;  %11683 = vmatprep.mubr.f32.mxu0 %v4599_v58 }
 0x2ba   : > { %11514 = vmatpush3.msra.mxu1 %v12869_v10  ;;  %11682 = vmatpush3.msra.mxu0 %v12869_v10 }
 0x2bb   : > { %12343 = vmatprep.subr.bf16.mxu1 %v12870_v44  ;;  %12393 = vmatprep.subr.bf16.mxu0 %v12870_v44 }
 0x2c0   : > { %11516 = vmatmul.mubr.f32.vlgmr.msra.gmra.mrb[4].mxu1 %v2628_v8  ;;  %11684 = vmatmul.mubr.f32.vlgmr.msra.gmra.mrb[6].mxu0 %v4609_v59 }
 0x2c1   : > { %11522 = vmatprep.mubr.f32.mxu1 %v2619_v9  ;;  %11690 = vmatprep.mubr.f32.mxu0 %v4599_v58  ;;  %v6508_v58 = vmul.f32 %v10631_v54, %v13585_v32 }
 0x2c2   : > { %12344 = vmatpush3.bf16.msra.mxu1 %v12870_v44  ;;  %12394 = vmatpush3.bf16.msra.mxu0 %v12870_v44 }
 0x2c3   : > { %12413 = vmatprep.subr.bf16.mxu0 %v12870_v44  ;;  %11525 = vmatprep.subr.mxu1 %v12869_v10 }
 0x2c8   : > { %11523 = vmatmul.mubr.f32.vlgmr.msra.gmra.mrb[4].mxu1 %v2629_v11  ;;  %11691 = vmatmul.mubr.f32.vlgmr.msra.gmra.mrb[6].mxu0 %v4609_v59  ;;  %v6509_v59 = vmul.f32 %v10631_v54, %v13588_v26 }
 0x2c9   : > { %11527 = vmatprep.mubr.f32.mxu1 %v13598_v0  ;;  %12414 = vmatpush3.bf16.msra.mxu0 %v12870_v44 }
 0x2ca   : > { %11739 = vmatprep.mubr.f32.mxu0 %v5594_v29  ;;  %11526 = vmatpush3.msra.mxu1 %v12869_v10  ;;  %v6514_v7 = vsel %vm1961_vm4, %v6509_v59, 0  ;;  %v10637_v29 = vld [vmem:[#allocation4 + $0x6] ss:$0 sm:$0xff] }
 0x2cb   : > { %11742 = vmatprep.subr.mxu0 %v12869_v10  ;;  %12345 = vmatprep.subr.bf16.mxu1 %v12870_v44  ;;  %v8491_v40 = vmul.f32 %v10637_v29, %v13588_v26 }
 0x2cc   : > { %11740 = vmatmul.mubr.f32.vlgmr.msra.gmra.mrb[8].mxu0 %v5604_v46  ;;  %v8490_v46 = vmul.f32 %v10637_v29, %v13585_v32 }
 0x2cd   : > { %11744 = vmatprep.mubr.f32.mxu0 %v13616_v55  ;;  %11743 = vmatpush3.msra.mxu0 %v12869_v10 }
 0x2ce   : > { %11747 = vmatprep.subr.mxu0 %v12869_v10  ;;  %v8493_v43 = vsel %vm1961_vm4, %v8490_v46, 0 }
 0x2cf   : > { %v8563_v54 = vand.u32 4294901760, %v8493_v43 }
 0x2d0   : > { %11528 = vmatmul.mubr.f32.vlgmr.msra.gmra.mrb[4].mxu1 %v13600_v6 }
 0x2d1   : > { %11534 = vmatprep.mubr.f32.mxu1 %v13598_v0  ;;  %12346 = vmatpush3.bf16.msra.mxu1 %v12870_v44  ;;  %v6511_v0 = vsel %vm1961_vm4, %v6508_v58, 0  ;;  %v8496_v58 = vsel %vm1961_vm4, %v8491_v40, 0 }
 0x2d2   : > { %12347 = vmatprep.subr.bf16.mxu1 %v12867_v3  ;;  %v6581_v35 = vand.u32 4294901760, %v6511_v0  ;;  %v8573_v59 = vand.u32 4294901760, %v8496_v58 }
 0x2d4   : > { %11745 = vmatmul.mubr.f32.vlgmr.msra.gmra.mrb[8].mxu0 %v13624_v30  ;;  %v6582_v8 = vsub.f32 %v6511_v0, %v6581_v35  ;;  %v8564_v0 = vsub.f32 %v8493_v43, %v8563_v54 }
 0x2d5   : > { %11749 = vmatprep.mubr.f32.mxu0 %v5591_v34  ;;  %11748 = vmatpush3.msra.mxu0 %v12869_v10 }
 0x2d6   : > { %12415 = vmatprep.subr.bf16.mxu0 %v12870_v44  ;;  %v6583_v11 = vand.u32 4294901760, %v6582_v8 }
 0x2d8   : > { %11535 = vmatmul.mubr.f32.vlgmr.msra.gmra.mrb[4].mxu1 %v13600_v6  ;;  %v6591_v6 = vand.u32 4294901760, %v6514_v7  ;;  %v6584_v15 = vsub.f32 %v6582_v8, %v6583_v11 }
 0x2d9   : > { %11541 = vmatprep.mubr.msk.f32.mxu1 %vm12868_vm0, %v12869_v10 }
 0x2da   : > { %v6592_v9 = vsub.f32 %v6514_v7, %v6591_v6  ;;  %v6585_v23 = vand.u32 4294901760, %v6584_v15  ;;  %v8565_v7 = vand.u32 4294901760, %v8564_v0  ;;  %v10640_v15 = vld [vmem:[#allocation4 + $0x7] ss:$0 sm:$0xff] }
 0x2dc   : > { %11750 = vmatmul.mubr.f32.vlgmr.msra.gmra.mrb[8].mxu0 %v5601_v13  ;;  %v6593_v14 = vand.u32 4294901760, %v6592_v9 }
 0x2dd   : > { %11756 = vmatprep.mubr.f32.mxu0 %v5592_v39  ;;  %12416 = vmatpush3.bf16.msra.mxu0 %v12870_v44 }
 0x2de   : > { %11759 = vmatprep.subr.mxu0 %v12869_v10  ;;  %v6594_v22 = vsub.f32 %v6592_v9, %v6593_v14 }
 0x2e0   : > { %v6595_v16 = vand.u32 4294901760, %v6594_v22  ;;  %v9481_v22 = vmul.f32 %v10640_v15, %v13585_v32 }
 0x2e4   : > { %11757 = vmatmul.mubr.f32.vlgmr.msra.gmra.mrb[8].mxu0 %v5602_v18 }
 0x2e5   : > { %11761 = vmatprep.mubr.f32.mxu0 %v13616_v55  ;;  %11760 = vmatpush3.msra.mxu0 %v12869_v10 }
 0x2e6   : > { %12417 = vmatprep.subr.bf16.mxu0 %v12870_v44 }
 0x2ec   : > { %11762 = vmatmul.mubr.f32.vlgmr.msra.gmra.mrb[8].mxu0 %v13624_v30 }
 0x2ed   : > { %11768 = vmatprep.mubr.f32.mxu0 %v13616_v55  ;;  %12418 = vmatpush3.bf16.msra.mxu0 %v12870_v44  ;;  %v7573_v55 = vsub.f32 %v7502_v42, %v7572_v47 }
 0x2ee   : > { %12437 = vmatprep.subr.bf16.mxu0 %v12870_v44 }
 0x2ef   : > { %v7574_v34 = vand.u32 4294901760, %v7573_v55 }
 0x2f1   : > { %v7575_v39 = vsub.f32 %v7573_v55, %v7574_v34 }
 0x2f3   : > { %v7576_v19 = vand.u32 4294901760, %v7575_v39  ;;  %v2525_v39 = vld [vmem:[#allocation3] sm:$0x1] }
 0x2f4   : > { %11769 = vmatmul.mubr.f32.vlgmr.msra.gmra.mrb[8].mxu0 %v13624_v30  ;;  %v7583_v30 = vsub.f32 %v7505_v37, %v7582_v38 }
 0x2f5   : > { %12438 = vmatpush3.bf16.msra.mxu0 %v12870_v44  ;;  %11817 = vmatprep.mubr.f32.mxu0 %v6585_v23  ;;  %v9482_v23 = vmul.f32 %v10640_v15, %v13588_v26 }
 0x2f6   : > { %11820 = vmatprep.subr.mxu0 %v12869_v10  ;;  %v7584_v13 = vand.u32 4294901760, %v7583_v30 }
 0x2f7   : > { %v9487_v51 = vsel %vm1961_vm4, %v9482_v23, 0 }
 0x2f8   : > { %11818 = vmatmul.mubr.f32.vlgmr.msra.gmra.mrb[10].mxu0 %v6595_v16  ;;  %v7585_v18 = vsub.f32 %v7583_v30, %v7584_v13  ;;  %v9484_v16 = vsel %vm1961_vm4, %v9481_v22, 0  ;;  %v9564_v52 = vand.u32 4294901760, %v9487_v51 }
 0x2f9   : > { %11822 = vmatprep.mubr.f32.mxu0 %v6581_v35  ;;  %11821 = vmatpush3.msra.mxu0 %v12869_v10  ;;  %v9554_v45 = vand.u32 4294901760, %v9484_v16 }
 0x2fa   : > { %11825 = vmatprep.subr.mxu0 %v12869_v10  ;;  %v7586_v28 = vand.u32 4294901760, %v7585_v18  ;;  %v2533_v18 = vrot.slane %v2525_v39, %v13505_v17 }
 0x2fb   : > { %v9555_v42 = vsub.f32 %v9484_v16, %v9554_v45 }
 0x2fd   : > { %v9556_v37 = vand.u32 4294901760, %v9555_v42 }
 0x300   : > { %11823 = vmatmul.mubr.f32.vlgmr.msra.gmra.mrb[10].mxu0 %v6591_v6 }
 0x301   : > { %11827 = vmatprep.mubr.f32.mxu0 %v6582_v8  ;;  %11826 = vmatpush3.msra.mxu0 %v12869_v10  ;;  %v8566_v8 = vsub.f32 %v8564_v0, %v8565_v7 }
 0x302   : > { %12439 = vmatprep.subr.bf16.mxu0 %v12870_v44 }
 0x308   : > { %11828 = vmatmul.mubr.f32.vlgmr.msra.gmra.mrb[10].mxu0 %v6592_v9 }
 0x309   : > { %11834 = vmatprep.mubr.f32.mxu0 %v6583_v11  ;;  %12440 = vmatpush3.bf16.msra.mxu0 %v12870_v44  ;;  %v8567_v11 = vand.u32 4294901760, %v8566_v8 }
 0x30a   : > { %11837 = vmatprep.subr.mxu0 %v12869_v10 }
 0x310   : > { %11835 = vmatmul.mubr.f32.vlgmr.msra.gmra.mrb[10].mxu0 %v6593_v14 }
 0x311   : > { %11839 = vmatprep.mubr.f32.mxu0 %v6581_v35  ;;  %11838 = vmatpush3.msra.mxu0 %v12869_v10 }
 0x312   : > { %12441 = vmatprep.subr.bf16.mxu0 %v12870_v44 }
 0x318   : > { %11840 = vmatmul.mubr.f32.vlgmr.msra.gmra.mrb[10].mxu0 %v6591_v6 }
 0x319   : > { %11846 = vmatprep.mubr.f32.mxu0 %v6581_v35  ;;  %12442 = vmatpush3.bf16.msra.mxu0 %v12870_v44  ;;  %v8574_v35 = vsub.f32 %v8496_v58, %v8573_v59  ;;  %v3529_v58 = vmul.f32 1.442695, %v13575_v56 }
 0x31a   : > { %12461 = vmatprep.subr.bf16.mxu0 %v12870_v44 }
 0x320   : > { %11847 = vmatmul.mubr.f32.vlgmr.msra.gmra.mrb[10].mxu0 %v6591_v6  ;;  %v8575_v6 = vand.u32 4294901760, %v8574_v35 }
 0x321   : > { %12462 = vmatpush3.bf16.msra.mxu0 %v12870_v44  ;;  %11895 = vmatprep.mubr.f32.mxu0 %v7576_v19  ;;  %v2535_v19 = vmul.f32 %v2533_v18, %v13519_v31  ;;  %v13736_v31 = vld [vmem:[%s12999_s15] sm:$0x1] }
 0x322   : > { %11898 = vmatprep.subr.mxu0 %v12869_v10  ;;  %v8576_v9 = vsub.f32 %v8574_v35, %v8575_v6 }
 0x323   : > { %v2538_v46 = vmul.f32 1.442695, %v2535_v19 }
 0x324   : > { %11896 = vmatmul.mubr.f32.vlgmr.msra.gmra.mrb[12].mxu0 %v7586_v28  ;;  %v8577_v14 = vand.u32 4294901760, %v8576_v9  ;;  %v2534_v28 = vmul.f32 %v2533_v18, %v13510_v24 }
 0x325   : > { %11900 = vmatprep.mubr.f32.mxu0 %v7572_v47  ;;  %11899 = vmatpush3.msra.mxu0 %v12869_v10  ;;  %12773 = vpow2.f32 %v2538_v46 }
 0x326   : > { %11903 = vmatprep.subr.mxu0 %v12869_v10  ;;  %v2536_v43 = vmul.f32 1.442695, %v2534_v28 }
 0x328   : > { %12775 = vpow2.f32 %v2536_v43 }
 0x329   : > { %12777 = vpow2.f32 %v3529_v58 }
 0x32c   : > { %11901 = vmatmul.mubr.f32.vlgmr.msra.gmra.mrb[12].mxu0 %v7582_v38 }
 0x32d   : > { %11905 = vmatprep.mubr.f32.mxu0 %v7573_v55  ;;  %11904 = vmatpush3.msra.mxu0 %v12869_v10  ;;  %v9557_v55 = vsub.f32 %v9555_v42, %v9556_v37 }
 0x32e   : > { %12463 = vmatprep.subr.bf16.mxu0 %v12870_v44 }
 0x334   : > { %11906 = vmatmul.mubr.f32.vlgmr.msra.gmra.mrb[12].mxu0 %v7583_v30 }
 0x335   : > { %11912 = vmatprep.mubr.f32.mxu0 %v7574_v34  ;;  %12464 = vmatpush3.bf16.msra.mxu0 %v12870_v44  ;;  %v9558_v34 = vand.u32 4294901760, %v9557_v55 }
 0x336   : > { %11915 = vmatprep.subr.mxu0 %v12869_v10 }
 0x33c   : > { %11913 = vmatmul.mubr.f32.vlgmr.msra.gmra.mrb[12].mxu0 %v7584_v13 }
 0x33d   : > { %11917 = vmatprep.mubr.f32.mxu0 %v7572_v47  ;;  %11916 = vmatpush3.msra.mxu0 %v12869_v10 }
 0x33e   : > { %12465 = vmatprep.subr.bf16.mxu0 %v12870_v44 }
 0x344   : > { %11918 = vmatmul.mubr.f32.vlgmr.msra.gmra.mrb[12].mxu0 %v7582_v38 }
 0x345   : > { %11924 = vmatprep.mubr.f32.mxu0 %v7572_v47  ;;  %12466 = vmatpush3.bf16.msra.mxu0 %v12870_v44  ;;  %v9565_v47 = vsub.f32 %v9487_v51, %v9564_v52 }
 0x346   : > { %12485 = vmatprep.subr.bf16.mxu0 %v12870_v44 }
 0x34c   : > { %11925 = vmatmul.mubr.f32.vlgmr.msra.gmra.mrb[12].mxu0 %v7582_v38  ;;  %v9566_v38 = vand.u32 4294901760, %v9565_v47 }
 0x34d   : > { %12486 = vmatpush3.bf16.msra.mxu0 %v12870_v44  ;;  %11973 = vmatprep.mubr.f32.mxu0 %v8567_v11  ;;  %v2523_v11 = vld [vmem:[#allocation2] sm:$0xff] }
 0x34e   : > { %11976 = vmatprep.subr.mxu0 %v12869_v10  ;;  %v9567_v30 = vsub.f32 %v9565_v47, %v9566_v38 }
 0x350   : > { %11974 = vmatmul.mubr.f32.vlgmr.msra.gmra.mrb[14].mxu0 %v8577_v14  ;;  %v9568_v13 = vand.u32 4294901760, %v9567_v30 }
 0x351   : > { %11978 = vmatprep.mubr.f32.mxu0 %v8563_v54  ;;  %11977 = vmatpush3.msra.mxu0 %v12869_v10 }
 0x352   : > { %11981 = vmatprep.subr.mxu0 %v12869_v10 }
 0x358   : > { %11979 = vmatmul.mubr.f32.vlgmr.msra.gmra.mrb[14].mxu0 %v8573_v59 }
 0x359   : > { %11983 = vmatprep.mubr.f32.mxu0 %v8564_v0  ;;  %11982 = vmatpush3.msra.mxu0 %v12869_v10  ;;  %v3030_v0 = vmul.f32 %v13736_v31, %v2525_v39 }
 0x35a   : > { %12487 = vmatprep.subr.bf16.mxu0 %v12870_v44 }
 0x35b   : > { %v3034_v9 = vrot.slane %v3030_v0, %v13505_v17 }
 0x360   : > { %11984 = vmatmul.mubr.f32.vlgmr.msra.gmra.mrb[14].mxu0 %v8574_v35 }
 0x361   : > { %11990 = vmatprep.mubr.f32.mxu0 %v8565_v7  ;;  %12488 = vmatpush3.bf16.msra.mxu0 %v12870_v44  ;;  %v12774_v7 = vpop.eup %12773 }
 0x362   : > { %11993 = vmatprep.subr.mxu0 %v12869_v10  ;;  %v12776_v8 = vpop.eup %12775 }
 0x363   : > { %v3028_v23 = vmul.f32 %v12776_v8, %v2523_v11 }
 0x368   : > { %11991 = vmatmul.mubr.f32.vlgmr.msra.gmra.mrb[14].mxu0 %v8575_v6  ;;  %v2524_v6 = vld [vmem:[#allocation2 + $0x8] sm:$0xff] }
 0x369   : > { %11995 = vmatprep.mubr.f32.mxu0 %v8563_v54  ;;  %11994 = vmatpush3.msra.mxu0 %v12869_v10  ;;  %v3029_v14 = vmul.f32 %v12774_v7, %v2524_v6  ;;  %v10626_v6 = vld [vmem:[%s12999_s15 + $0x3] sm:$0x1] }
 0x36a   : > { %12489 = vmatprep.subr.bf16.mxu0 %v12870_v44  ;;  %v6003_v8 = vmul.f32 %v10626_v6, %v13512_v25 }
 0x36c   : > { %v6007_v11 = vrot.slane %v6003_v8, %v13505_v17 }
 0x370   : > { %11996 = vmatmul.mubr.f32.vlgmr.msra.gmra.mrb[14].mxu0 %v8573_v59 }
 0x371   : > { %12002 = vmatprep.mubr.f32.mxu0 %v8563_v54  ;;  %12490 = vmatpush3.bf16.msra.mxu0 %v12870_v44  ;;  %v2528_v54 = vld [vmem:[#allocation5] sm:$0x1] }
 0x372   : > { %12509 = vmatprep.subr.bf16.mxu0 %v12870_v44  ;;  %v3041_v24 = vsel %vm1961_vm4, %v2528_v54, 0 }
 0x373   : > { %v13740_v35 = vand.u32 4294901760, %v3041_v24 }
 0x375   : > { %v3111_v56 = vsub.f32 %v3041_v24, %v13740_v35 }
 0x377   : > { %v3112_v51 = vand.u32 4294901760, %v3111_v56 }
 0x378   : > { %12003 = vmatmul.mubr.f32.vlgmr.msra.gmra.mrb[14].mxu0 %v8573_v59  ;;  %v3527_v59 = vmul.f32 1.442695, %v13572_v49 }
 0x379   : > { %12510 = vmatpush3.bf16.msra.mxu0 %v12870_v44  ;;  %12051 = vmatprep.mubr.f32.mxu0 %v9558_v34 }
 0x37a   : > { %12054 = vmatprep.subr.mxu0 %v12869_v10  ;;  %12779 = vpow2.f32 %v3527_v59 }
 0x37c   : > { %12052 = vmatmul.mubr.f32.vlgmr.msra.gmra.mrb[16].mxu0 %v9568_v13  ;;  %v3113_v13 = vsub.f32 %v3111_v56, %v3112_v51 }
 0x37d   : > { %12056 = vmatprep.mubr.f32.mxu0 %v9554_v45  ;;  %12055 = vmatpush3.msra.mxu0 %v12869_v10 }
 0x37e   : > { %12059 = vmatprep.subr.mxu0 %v12869_v10  ;;  %v3114_v43 = vand.u32 4294901760, %v3113_v13  ;;  %v10629_v13 = vld [vmem:[%s12999_s15 + $0x4] sm:$0x1] }
 0x384   : > { %12057 = vmatmul.mubr.f32.vlgmr.msra.gmra.mrb[16].mxu0 %v9564_v52 }
 0x385   : > { %12061 = vmatprep.mubr.f32.mxu0 %v9555_v42  ;;  %12060 = vmatpush3.msra.mxu0 %v12869_v10 }
 0x386   : > { %12511 = vmatprep.subr.bf16.mxu0 %v12870_v44 }
 0x38c   : > { %12062 = vmatmul.mubr.f32.vlgmr.msra.gmra.mrb[16].mxu0 %v9565_v47 }
 0x38d   : > { %12068 = vmatprep.mubr.f32.mxu0 %v9556_v37  ;;  %12512 = vmatpush3.bf16.msra.mxu0 %v12870_v44 }
 0x38e   : > { %12071 = vmatprep.subr.mxu0 %v12869_v10 }
 0x394   : > { %12069 = vmatmul.mubr.f32.vlgmr.msra.gmra.mrb[16].mxu0 %v9566_v38 }
 0x395   : > { %12073 = vmatprep.mubr.f32.mxu0 %v9554_v45  ;;  %12072 = vmatpush3.msra.mxu0 %v12869_v10 }
 0x396   : > { %12513 = vmatprep.subr.bf16.mxu0 %v12870_v44 }
 0x39b   : > { %v13728_v29 = vpop.f32.mrb[6].mxu0 }
 0x39c   : > { %v13730_v40 = vpop.f32.mrb[7].mxu0  ;;  %12074 = vmatmul.mubr.f32.vlgmr.msra.gmra.mrb[16].mxu0 %v9564_v52 }
 0x39d   : > { %12080 = vmatprep.mubr.f32.mxu0 %v9554_v45  ;;  %12514 = vmatpush3.bf16.msra.mxu0 %v12870_v44 }
 0x3a4   : > { %12081 = vmatmul.mubr.f32.vlgmr.msra.gmra.mrb[16].mxu0 %v9564_v52  ;;  %v12778_v52 = vpop.eup %12777 }
 0x3a5   : > { %v12780_v47 = vpop.eup %12779 }
 0x3ab   : > { %v11536_v49 = vpop.f32.mrb[4].mxu1 }
 0x3ac   : > { %v3036_v15 = vmul.f32 %v11536_v49, %v3034_v9  ;;  %v3018_v22 = vpop.f32.mrb[5].mxu1 }
 0x3ad   : > { %v3035_v16 = vmul.f32 %v3034_v9, %v3018_v22  ;;  %v10622_v9 = vld [vmem:[#allocation4 + $0x1] ss:$0 sm:$0xff] }
 0x3ae   : > { %v3038_v45 = vadd.f32 %v3036_v15, %v3029_v14  ;;  %v3535_v22 = vmul.f32 %v10622_v9, %v13585_v32  ;;  %v3536_v25 = vmul.f32 %v10622_v9, %v13588_v26 }
 0x3af   : > { %v3037_v42 = vadd.f32 %v3035_v16, %v3028_v23 }
 0x3b0   : > { %v3047_v37 = vand.u32 4294901760, %v3038_v45  ;;  %v13744_v38 = vmul.f32 %v12778_v52, %v3038_v45  ;;  %v3538_v16 = vsel %vm1961_vm4, %v3535_v22, 0  ;;  %v3541_v52 = vsel %vm1961_vm4, %v3536_v25, 0 }
 0x3b1   : > { %v3044_v55 = vand.u32 4294901760, %v3037_v42  ;;  %v13746_v30 = vmul.f32 %v12780_v47, %v3037_v42  ;;  %v3618_v32 = vand.u32 4294901760, %v3541_v52 }
 0x3b2   : > { %v3129_v34 = vsub.f32 %v3038_v45, %v3047_v37  ;;  %v3608_v45 = vand.u32 4294901760, %v3538_v16 }
 0x3b3   : > { %v3122_v39 = vsub.f32 %v3037_v42, %v3044_v55  ;;  %v12348_v18 = vpack.c.bf16 %v3047_v37, %v3044_v55  ;;  %v3619_v42 = vsub.f32 %v3541_v52, %v3618_v32 }
 0x3b4   : > { %v3130_v19 = vand.u32 4294901760, %v3129_v34 }
 0x3b5   : > { %v3123_v28 = vand.u32 4294901760, %v3122_v39  ;;  %12349 = vmatpush3.bf16.msra.mxu1 %v12348_v18  ;;  %v12354_v46 = vpack.c.bf16 %v3129_v34, %v3122_v39  ;;  %v3620_v26 = vand.u32 4294901760, %v3619_v42 }
 0x3b6   : > { %12350 = vmatprep.subr.bf16.mxu1 %v12867_v3  ;;  %v3131_v54 = vsub.f32 %v3129_v34, %v3130_v19 }
 0x3b7   : > { %v3124_v58 = vsub.f32 %v3122_v39, %v3123_v28  ;;  %v12360_v59 = vpack.c.bf16 %v3130_v19, %v3123_v28  ;;  %v3621_v37 = vsub.f32 %v3619_v42, %v3620_v26  ;;  %v6994_v39 = vmul.f32 %v10629_v13, %v13514_v20  ;;  %v13800_v20 = vld [vmem:[%s12999_s15 + $0x5] sm:$0x1] }
 0x3b8   : > { %11542 = vmatmul.mubr.f32.vlgmr.msra.gmra.mrb[6].mxu1 %v3114_v43  ;;  %v3132_v24 = vand.u32 4294901760, %v3131_v54  ;;  %v7985_v43 = vmul.f32 %v13800_v20, %v13523_v50  ;;  %v10638_v50 = vld [vmem:[%s12999_s15 + $0x7] sm:$0x1] }
 0x3b9   : > { %v3125_v0 = vand.u32 4294901760, %v3124_v58  ;;  %11548 = vmatprep.mubr.msk.f32.mxu1 %vm12868_vm0, %v12869_v10  ;;  %v3622_v34 = vand.u32 4294901760, %v3621_v37  ;;  %v9967_v22 = vmul.f32 %v10638_v50, %v13543_v33 }
 0x3ba   : > { %v7989_v54 = vrot.slane %v7985_v43, %v13505_v17 }
 0x3bb   : > { %v12351_v7 = vpack.c.bf16 %v3132_v24, %v3125_v0  ;;  %v9971_v25 = vrot.slane %v9967_v22, %v13505_v17 }
 0x3bd   : > { %12352 = vmatpush3.bf16.msra.mxu1 %v12351_v7  ;;  %v10635_v7 = vld [vmem:[%s12999_s15 + $0x6] sm:$0x1] }
 0x3be   : > { %12353 = vmatprep.subr.bf16.mxu1 %v12867_v3  ;;  %v8976_v6 = vmul.f32 %v10635_v7, %v13541_v27 }
 0x3c0   : > { %11549 = vmatmul.mubr.f32.vlgmr.msra.gmra.mrb[6].mxu1 %v13740_v35  ;;  %v8980_v8 = vrot.slane %v8976_v6, %v13505_v17 }
 0x3c1   : > { %12355 = vmatpush3.bf16.msra.mxu1 %v12354_v46  ;;  %11555 = vmatprep.mubr.msk.f32.mxu1 %vm12868_vm0, %v12869_v10 }
 0x3c2   : > { %12356 = vmatprep.subr.bf16.mxu1 %v12867_v3 }
 0x3c7   : > { %v11770_v49 = vpop.f32.mrb[8].mxu0 }
 0x3c8   : > { %v13759_v14 = vmul.f32 %v11770_v49, %v6007_v11  ;;  %11556 = vmatmul.mubr.f32.vlgmr.msra.gmra.mrb[6].mxu1 %v3111_v56  ;;  %v5991_v15 = vpop.f32.mrb[9].mxu0  ;;  %v3609_v56 = vsub.f32 %v3538_v16, %v3608_v45 }
 0x3c9   : > { %12358 = vmatpush3.bf16.msra.mxu1 %v12348_v18  ;;  %v13762_v23 = vmul.f32 %v6007_v11, %v5991_v15  ;;  %11562 = vmatprep.mubr.msk.f32.mxu1 %vm12868_vm0, %v12869_v10 }
 0x3ca   : > { %12359 = vmatprep.subr.bf16.mxu1 %v12867_v3  ;;  %v3610_v47 = vand.u32 4294901760, %v3609_v56 }
 0x3d0   : > { %11563 = vmatmul.mubr.f32.vlgmr.msra.gmra.mrb[6].mxu1 %v3112_v51  ;;  %v3611_v51 = vsub.f32 %v3609_v56, %v3610_v47 }
 0x3d1   : > { %12361 = vmatpush3.bf16.msra.mxu1 %v12360_v59  ;;  %11569 = vmatprep.mubr.msk.f32.mxu1 %vm12868_vm0, %v12869_v10 }
 0x3d2   : > { %12362 = vmatprep.subr.bf16.mxu1 %v12867_v3  ;;  %v3612_v55 = vand.u32 4294901760, %v3611_v51  ;;  %v13828_v51 = vld [vmem:[%s12999_s15 + $0x1] sm:$0x1] }
 0x3d3   : > { %v4021_v37 = vmul.f32 %v13828_v51, %v13561_v2 }
 0x3d8   : > { %11570 = vmatmul.mubr.f32.vlgmr.msra.gmra.mrb[6].mxu1 %v13740_v35 }
 0x3d9   : > { %12364 = vmatpush3.bf16.msra.mxu1 %v12348_v18  ;;  %11576 = vmatprep.mubr.msk.f32.mxu1 %vm12868_vm0, %v12869_v10 }
 0x3da   : > { %12365 = vmatprep.subr.bf16.mxu1 %v12870_v44 }
 0x3e0   : > { %11577 = vmatmul.mubr.f32.vlgmr.msra.gmra.mrb[6].mxu1 %v13740_v35  ;;  %v6998_v35 = vrot.slane %v6994_v39, %v13505_v17 }
 0x3e1   : > { %12366 = vmatpush3.bf16.msra.mxu1 %v12870_v44  ;;  %11583 = vmatprep.mubr.f32.mxu1 %v3612_v55 }
 0x3e2   : > { %11586 = vmatprep.subr.mxu1 %v12869_v10 }
 0x3e4   : > { %11584 = vmatmul.mubr.f32.vlgmr.msra.gmra.mrb[8].mxu1 %v3622_v34  ;;  %v4025_v34 = vrot.slane %v4021_v37, %v13505_v17  ;;  %v4613_v37 = vand.u32 4294901760, %v13620_v63 }
 0x3e5   : > { %11588 = vmatprep.mubr.f32.mxu1 %v3608_v45  ;;  %11587 = vmatpush3.msra.mxu1 %v12869_v10 }
 0x3e6   : > { %11591 = vmatprep.subr.mxu1 %v12869_v10 }
 0x3ec   : > { %11589 = vmatmul.mubr.f32.vlgmr.msra.gmra.mrb[8].mxu1 %v3618_v32 }
 0x3ed   : > { %11593 = vmatprep.mubr.f32.mxu1 %v3609_v56  ;;  %11592 = vmatpush3.msra.mxu1 %v12869_v10 }
 0x3ee   : > { %12367 = vmatprep.subr.bf16.mxu1 %v12870_v44 }
 0x3f3   : > { %v11848_v18 = vpop.f32.mrb[10].mxu0 }
 0x3f4   : > { %v13787_v19 = vmul.f32 %v11848_v18, %v6998_v35  ;;  %11594 = vmatmul.mubr.f32.vlgmr.msra.gmra.mrb[8].mxu1 %v3619_v42  ;;  %v6982_v28 = vpop.f32.mrb[11].mxu0  ;;  %v3518_v42 = vld [vmem:[#allocation5 + $0x1] sm:$0x1] }
 0x3f5   : > { %v13789_v46 = vmul.f32 %v6998_v35, %v6982_v28  ;;  %11600 = vmatprep.mubr.f32.mxu1 %v3610_v47  ;;  %12368 = vmatpush3.bf16.msra.mxu1 %v12870_v44  ;;  %v4520_v47 = vmul.f32 1.442695, %v13581_v62  ;;  %v4032_v33 = vsel %vm1961_vm4, %v3518_v42, 0 }
 0x3f6   : > { %11603 = vmatprep.subr.mxu1 %v12869_v10  ;;  %v4101_v55 = vand.u32 4294901760, %v4032_v33 }
 0x3f7   : > { %12781 = vpow2.f32 %v4520_v47 }
 0x3f8   : > { %v4102_v13 = vsub.f32 %v4032_v33, %v4101_v55  ;;  %v4603_v33 = vand.u32 4294901760, %v13618_v41  ;;  %v10621_v41 = vld [vmem:[%s13866_s25 + $0x1] sm:$0x1] }
 0x3fc   : > { %11601 = vmatmul.mubr.f32.vlgmr.msra.gmra.mrb[8].mxu1 %v3620_v26  ;;  %v4518_v26 = vmul.f32 1.442695, %v13578_v61  ;;  %v4103_v61 = vand.u32 4294901760, %v4102_v13 }
 0x3fd   : > { %11605 = vmatprep.mubr.f32.mxu1 %v3608_v45  ;;  %11604 = vmatpush3.msra.mxu1 %v12869_v10 }
 0x3fe   : > { %12369 = vmatprep.subr.bf16.mxu1 %v12870_v44  ;;  %12783 = vpow2.f32 %v4518_v26 }
 0x401   : > { %v12782_v43 = vpop.eup %12781 }
 0x404   : > { %11606 = vmatmul.mubr.f32.vlgmr.msra.gmra.mrb[8].mxu1 %v3618_v32 }
 0x405   : > { %11612 = vmatprep.mubr.f32.mxu1 %v3608_v45  ;;  %12370 = vmatpush3.bf16.msra.mxu1 %v12870_v44 }
 0x406   : > { %12371 = vmatprep.subr.bf16.mxu1 %v12867_v3 }
 0x40c   : > { %11613 = vmatmul.mubr.f32.vlgmr.msra.gmra.mrb[8].mxu1 %v3618_v32 }
 0x40d   : > { %11619 = vmatprep.mubr.msk.f32.mxu1 %vm12868_vm0, %v12869_v10 }
 0x41f   : > { %v11926_v58 = vpop.f32.mrb[12].mxu0 }
 0x420   : > { %v13805_v59 = vmul.f32 %v11926_v58, %v7989_v54  ;;  %v7973_v24 = vpop.f32.mrb[13].mxu0  ;;  %v12784_v58 = vpop.eup %12783 }
 0x421   : > { %v13807_v0 = vmul.f32 %v7989_v54, %v7973_v24 }
 0x44b   : > { %v12004_v9 = vpop.f32.mrb[14].mxu0 }
 0x44c   : > { %v13812_v11 = vmul.f32 %v12004_v9, %v8980_v8  ;;  %v8964_v49 = vpop.f32.mrb[15].mxu0  ;;  %v4104_v9 = vsub.f32 %v4102_v13, %v4103_v61 }
 0x44d   : > { %v13814_v15 = vmul.f32 %v8980_v8, %v8964_v49 }
 0x477   : > { %v12082_v16 = vpop.f32.mrb[16].mxu0 }
 0x478   : > { %v13819_v45 = vmul.f32 %v12082_v16, %v9971_v25  ;;  %v9955_v52 = vpop.f32.mrb[17].mxu0 }
 0x479   : > { %v13821_v32 = vmul.f32 %v9971_v25, %v9955_v52 }
 0x4b3   : > { %v13823_v27 = vpop.f32.mrb[6].mxu1 }
 0x4b4   : > { %v11578_v56 = vpop.f32.mrb[7].mxu1 }
 0x4df   : > { %v11614_v39 = vpop.f32.mrb[8].mxu1 }
 0x4e0   : > { %v4027_v35 = vmul.f32 %v11614_v39, %v4025_v34  ;;  %v4009_v18 = vpop.f32.mrb[9].mxu1 }
 0x4e1   : > { %v4026_v28 = vmul.f32 %v4025_v34, %v4009_v18  ;;  %v4493_v34 = vsub.f32 0.0, %v10621_v41 }
 0x4e2   : > { %v4029_v62 = vadd.f32 %v4027_v35, %v13744_v38  ;;  %v4105_v38 = vand.u32 4294901760, %v4104_v9 }
 0x4e3   : > { %v4028_v54 = vadd.f32 %v4026_v28, %v13746_v30 }
 0x4e4   : > { %v4038_v24 = vand.u32 4294901760, %v4029_v62  ;;  %v13836_v7 = vmul.f32 %v12782_v43, %v4029_v62  ;;  %v4509_v43 = vld [vmem:[#allocation5 + $0x2] sm:$0x1] }
 0x4e5   : > { %v4035_v2 = vand.u32 4294901760, %v4028_v54  ;;  %v13838_v6 = vmul.f32 %v12784_v58, %v4028_v54  ;;  %v5511_v58 = vmul.f32 1.442695, %v13533_v60  ;;  %v12837_v60 = vld [vmem:[#allocation3 + $0x2] sm:$0x1] }
 0x4e6   : > { %v4120_v8 = vsub.f32 %v4029_v62, %v4038_v24  ;;  %v13873_v62 = vld [vmem:[%s14219_s8] sm:$0x1] }
 0x4e7   : > { %v4113_v49 = vsub.f32 %v4028_v54, %v4035_v2  ;;  %v12372_v50 = vpack.c.bf16 %v4038_v24, %v4035_v2  ;;  %v3039_v24 = vmul.f32 %v13736_v31, %v13873_v62  ;;  %v4030_v2 = vmul.f32 %v13828_v51, %v13873_v62 }
 0x4e8   : > { %v4121_v22 = vand.u32 4294901760, %v4120_v8 }
 0x4e9   : > { %v4114_v25 = vand.u32 4294901760, %v4113_v49  ;;  %12373 = vmatpush3.bf16.msra.mxu1 %v12372_v50  ;;  %v12378_v16 = vpack.c.bf16 %v4120_v8, %v4113_v49  ;;  %v12535_v31 = vadd.f32 %v13823_v27, %v3039_v24 }
 0x4ea   : > { %12374 = vmatprep.subr.bf16.mxu1 %v12867_v3  ;;  %v4122_v52 = vsub.f32 %v4120_v8, %v4121_v22  ;;  %v13882_v8 = vld [vmem:[%s12999_s15 + $0x2] sm:$0x1] }
 0x4eb   : > { %v4115_v30 = vsub.f32 %v4113_v49, %v4114_v25  ;;  %v12384_v56 = vpack.c.bf16 %v4121_v22, %v4114_v25  ;;  %v5023_v49 = vsel %vm1961_vm4, %v4509_v43, 0 }
 0x4ec   : > { %11620 = vmatmul.mubr.f32.vlgmr.msra.gmra.mrb[10].mxu1 %v4105_v38  ;;  %v4123_v42 = vand.u32 4294901760, %v4122_v52 }
 0x4ed   : > { %v4116_v47 = vand.u32 4294901760, %v4115_v30  ;;  %11626 = vmatprep.mubr.msk.f32.mxu1 %vm12868_vm0, %v12869_v10  ;;  %v13889_v30 = vand.u32 4294901760, %v5023_v49 }
 0x4ef   : > { %v12375_v26 = vpack.c.bf16 %v4123_v42, %v4116_v47  ;;  %v13895_v27 = vsub.f32 %v5023_v49, %v13889_v30 }
 0x4f1   : > { %12376 = vmatpush3.bf16.msra.mxu1 %v12375_v26 }
 0x4f2   : > { %12377 = vmatprep.subr.bf16.mxu1 %v12867_v3 }
 0x4f4   : > { %11627 = vmatmul.mubr.f32.vlgmr.msra.gmra.mrb[10].mxu1 %v4101_v55 }
 0x4f5   : > { %12379 = vmatpush3.bf16.msra.mxu1 %v12378_v16  ;;  %11633 = vmatprep.mubr.msk.f32.mxu1 %vm12868_vm0, %v12869_v10  ;;  %v5012_v16 = vmul.f32 %v12837_v60, %v13882_v8 }
 0x4f6   : > { %12380 = vmatprep.subr.bf16.mxu1 %v12867_v3 }
 0x4fc   : > { %11634 = vmatmul.mubr.f32.vlgmr.msra.gmra.mrb[10].mxu1 %v4102_v13  ;;  %v4494_v13 = vmul.f32 1.442695, %v4493_v34 }
 0x4fd   : > { %12382 = vmatpush3.bf16.msra.mxu1 %v12372_v50  ;;  %11640 = vmatprep.mubr.msk.f32.mxu1 %vm12868_vm0, %v12869_v10 }
 0x4fe   : > { %12383 = vmatprep.subr.bf16.mxu1 %v12867_v3  ;;  %12785 = vpow2.f32 %v4494_v13 }
 0x504   : > { %11641 = vmatmul.mubr.f32.vlgmr.msra.gmra.mrb[10].mxu1 %v4103_v61  ;;  %v5509_v61 = vmul.f32 1.442695, %v13530_v57  ;;  %v6502_v57 = vmul.f32 1.442695, %v13539_v5  ;;  %v5016_v5 = vrot.slane %v5012_v16, %v13505_v17  ;;  %v8484_v17 = vmul.f32 1.442695, %v13559_v53 }
 0x505   : > { %12385 = vmatpush3.bf16.msra.mxu1 %v12384_v56  ;;  %11647 = vmatprep.mubr.msk.f32.mxu1 %vm12868_vm0, %v12869_v10 }
 0x506   : > { %12386 = vmatprep.subr.bf16.mxu1 %v12867_v3 }
 0x508   : > { %v12786_v63 = vpop.eup %12785 }
 0x509   : > { %v4496_v18 = vadd.f32 1.0, %v12786_v63  ;;  %v5094_v63 = vand.u32 4294901760, %v13895_v27 }
 0x50c   : > { %11648 = vmatmul.mubr.f32.vlgmr.msra.gmra.mrb[10].mxu1 %v4101_v55 }
 0x50d   : > { %12388 = vmatpush3.bf16.msra.mxu1 %v12372_v50  ;;  %11654 = vmatprep.mubr.msk.f32.mxu1 %vm12868_vm0, %v12869_v10  ;;  %v6500_v50 = vmul.f32 1.442695, %v13536_v4  ;;  %v7493_v4 = vmul.f32 1.442695, %v13549_v36  ;;  %v8482_v36 = vmul.f32 1.442695, %v13556_v48 }
 0x50e   : > { %12389 = vmatprep.subr.bf16.mxu1 %v12870_v44 }
 0x514   : > { %11655 = vmatmul.mubr.f32.vlgmr.msra.gmra.mrb[10].mxu1 %v4101_v55  ;;  %v2529_v55 = vld [vmem:[%s13866_s25] sm:$0x1] }
 0x515   : > { %12390 = vmatpush3.bf16.msra.mxu1 %v12870_v44  ;;  %11661 = vmatprep.mubr.f32.mxu1 %v4603_v33  ;;  %v3502_v44 = vsub.f32 0.0, %v2529_v55 }
 0x516   : > { %12395 = vmatprep.subr.bf16.mxu1 %v12867_v3 }
 0x517   : > { %v3503_v39 = vmul.f32 1.442695, %v3502_v44 }
 0x518   : > { %11662 = vmatmul.mubr.f32.vlgmr.msra.gmra.mrb[12].mxu1 %v4613_v37 }
 0x519   : > { %11697 = vmatprep.mubr.msk.f32.mxu1 %vm12868_vm0, %v12869_v10  ;;  %12787 = vpow2.f32 %v3503_v39 }
 0x51a   : > { %12789 = vrcp.f32 %v4496_v18  ;;  %v9475_v18 = vmul.f32 1.442695, %v13567_v21 }
 0x523   : > { %v12788_v35 = vpop.eup %12787 }
 0x524   : > { %v3505_v28 = vadd.f32 1.0, %v12788_v35  ;;  %v12790_v54 = vpop.eup %12789 }
 0x525   : > { %v4499_v22 = vmul.f32 %v12790_v54, %v10621_v41  ;;  %v7491_v41 = vmul.f32 1.442695, %v13546_v12  ;;  %v9473_v12 = vmul.f32 1.442695, %v13564_v1 }
 0x526   : > { %12791 = vrcp.f32 %v3505_v28 }
 0x527   : > { %12793 = vpow2.f32 %v5509_v61 }
 0x528   : > { %12795 = vpow2.f32 %v5511_v58  ;;  %v5095_v58 = vsub.f32 %v13895_v27, %v5094_v63 }
 0x529   : > { %12797 = vpow2.f32 %v6500_v50 }
 0x52a   : > { %12799 = vpow2.f32 %v6502_v57 }
 0x52b   : > { %12801 = vpow2.f32 %v7493_v4 }
 0x52c   : > { %12803 = vpow2.f32 %v7491_v41 }
 0x52d   : > { %12805 = vpow2.f32 %v8482_v36 }
 0x52e   : > { %12807 = vpow2.f32 %v8484_v17 }
 0x52f   : > { %12809 = vpow2.f32 %v9473_v12 }
 0x530   : > { %v12792_v9 = vpop.eup %12791  ;;  %12811 = vpow2.f32 %v9475_v18 }
 0x531   : > { %v3508_v38 = vmul.f32 %v12792_v9, %v2529_v55  ;;  %v12794_v39 = vpop.eup %12793 }
 0x532   : > { %v12796_v35 = vpop.eup %12795 }
 0x533   : > { %v3509_v47 = vmul.f32 %v12535_v31, %v3508_v38  ;;  %v12798_v54 = vpop.eup %12797 }
 0x534   : > { %v12800_v1 = vpop.eup %12799 }
 0x5e7   : > { %v4489_v25 = vpop.f32.mrb[10].mxu1 }
 0x5e8   : > { %v12536_v51 = vadd.f32 %v4489_v25, %v4030_v2  ;;  %v11656_v52 = vpop.f32.mrb[11].mxu1  ;;  %v5096_v25 = vand.u32 4294901760, %v5095_v58 }
 0x5ea   : > { %v4500_v56 = vmul.f32 %v12536_v51, %v4499_v22 }
 0x5eb   : > { %v11663_v42 = vpop.f32.mrb[12].mxu1 }
 0x5ec   : > { %v10448_v26 = vrot.slane %v4500_v56, 7  ;;  %v12537_v33 = vadd.f32 %v13728_v29, %v11663_v42  ;;  %v4605_v37 = vpop.f32.mrb[13].mxu1  ;;  %v12802_v56 = vpop.eup %12801 }
 0x5ed   : > { %v12538_v55 = vadd.f32 %v13730_v40, %v4605_v37 }
 0x5ee   : > { %v13899_v34 = vsel %vm10468_vm7, %v3509_v47, %v10448_v26  ;;  %v5018_v44 = vmul.f32 %v12537_v33, %v5016_v5  ;;  %v12804_v26 = vpop.eup %12803 }
 0x5ef   : > { %v5017_v13 = vmul.f32 %v12538_v55, %v5016_v5 }
 0x5f0   : > { %v5020_v29 = vadd.f32 %v5018_v44, %v13836_v7 }
 0x5f1   : > { %v5019_v40 = vadd.f32 %v5017_v13, %v13838_v6 }
 0x5f2   : > { %v5029_v28 = vand.u32 4294901760, %v5020_v29  ;;  %v6002_v61 = vmul.f32 %v12796_v35, %v5020_v29 }
 0x5f3   : > { %v5026_v48 = vand.u32 4294901760, %v5019_v40  ;;  %v6001_v43 = vmul.f32 %v12794_v39, %v5019_v40  ;;  %v12806_v39 = vpop.eup %12805 }
 0x5f4   : > { %v13908_v53 = vsub.f32 %v5020_v29, %v5029_v28  ;;  %v6011_v7 = vadd.f32 %v13759_v14, %v6002_v61  ;;  %v12808_v12 = vpop.eup %12807 }
 0x5f5   : > { %v13914_v6 = vsub.f32 %v5019_v40, %v5026_v48  ;;  %v6010_v21 = vadd.f32 %v13762_v23, %v6001_v43  ;;  %v13917_v24 = vpack.c.bf16 %v5029_v28, %v5026_v48  ;;  %v12810_v48 = vpop.eup %12809 }
 0x5f6   : > { %v6993_v2 = vmul.f32 %v12800_v1, %v6011_v7  ;;  %v5112_v9 = vand.u32 4294901760, %v13908_v53  ;;  %v6020_v49 = vand.u32 4294901760, %v6011_v7  ;;  %v12812_v58 = vpop.eup %12811 }
 0x5f7   : > { %v6992_v50 = vmul.f32 %v12798_v54, %v6010_v21  ;;  %12397 = vmatpush3.bf16.msra.mxu1 %v13917_v24  ;;  %v5105_v14 = vand.u32 4294901760, %v13914_v6  ;;  %v12402_v22 = vpack.c.bf16 %v13908_v53, %v13914_v6  ;;  %v6017_v57 = vand.u32 4294901760, %v6010_v21 }
 0x5f8   : > { %12398 = vmatprep.subr.bf16.mxu1 %v12867_v3  ;;  %v5113_v23 = vsub.f32 %v13908_v53, %v5112_v9  ;;  %v13926_v60 = vsub.f32 %v6011_v7, %v6020_v49  ;;  %v7002_v16 = vadd.f32 %v13787_v19, %v6993_v2 }
 0x5f9   : > { %v5106_v31 = vsub.f32 %v13914_v6, %v5105_v14  ;;  %v13930_v38 = vpack.c.bf16 %v5112_v9, %v5105_v14  ;;  %v13932_v51 = vpack.c.bf16 %v6020_v49, %v6017_v57  ;;  %v13934_v52 = vsub.f32 %v6010_v21, %v6017_v57 }
 0x5fa   : > { %11698 = vmatmul.mubr.f32.vlgmr.msra.gmra.mrb[14].mxu1 %v5096_v25  ;;  %v5114_v4 = vand.u32 4294901760, %v5113_v23  ;;  %v6103_v42 = vand.u32 4294901760, %v13926_v60  ;;  %v7001_v5 = vadd.f32 %v13789_v46, %v6992_v50  ;;  %v7011_v47 = vand.u32 4294901760, %v7002_v16 }
 0x5fb   : > { %v5107_v33 = vand.u32 4294901760, %v5106_v31  ;;  %11704 = vmatprep.mubr.msk.f32.mxu1 %vm12868_vm0, %v12869_v10  ;;  %v6096_v19 = vand.u32 4294901760, %v13934_v52  ;;  %v12426_v37 = vpack.c.bf16 %v13926_v60, %v13934_v52  ;;  %v7984_v41 = vmul.f32 %v12802_v56, %v7002_v16 }
 0x5fc   : > { %v6104_v55 = vsub.f32 %v13926_v60, %v6103_v42  ;;  %v7008_v44 = vand.u32 4294901760, %v7001_v5  ;;  %v13944_v36 = vsub.f32 %v7002_v16, %v7011_v47  ;;  %v7983_v13 = vmul.f32 %v12804_v26, %v7001_v5 }
 0x5fd   : > { %v12399_v46 = vpack.c.bf16 %v5114_v4, %v5107_v33  ;;  %v6097_v17 = vsub.f32 %v13934_v52, %v6096_v19  ;;  %v13947_v29 = vpack.c.bf16 %v6103_v42, %v6096_v19  ;;  %v7993_v35 = vadd.f32 %v13805_v59, %v7984_v41 }
 0x5fe   : > { %v6105_v40 = vand.u32 4294901760, %v6104_v55  ;;  %v13950_v18 = vpack.c.bf16 %v7011_v47, %v7008_v44  ;;  %v13952_v28 = vsub.f32 %v7001_v5, %v7008_v44  ;;  %v7094_v61 = vand.u32 4294901760, %v13944_v36 }
 0x5ff   : > { %12400 = vmatpush3.bf16.msra.mxu1 %v12399_v46  ;;  %v6098_v43 = vand.u32 4294901760, %v6097_v17  ;;  %v7992_v54 = vadd.f32 %v13807_v0, %v7983_v13  ;;  %v8002_v53 = vand.u32 4294901760, %v7993_v35  ;;  %v8975_v7 = vmul.f32 %v12808_v12, %v7993_v35 }
 0x600   : > { %12401 = vmatprep.subr.bf16.mxu1 %v12867_v3  ;;  %v7087_v59 = vand.u32 4294901760, %v13952_v28  ;;  %v7095_v1 = vsub.f32 %v13944_v36, %v7094_v61  ;;  %v12450_v6 = vpack.c.bf16 %v13944_v36, %v13952_v28 }
 0x601   : > { %v13961_v21 = vpack.c.bf16 %v6105_v40, %v6098_v43  ;;  %v7999_v2 = vand.u32 4294901760, %v7992_v54  ;;  %v13963_v9 = vsub.f32 %v7993_v35, %v8002_v53  ;;  %v8974_v49 = vmul.f32 %v12806_v39, %v7992_v54 }
 0x602   : > { %11705 = vmatmul.mubr.f32.vlgmr.msra.gmra.mrb[14].mxu1 %v13889_v30  ;;  %v7088_v0 = vsub.f32 %v13952_v28, %v7087_v59  ;;  %v7096_v50 = vand.u32 4294901760, %v7095_v1  ;;  %v13967_v14 = vpack.c.bf16 %v7094_v61, %v7087_v59  ;;  %v8984_v57 = vadd.f32 %v13812_v11, %v8975_v7 }
 0x603   : > { %12403 = vmatpush3.bf16.msra.mxu1 %v12402_v22  ;;  %11711 = vmatprep.mubr.msk.f32.mxu1 %vm12868_vm0, %v12869_v10  ;;  %v13972_v25 = vpack.c.bf16 %v8002_v53, %v7999_v2  ;;  %v13974_v23 = vsub.f32 %v7992_v54, %v7999_v2  ;;  %v8085_v16 = vand.u32 4294901760, %v13963_v9  ;;  %v8983_v31 = vadd.f32 %v13814_v15, %v8974_v49  ;;  %v5500_v2 = vld [vmem:[#allocation5 + $0x3] sm:$0x1] }
 0x604   : > { %12404 = vmatprep.subr.bf16.mxu1 %v12867_v3  ;;  %v7089_v56 = vand.u32 4294901760, %v7088_v0  ;;  %v8993_v4 = vand.u32 4294901760, %v8984_v57  ;;  %v9966_v42 = vmul.f32 %v12812_v58, %v8984_v57 }
 0x605   : > { %v8078_v5 = vand.u32 4294901760, %v13974_v23  ;;  %v8086_v11 = vsub.f32 %v13963_v9, %v8085_v16  ;;  %v12474_v22 = vpack.c.bf16 %v13963_v9, %v13974_v23  ;;  %v8990_v47 = vand.u32 4294901760, %v8983_v31 }
 0x606   : > { %v13983_v26 = vpack.c.bf16 %v7096_v50, %v7089_v56  ;;  %v13985_v33 = vsub.f32 %v8984_v57, %v8993_v4  ;;  %v9965_v19 = vmul.f32 %v12810_v48, %v8983_v31  ;;  %v9975_v15 = vadd.f32 %v13819_v45, %v9966_v42 }
 0x607   : > { %v8079_v41 = vsub.f32 %v13974_v23, %v8078_v5  ;;  %v8087_v55 = vand.u32 4294901760, %v8086_v11  ;;  %v13989_v44 = vpack.c.bf16 %v8085_v16, %v8078_v5  ;;  %v13991_v13 = vpack.c.bf16 %v8993_v4, %v8990_v47 }
 0x608   : > { %v13993_v39 = vsub.f32 %v8983_v31, %v8990_v47  ;;  %v9076_v46 = vand.u32 4294901760, %v13985_v33  ;;  %v9974_v17 = vadd.f32 %v13821_v32, %v9965_v19  ;;  %v9984_v35 = vand.u32 4294901760, %v9975_v15  ;;  %10483 = vst.msk [vmem:[#allocation2 + $0x8] sm:$0xff] %vm391_vm1, %v9975_v15 }
 0x609   : > { %v8080_v12 = vand.u32 4294901760, %v8079_v41  ;;  %v6014_v31 = vsel %vm1961_vm4, %v5500_v2, 0 }
 0x60a   : > { %11712 = vmatmul.mubr.f32.vlgmr.msra.gmra.mrb[14].mxu1 %v13895_v27  ;;  %v9069_v45 = vand.u32 4294901760, %v13993_v39  ;;  %v9077_v40 = vsub.f32 %v13985_v33, %v9076_v46  ;;  %v12498_v61 = vpack.c.bf16 %v13985_v33, %v13993_v39  ;;  %v9981_v48 = vand.u32 4294901760, %v9974_v17  ;;  %10482 = vst.msk [vmem:[#allocation2] sm:$0xff] %vm391_vm1, %v9974_v17 }
 0x60b   : > { %12406 = vmatpush3.bf16.msra.mxu1 %v13917_v24  ;;  %11718 = vmatprep.mubr.msk.f32.mxu1 %vm12868_vm0, %v12869_v10  ;;  %v14007_v32 = vpack.c.bf16 %v8087_v55, %v8080_v12  ;;  %v14009_v43 = vsub.f32 %v9975_v15, %v9984_v35  ;;  %v6083_v11 = vand.u32 4294901760, %v6014_v31 }
 0x60c   : > { %12407 = vmatprep.subr.bf16.mxu1 %v12867_v3  ;;  %v9070_v54 = vsub.f32 %v13993_v39, %v9069_v45  ;;  %v9078_v53 = vand.u32 4294901760, %v9077_v40  ;;  %v14013_v7 = vpack.c.bf16 %v9076_v46, %v9069_v45  ;;  %v14015_v58 = vpack.c.bf16 %v9984_v35, %v9981_v48 }
 0x60d   : > { %v14017_v59 = vsub.f32 %v9974_v17, %v9981_v48  ;;  %v10067_v1 = vand.u32 4294901760, %v14009_v43  ;;  %v6084_v19 = vsub.f32 %v6014_v31, %v6083_v11  ;;  %v10624_v17 = vld [vmem:[%s13866_s25 + $0x2] sm:$0x1]  ;;  %v12838_v31 = vld [vmem:[%s12999_s15 + $0x3] sm:$0x1] }
 0x60e   : > { %v9071_v49 = vand.u32 4294901760, %v9070_v54  ;;  %v5484_v12 = vsub.f32 0.0, %v10624_v17 }
 0x60f   : > { %v10060_v0 = vand.u32 4294901760, %v14017_v59  ;;  %v10068_v50 = vsub.f32 %v14009_v43, %v10067_v1  ;;  %v12522_v57 = vpack.c.bf16 %v14009_v43, %v14017_v59  ;;  %v6085_v27 = vand.u32 4294901760, %v6084_v19 }
 0x610   : > { %v14024_v16 = vpack.c.bf16 %v9078_v53, %v9071_v49  ;;  %v5485_v40 = vmul.f32 1.442695, %v5484_v12  ;;  %v5021_v43 = vmul.f32 %v13882_v8, %v13873_v62 }
 0x611   : > { %v10061_v56 = vsub.f32 %v14017_v59, %v10060_v0  ;;  %v10069_v4 = vand.u32 4294901760, %v10068_v50  ;;  %v14028_v42 = vpack.c.bf16 %v10067_v1, %v10060_v0  ;;  %v10627_v1 = vld [vmem:[%s13866_s25 + $0x3] sm:$0x1] }
 0x612   : > { %11719 = vmatmul.mubr.f32.vlgmr.msra.gmra.mrb[14].mxu1 %v5094_v63  ;;  %v6086_v63 = vsub.f32 %v6084_v19, %v6085_v27  ;;  %12813 = vpow2.f32 %v5485_v40 }
 0x613   : > { %12409 = vmatpush3.bf16.msra.mxu1 %v13930_v38  ;;  %11725 = vmatprep.mubr.msk.f32.mxu1 %vm12868_vm0, %v12869_v10  ;;  %v10062_v5 = vand.u32 4294901760, %v10061_v56 }
 0x614   : > { %12410 = vmatprep.subr.bf16.mxu1 %v12867_v3  ;;  %v6087_v38 = vand.u32 4294901760, %v6086_v63 }
 0x615   : > { %v14036_v47 = vpack.c.bf16 %v10069_v4, %v10062_v5  ;;  %v10630_v5 = vld [vmem:[%s13866_s25 + $0x4] sm:$0x1] }
 0x61a   : > { %11726 = vmatmul.mubr.f32.vlgmr.msra.gmra.mrb[14].mxu1 %v13889_v30 }
 0x61b   : > { %12412 = vmatpush3.bf16.msra.mxu1 %v13917_v24  ;;  %11732 = vmatprep.mubr.msk.f32.mxu1 %vm12868_vm0, %v12869_v10 }
 0x61c   : > { %12419 = vmatprep.subr.bf16.mxu1 %v12867_v3 }
 0x622   : > { %11733 = vmatmul.mubr.f32.vlgmr.msra.gmra.mrb[14].mxu1 %v13889_v30  ;;  %v6491_v30 = vld [vmem:[#allocation5 + $0x4] sm:$0x1] }
 0x623   : > { %12421 = vmatpush3.bf16.msra.mxu1 %v13932_v51  ;;  %11775 = vmatprep.mubr.msk.f32.mxu1 %vm12868_vm0, %v12869_v10  ;;  %v7005_v24 = vsel %vm1961_vm4, %v6491_v30, 0 }
 0x624   : > { %12422 = vmatprep.subr.bf16.mxu1 %v12867_v3  ;;  %v7074_v60 = vand.u32 4294901760, %v7005_v24 }
 0x626   : > { %11776 = vmatmul.mubr.f32.vlgmr.msra.gmra.mrb[16].mxu1 %v6087_v38  ;;  %v7075_v52 = vsub.f32 %v7005_v24, %v7074_v60  ;;  %v12839_v24 = vld [vmem:[%s12999_s15 + $0x4] sm:$0x1] }
 0x627   : > { %12424 = vmatpush3.bf16.msra.mxu1 %v13961_v21  ;;  %11782 = vmatprep.mubr.msk.f32.mxu1 %vm12868_vm0, %v12869_v10 }
 0x628   : > { %12425 = vmatprep.subr.bf16.mxu1 %v12867_v3 }
 0x62e   : > { %11783 = vmatmul.mubr.f32.vlgmr.msra.gmra.mrb[16].mxu1 %v6083_v11 }
 0x62f   : > { %12427 = vmatpush3.bf16.msra.mxu1 %v12426_v37  ;;  %11789 = vmatprep.mubr.msk.f32.mxu1 %vm12868_vm0, %v12869_v10  ;;  %v7076_v37 = vand.u32 4294901760, %v7075_v52 }
 0x630   : > { %12428 = vmatprep.subr.bf16.mxu1 %v12867_v3 }
 0x631   : > { %v7077_v21 = vsub.f32 %v7075_v52, %v7076_v37 }
 0x636   : > { %11790 = vmatmul.mubr.f32.vlgmr.msra.gmra.mrb[16].mxu1 %v6084_v19 }
 0x637   : > { %12430 = vmatpush3.bf16.msra.mxu1 %v13932_v51  ;;  %11796 = vmatprep.mubr.msk.f32.mxu1 %vm12868_vm0, %v12869_v10 }
 0x638   : > { %12431 = vmatprep.subr.bf16.mxu1 %v12867_v3 }
 0x63e   : > { %11797 = vmatmul.mubr.f32.vlgmr.msra.gmra.mrb[16].mxu1 %v6085_v27 }
 0x63f   : > { %12433 = vmatpush3.bf16.msra.mxu1 %v13947_v29  ;;  %11803 = vmatprep.mubr.msk.f32.mxu1 %vm12868_vm0, %v12869_v10  ;;  %v7078_v29 = vand.u32 4294901760, %v7077_v21 }
 0x640   : > { %12434 = vmatprep.subr.bf16.mxu1 %v12867_v3 }
 0x646   : > { %11804 = vmatmul.mubr.f32.vlgmr.msra.gmra.mrb[16].mxu1 %v6083_v11 }
 0x647   : > { %12436 = vmatpush3.bf16.msra.mxu1 %v13932_v51  ;;  %11810 = vmatprep.mubr.msk.f32.mxu1 %vm12868_vm0, %v12869_v10  ;;  %v7482_v51 = vld [vmem:[#allocation5 + $0x5] sm:$0x1] }
 0x648   : > { %12443 = vmatprep.subr.bf16.mxu1 %v12867_v3 }
 0x64e   : > { %11811 = vmatmul.mubr.f32.vlgmr.msra.gmra.mrb[16].mxu1 %v6083_v11 }
 0x64f   : > { %12445 = vmatpush3.bf16.msra.mxu1 %v13950_v18  ;;  %11853 = vmatprep.mubr.msk.f32.mxu1 %vm12868_vm0, %v12869_v10 }
 0x650   : > { %12446 = vmatprep.subr.bf16.mxu1 %v12867_v3 }
 0x652   : > { %11854 = vmatmul.mubr.f32.vlgmr.msra.gmra.mrb[18].mxu1 %v7078_v29 }
 0x653   : > { %12448 = vmatpush3.bf16.msra.mxu1 %v13983_v26  ;;  %11860 = vmatprep.mubr.msk.f32.mxu1 %vm12868_vm0, %v12869_v10  ;;  %v7996_v26 = vsel %vm1961_vm4, %v7482_v51, 0  ;;  %v10633_v51 = vld [vmem:[%s13866_s25 + $0x5] sm:$0x1] }
 0x654   : > { %12449 = vmatprep.subr.bf16.mxu1 %v12867_v3  ;;  %v8065_v36 = vand.u32 4294901760, %v7996_v26 }
 0x656   : > { %v8066_v28 = vsub.f32 %v7996_v26, %v8065_v36 }
 0x65a   : > { %11861 = vmatmul.mubr.f32.vlgmr.msra.gmra.mrb[18].mxu1 %v7074_v60 }
 0x65b   : > { %12451 = vmatpush3.bf16.msra.mxu1 %v12450_v6  ;;  %11867 = vmatprep.mubr.msk.f32.mxu1 %vm12868_vm0, %v12869_v10  ;;  %v8067_v6 = vand.u32 4294901760, %v8066_v28 }
 0x65c   : > { %12452 = vmatprep.subr.bf16.mxu1 %v12867_v3 }
 0x65d   : > { %v8068_v15 = vsub.f32 %v8066_v28, %v8067_v6 }
 0x662   : > { %11868 = vmatmul.mubr.f32.vlgmr.msra.gmra.mrb[18].mxu1 %v7075_v52 }
 0x663   : > { %12454 = vmatpush3.bf16.msra.mxu1 %v13950_v18  ;;  %11874 = vmatprep.mubr.msk.f32.mxu1 %vm12868_vm0, %v12869_v10 }
 0x664   : > { %12455 = vmatprep.subr.bf16.mxu1 %v12867_v3 }
 0x66a   : > { %11875 = vmatmul.mubr.f32.vlgmr.msra.gmra.mrb[18].mxu1 %v7076_v37 }
 0x66b   : > { %12457 = vmatpush3.bf16.msra.mxu1 %v13967_v14  ;;  %11881 = vmatprep.mubr.msk.f32.mxu1 %vm12868_vm0, %v12869_v10  ;;  %v8069_v14 = vand.u32 4294901760, %v8068_v15 }
 0x66c   : > { %12458 = vmatprep.subr.bf16.mxu1 %v12867_v3 }
 0x672   : > { %11882 = vmatmul.mubr.f32.vlgmr.msra.gmra.mrb[18].mxu1 %v7074_v60 }
 0x673   : > { %12460 = vmatpush3.bf16.msra.mxu1 %v13950_v18  ;;  %11888 = vmatprep.mubr.msk.f32.mxu1 %vm12868_vm0, %v12869_v10  ;;  %v8473_v18 = vld [vmem:[#allocation5 + $0x6] sm:$0x1] }
 0x674   : > { %12467 = vmatprep.subr.bf16.mxu1 %v12867_v3  ;;  %v8987_v41 = vsel %vm1961_vm4, %v8473_v18, 0 }
 0x675   : > { %v9056_v9 = vand.u32 4294901760, %v8987_v41 }
 0x677   : > { %v9057_v23 = vsub.f32 %v8987_v41, %v9056_v9 }
 0x67a   : > { %11889 = vmatmul.mubr.f32.vlgmr.msra.gmra.mrb[18].mxu1 %v7074_v60  ;;  %v7003_v60 = vmul.f32 %v12839_v24, %v13873_v62 }
 0x67b   : > { %12469 = vmatpush3.bf16.msra.mxu1 %v13972_v25  ;;  %11931 = vmatprep.mubr.msk.f32.mxu1 %vm12868_vm0, %v12869_v10 }
 0x67c   : > { %12470 = vmatprep.subr.bf16.mxu1 %v12867_v3 }
 0x67e   : > { %11932 = vmatmul.mubr.f32.vlgmr.msra.gmra.mrb[20].mxu1 %v8069_v14 }
 0x67f   : > { %12472 = vmatpush3.bf16.msra.mxu1 %v14007_v32  ;;  %11938 = vmatprep.mubr.msk.f32.mxu1 %vm12868_vm0, %v12869_v10 }
 0x680   : > { %12473 = vmatprep.subr.bf16.mxu1 %v12867_v3 }
 0x686   : > { %11939 = vmatmul.mubr.f32.vlgmr.msra.gmra.mrb[20].mxu1 %v8065_v36 }
 0x687   : > { %12475 = vmatpush3.bf16.msra.mxu1 %v12474_v22  ;;  %11945 = vmatprep.mubr.msk.f32.mxu1 %vm12868_vm0, %v12869_v10  ;;  %v9058_v22 = vand.u32 4294901760, %v9057_v23 }
 0x688   : > { %12476 = vmatprep.subr.bf16.mxu1 %v12867_v3 }
 0x689   : > { %v9059_v55 = vsub.f32 %v9057_v23, %v9058_v22 }
 0x68e   : > { %11946 = vmatmul.mubr.f32.vlgmr.msra.gmra.mrb[20].mxu1 %v8066_v28  ;;  %v8457_v28 = vsub.f32 0.0, %v10633_v51 }
 0x68f   : > { %12478 = vmatpush3.bf16.msra.mxu1 %v13972_v25  ;;  %11952 = vmatprep.mubr.msk.f32.mxu1 %vm12868_vm0, %v12869_v10 }
 0x690   : > { %12479 = vmatprep.subr.bf16.mxu1 %v12867_v3  ;;  %v8458_v15 = vmul.f32 1.442695, %v8457_v28 }
 0x696   : > { %11953 = vmatmul.mubr.f32.vlgmr.msra.gmra.mrb[20].mxu1 %v8067_v6 }
 0x697   : > { %12481 = vmatpush3.bf16.msra.mxu1 %v13989_v44  ;;  %11959 = vmatprep.mubr.msk.f32.mxu1 %vm12868_vm0, %v12869_v10  ;;  %v9060_v44 = vand.u32 4294901760, %v9059_v55 }
 0x698   : > { %12482 = vmatprep.subr.bf16.mxu1 %v12867_v3 }
 0x69e   : > { %11960 = vmatmul.mubr.f32.vlgmr.msra.gmra.mrb[20].mxu1 %v8065_v36 }
 0x69f   : > { %12484 = vmatpush3.bf16.msra.mxu1 %v13972_v25  ;;  %11966 = vmatprep.mubr.msk.f32.mxu1 %vm12868_vm0, %v12869_v10  ;;  %v9464_v25 = vld [vmem:[#allocation5 + $0x7] sm:$0x1] }
 0x6a0   : > { %12491 = vmatprep.subr.bf16.mxu1 %v12867_v3  ;;  %v9978_v46 = vsel %vm1961_vm4, %v9464_v25, 0  ;;  %v10636_v25 = vld [vmem:[%s13866_s25 + $0x6] sm:$0x1] }
 0x6a1   : > { %v10047_v33 = vand.u32 4294901760, %v9978_v46 }
 0x6a3   : > { %v10048_v39 = vsub.f32 %v9978_v46, %v10047_v33 }
 0x6a5   : > { %v10049_v35 = vand.u32 4294901760, %v10048_v39 }
 0x6a6   : > { %11967 = vmatmul.mubr.f32.vlgmr.msra.gmra.mrb[20].mxu1 %v8065_v36 }
 0x6a7   : > { %12493 = vmatpush3.bf16.msra.mxu1 %v13991_v13  ;;  %12009 = vmatprep.mubr.msk.f32.mxu1 %vm12868_vm0, %v12869_v10  ;;  %v10050_v45 = vsub.f32 %v10048_v39, %v10049_v35 }
 0x6a8   : > { %12494 = vmatprep.subr.bf16.mxu1 %v12867_v3 }
 0x6aa   : > { %12010 = vmatmul.mubr.f32.vlgmr.msra.gmra.mrb[22].mxu1 %v9060_v44 }
 0x6ab   : > { %12496 = vmatpush3.bf16.msra.mxu1 %v14024_v16  ;;  %12016 = vmatprep.mubr.msk.f32.mxu1 %vm12868_vm0, %v12869_v10 }
 0x6ac   : > { %12497 = vmatprep.subr.bf16.mxu1 %v12867_v3 }
 0x6b2   : > { %12017 = vmatmul.mubr.f32.vlgmr.msra.gmra.mrb[22].mxu1 %v9056_v9 }
 0x6b3   : > { %12499 = vmatpush3.bf16.msra.mxu1 %v12498_v61  ;;  %12023 = vmatprep.mubr.msk.f32.mxu1 %vm12868_vm0, %v12869_v10  ;;  %v10051_v61 = vand.u32 4294901760, %v10050_v45 }
 0x6b4   : > { %12500 = vmatprep.subr.bf16.mxu1 %v12867_v3 }
 0x6ba   : > { %12024 = vmatmul.mubr.f32.vlgmr.msra.gmra.mrb[22].mxu1 %v9057_v23 }
 0x6bb   : > { %12502 = vmatpush3.bf16.msra.mxu1 %v13991_v13  ;;  %12030 = vmatprep.mubr.msk.f32.mxu1 %vm12868_vm0, %v12869_v10 }
 0x6bc   : > { %12503 = vmatprep.subr.bf16.mxu1 %v12867_v3 }
 0x6c2   : > { %12031 = vmatmul.mubr.f32.vlgmr.msra.gmra.mrb[22].mxu1 %v9058_v22 }
 0x6c3   : > { %12505 = vmatpush3.bf16.msra.mxu1 %v14013_v7  ;;  %12037 = vmatprep.mubr.msk.f32.mxu1 %vm12868_vm0, %v12869_v10 }
 0x6c4   : > { %12506 = vmatprep.subr.bf16.mxu1 %v12867_v3 }
 0x6ca   : > { %12038 = vmatmul.mubr.f32.vlgmr.msra.gmra.mrb[22].mxu1 %v9056_v9 }
 0x6cb   : > { %12508 = vmatpush3.bf16.msra.mxu1 %v13991_v13  ;;  %12044 = vmatprep.mubr.msk.f32.mxu1 %vm12868_vm0, %v12869_v10  ;;  %v12814_v13 = vpop.eup %12813 }
 0x6cc   : > { %12515 = vmatprep.subr.bf16.mxu1 %v12867_v3  ;;  %v5487_v48 = vadd.f32 1.0, %v12814_v13 }
 0x6ce   : > { %12815 = vrcp.f32 %v5487_v48 }
 0x6d2   : > { %12045 = vmatmul.mubr.f32.vlgmr.msra.gmra.mrb[22].mxu1 %v9056_v9  ;;  %v7994_v9 = vmul.f32 %v13800_v20, %v13873_v62 }
 0x6d3   : > { %12517 = vmatpush3.bf16.msra.mxu1 %v14015_v58  ;;  %12087 = vmatprep.mubr.msk.f32.mxu1 %vm12868_vm0, %v12869_v10 }
 0x6d4   : > { %12518 = vmatprep.subr.bf16.mxu1 %v12867_v3 }
 0x6d6   : > { %12088 = vmatmul.mubr.f32.vlgmr.msra.gmra.mrb[24].mxu1 %v10051_v61  ;;  %v12840_v61 = vld [vmem:[%s12999_s15 + $0x6] sm:$0x1] }
 0x6d7   : > { %12520 = vmatpush3.bf16.msra.mxu1 %v14036_v47  ;;  %12094 = vmatprep.mubr.msk.f32.mxu1 %vm12868_vm0, %v12869_v10  ;;  %v7466_v47 = vsub.f32 0.0, %v10630_v5  ;;  %v8985_v20 = vmul.f32 %v12840_v61, %v13873_v62 }
 0x6d8   : > { %12521 = vmatprep.subr.bf16.mxu1 %v12867_v3  ;;  %v12816_v32 = vpop.eup %12815 }
 0x6d9   : > { %v5490_v54 = vmul.f32 %v12816_v32, %v10624_v17  ;;  %v7467_v27 = vmul.f32 1.442695, %v7466_v47 }
 0x6de   : > { %12095 = vmatmul.mubr.f32.vlgmr.msra.gmra.mrb[24].mxu1 %v10047_v33 }
 0x6df   : > { %12523 = vmatpush3.bf16.msra.mxu1 %v12522_v57  ;;  %12101 = vmatprep.mubr.msk.f32.mxu1 %vm12868_vm0, %v12869_v10 }
 0x6e0   : > { %12524 = vmatprep.subr.bf16.mxu1 %v12867_v3 }
 0x6e6   : > { %12102 = vmatmul.mubr.f32.vlgmr.msra.gmra.mrb[24].mxu1 %v10048_v39  ;;  %v9448_v39 = vsub.f32 0.0, %v10636_v25 }
 0x6e7   : > { %12526 = vmatpush3.bf16.msra.mxu1 %v14015_v58  ;;  %12108 = vmatprep.mubr.msk.f32.mxu1 %vm12868_vm0, %v12869_v10 }
 0x6e8   : > { %12527 = vmatprep.subr.bf16.mxu1 %v12867_v3 }
 0x6ee   : > { %12109 = vmatmul.mubr.f32.vlgmr.msra.gmra.mrb[24].mxu1 %v10049_v35  ;;  %v9449_v35 = vmul.f32 1.442695, %v9448_v39 }
 0x6ef   : > { %12529 = vmatpush3.bf16.msra.mxu1 %v14028_v42  ;;  %12115 = vmatprep.mubr.msk.f32.mxu1 %vm12868_vm0, %v12869_v10 }
 0x6f0   : > { %12530 = vmatprep.subr.bf16.mxu1 %v12867_v3  ;;  %v6475_v3 = vsub.f32 0.0, %v10627_v1 }
 0x6f2   : > { %v6476_v8 = vmul.f32 1.442695, %v6475_v3 }
 0x6f4   : > { %12817 = vpow2.f32 %v6476_v8  ;;  %v12841_v8 = vld [vmem:[%s12999_s15 + $0x7] sm:$0x1] }
 0x6f5   : > { %v5480_v53 = vpop.f32.mrb[14].mxu1 }
 0x6f6   : > { %v12539_v7 = vadd.f32 %v5480_v53, %v5021_v43  ;;  %v11734_v59 = vpop.f32.mrb[15].mxu1  ;;  %12116 = vmatmul.mubr.f32.vlgmr.msra.gmra.mrb[24].mxu1 %v10047_v33 }
 0x6f7   : > { %12532 = vmatpush3.bf16.msra.mxu1 %v14015_v58  ;;  %12122 = vmatprep.mubr.msk.f32.mxu1 %vm12868_vm0, %v12869_v10  ;;  %v6012_v58 = vmul.f32 %v12838_v31, %v13873_v62 }
 0x6f8   : > { %v5491_v2 = vmul.f32 %v12539_v7, %v5490_v54  ;;  %v10639_v54 = vld [vmem:[%s13866_s25 + $0x7] sm:$0x1] }
 0x6f9   : > { %v10439_v59 = vsub.f32 0.0, %v10639_v54 }
 0x6fa   : > { %v10451_v49 = vrot.slane %v5491_v2, 6 }
 0x6fb   : > { %v10440_v2 = vmul.f32 1.442695, %v10439_v59 }
 0x6fc   : > { %v10470_v0 = vsel %vm956_vm2, %v13899_v34, %v10451_v49 }
 0x6fe   : > { %12123 = vmatmul.mubr.f32.vlgmr.msra.gmra.mrb[24].mxu1 %v10047_v33  ;;  %v12818_v50 = vpop.eup %12817 }
 0x6ff   : > { %v6478_v57 = vadd.f32 1.0, %v12818_v50  ;;  %v9976_v50 = vmul.f32 %v12841_v8, %v13873_v62 }
 0x701   : > { %12819 = vrcp.f32 %v6478_v57 }
 0x702   : > { %12821 = vpow2.f32 %v7467_v27 }
 0x70b   : > { %v12820_v16 = vpop.eup %12819 }
 0x70c   : > { %v6481_v56 = vmul.f32 %v12820_v16, %v10627_v1  ;;  %v12822_v63 = vpop.eup %12821 }
 0x70d   : > { %v7469_v38 = vadd.f32 1.0, %v12822_v63 }
 0x70f   : > { %12823 = vrcp.f32 %v7469_v38 }
 0x710   : > { %12825 = vpow2.f32 %v8458_v15 }
 0x719   : > { %v12824_v30 = vpop.eup %12823 }
 0x71a   : > { %v7472_v52 = vmul.f32 %v12824_v30, %v10630_v5  ;;  %v12826_v14 = vpop.eup %12825 }
 0x71b   : > { %v8460_v18 = vadd.f32 1.0, %v12826_v14 }
 0x71d   : > { %12827 = vrcp.f32 %v8460_v18 }
 0x71e   : > { %12829 = vpow2.f32 %v9449_v35 }
 0x721   : > { %v6471_v10 = vpop.f32.mrb[16].mxu1 }
 0x722   : > { %v12540_v4 = vadd.f32 %v6471_v10, %v6012_v58  ;;  %v11812_v42 = vpop.f32.mrb[17].mxu1 }
 0x724   : > { %v6482_v11 = vmul.f32 %v12540_v4, %v6481_v56 }
 0x726   : > { %v10454_v34 = vrot.slane %v6482_v11, 5 }
 0x727   : > { %v12828_v41 = vpop.eup %12827 }
 0x728   : > { %v10472_v19 = vsel %vm10471_vm8, %v10470_v0, %v10454_v34  ;;  %v8463_v23 = vmul.f32 %v12828_v41, %v10633_v51  ;;  %v12830_v12 = vpop.eup %12829 }
 0x729   : > { %v9451_v45 = vadd.f32 1.0, %v12830_v12 }
 0x72b   : > { %12831 = vrcp.f32 %v9451_v45 }
 0x72c   : > { %12833 = vpow2.f32 %v10440_v2 }
 0x735   : > { %v12832_v40 = vpop.eup %12831 }
 0x736   : > { %v9454_v13 = vmul.f32 %v12832_v40, %v10636_v25  ;;  %v12834_v49 = vpop.eup %12833 }
 0x737   : > { %v10442_v3 = vadd.f32 1.0, %v12834_v49 }
 0x739   : > { %12835 = vrcp.f32 %v10442_v3 }
 0x743   : > { %v12836_v0 = vpop.eup %12835 }
 0x744   : > { %v10445_v57 = vmul.f32 %v12836_v0, %v10639_v54 }
 0x74d   : > { %v7462_v37 = vpop.f32.mrb[18].mxu1 }
 0x74e   : > { %v12541_v21 = vadd.f32 %v7462_v37, %v7003_v60  ;;  %v11890_v29 = vpop.f32.mrb[19].mxu1 }
 0x750   : > { %v7473_v26 = vmul.f32 %v12541_v21, %v7472_v52 }
 0x752   : > { %v10457_v36 = vrot.slane %v7473_v26, 4 }
 0x754   : > { %v10474_v6 = vsel %vm10473_vm9, %v10472_v19, %v10457_v36 }
 0x779   : > { %v8453_v22 = vpop.f32.mrb[20].mxu1 }
 0x77a   : > { %v12542_v55 = vadd.f32 %v8453_v22, %v7994_v9  ;;  %v11968_v44 = vpop.f32.mrb[21].mxu1 }
 0x77c   : > { %v8464_v46 = vmul.f32 %v12542_v55, %v8463_v23 }
 0x77e   : > { %v10460_v33 = vrot.slane %v8464_v46, 3 }
 0x780   : > { %v10476_v17 = vsel %vm10475_vm10, %v10474_v6, %v10460_v33 }
 0x7a5   : > { %v9444_v48 = vpop.f32.mrb[22].mxu1 }
 0x7a6   : > { %v12543_v32 = vadd.f32 %v9444_v48, %v8985_v20  ;;  %v12046_v43 = vpop.f32.mrb[23].mxu1 }
 0x7a8   : > { %v9455_v53 = vmul.f32 %v12543_v32, %v9454_v13 }
 0x7aa   : > { %v10463_v7 = vrot.slane %v9455_v53, 2 }
 0x7ac   : > { %v10478_v1 = vsel %vm10477_vm11, %v10476_v17, %v10463_v7 }
 0x7d1   : > { %v10435_v16 = vpop.f32.mrb[24].mxu1 }
 0x7d2   : > { %v12544_v31 = vadd.f32 %v10435_v16, %v9976_v50  ;;  %v12124_v58 = vpop.f32.mrb[25].mxu1 }
 0x7d4   : > { %v10446_v56 = vmul.f32 %v12544_v31, %v10445_v57 }
 0x7d6   : > { %v10466_v10 = vrot.slane %v10446_v56, 1 }
 0x7d8   : > { %v10480_v4 = vsel %vm10479_vm12, %v10478_v1, %v10466_v10 }
 0x7d9   : > { %10481 = vst.msk [vmem:[%s386_s14] sm:$0xff] %vm391_vm1, %v10480_v4 }
 0x7da PF: > { %s19_s11 = sadd.s32 1, %s12865_s11   ;;  %s14225_s30 = smov %s12861_s10 }
 0x7db   : > { %p16_p5 = scmp.ge.s32.totalorder %s19_s11, 4   ;;  %s14226_s10 = smov %s14228_s12 }
 0x7dd   :  { %18 = sbr.rel (!%p16_p5) target bundleno = 2 (0x2), region = 128 }

</bundles_post_ra>
